<compile_context>
chip_gen: v6e
topology: v6e:2x2x1
jax: 0.10.0
libtpu: 0.0.40
codegen_flags: <defaults>
</compile_context>

<pallas_src>
import functools

import jax
import jax.numpy as jnp
from jax.experimental import pallas as pl
from jax.experimental.pallas import tpu as pltpu


# ----------------------------------------------------------------------------
# helpers
# ----------------------------------------------------------------------------
def _round_up(x, m):
    return ((x + m - 1) // m) * m


def _pad_to(x, rows, cols):
    r, c = x.shape
    if r == rows and c == cols:
        return x
    return jnp.pad(x, ((0, rows - r), (0, cols - c)))


def _vmem_capacity_bytes():
    """Physical VMEM of the current TPU generation (fallback: 128 MiB)."""
    try:
        return int(getattr(pltpu.get_tpu_info(), "vmem_capacity_bytes"))
    except Exception:
        return 128 * 1024 * 1024


def _is_multi_tensorcore():
    """v7x exposes 2 TensorCores per chip; the gridless fused path would use one."""
    try:
        kind = jax.devices()[0].device_kind.lower()
    except Exception:
        return False
    return "v7" in kind


def _choose_tile(n, max_tile=512):
    """Row/K tile: biggest tile (<=512) whose row padding overhead stays small."""
    n128 = _round_up(n, 128)
    if n128 <= max_tile:
        return n128, n128
    for t in (max_tile, 256, 128):
        n_pad = _round_up(n, t)
        if (n_pad - n) * 8 <= n:          # keep padding overhead under ~12.5%
            return t, n_pad
    return 128, n128


def _compiler_params(dimension_semantics, vmem_need_bytes):
    kwargs = {}
    if dimension_semantics:
        kwargs["dimension_semantics"] = tuple(dimension_semantics)
    # Scoped VMEM default is only 16 MiB on v5e / 32 MiB on v6e+.  Raise it as
    # soon as the working set approaches that, capped with headroom below the
    # generation's physical VMEM (64 MiB v7x / 128 MiB v5e-v6e).
    cap = int(_vmem_capacity_bytes() * 85 // 100)
    if vmem_need_bytes > 8 * 1024 * 1024:
        kwargs["vmem_limit_bytes"] = int(
            min(vmem_need_bytes * 5 // 4 + (2 << 20), cap))
    return pltpu.CompilerParams(**kwargs)


def _fold_bn(p, last, bn_eps, fin_pad, fout_pad):
    """Fold eval-mode BatchNorm1d (init running stats) + bias into padded W'/shift'."""
    fin, fout = p["w"].shape
    if last:                                  # final GraphConv: no BN, no activation
        scale = jnp.ones((fout,), jnp.float32)
        shift = p["b"].astype(jnp.float32)
    else:                                     # running_mean=0, running_var=1
        scale = p["gamma"] / jnp.sqrt(1.0 + bn_eps)
        shift = p["b"] * scale + p["beta"]
    w = p["w"].astype(jnp.float32) * scale[None, :]
    w = _pad_to(w, fin_pad, fout_pad).astype(jnp.bfloat16)       # zero-padded
    shift = jnp.pad(shift, (0, fout_pad - fout)).reshape(1, -1).astype(jnp.float32)
    return w, shift


# ----------------------------------------------------------------------------
# layered path: one K-tiled (aggregate + project + BN/bias + act) kernel / layer
# ----------------------------------------------------------------------------
def _gcn_layer_kernel(a_ref, h_ref, w_ref, shift_ref, o_ref, acc_ref, *, apply_relu):
    k = pl.program_id(1)

    @pl.when(k == 0)
    def _():
        acc_ref[...] = jnp.zeros_like(acc_ref)

    # streamed neighborhood aggregation: (tile_n, tile_k) @ (tile_k, Fin_pad),
    # bf16 MXU operands, f32 accumulation in VMEM scratch.
    acc_ref[...] += jnp.dot(a_ref[...], h_ref[...],
                            preferred_element_type=jnp.float32)

    @pl.when(k == pl.num_programs(1) - 1)
    def _():
        # projection with BN/bias folded into W'/shift'; shift-add/ReLU in f32.
        out = jnp.dot(acc_ref[...].astype(jnp.bfloat16), w_ref[...],
                      preferred_element_type=jnp.float32) + shift_ref[...]
        if apply_relu:
            out = jnp.maximum(out, 0.0)
        o_ref[...] = out.astype(o_ref.dtype)


def _gcn_layer(a_pad, h, w, shift, *, apply_relu, tile_n, tile_k, out_dtype):
    n_pad = a_pad.shape[0]
    fin_pad, fout_pad = w.shape
    out_bytes = jnp.dtype(out_dtype).itemsize
    grid = (n_pad // tile_n, n_pad // tile_k)

    # working set (bytes), incl. f32 accumulator and epilogue temps
    vmem_need = (2 * tile_n * tile_k * 2          # Ahat block, bf16, double-buffered
                 + 2 * tile_k * fin_pad * 2       # H source chunk, bf16, double-buffered
                 + 2 * fin_pad * fout_pad * 2     # W' (grid-invariant, still 2 bufs)
                 + 2 * fout_pad * 4               # shift'
                 + tile_n * fin_pad * 4           # f32 accumulator (scratch)
                 + tile_n * fin_pad * 2           # bf16 cast of acc in epilogue
                 + tile_n * fout_pad * 4          # f32 epilogue result
                 + 2 * tile_n * fout_pad * out_bytes)  # output blocks

    flops = 2 * n_pad * n_pad * fin_pad + 2 * n_pad * fin_pad * fout_pad
    bytes_accessed = (n_pad * n_pad * 2                              # Ahat
                      + (n_pad // tile_n) * n_pad * fin_pad * 2      # H re-read per row tile
                      + fin_pad * fout_pad * 2 + fout_pad * 4
                      + n_pad * fout_pad * out_bytes)

    return pl.pallas_call(
        functools.partial(_gcn_layer_kernel, apply_relu=apply_relu),
        out_shape=jax.ShapeDtypeStruct((n_pad, fout_pad), out_dtype),
        grid=grid,
        in_specs=[
            pl.BlockSpec((tile_n, tile_k), lambda i, k: (i, k)),    # Ahat tile
            pl.BlockSpec((tile_k, fin_pad), lambda i, k: (k, 0)),   # H source chunk
            pl.BlockSpec((fin_pad, fout_pad), lambda i, k: (0, 0)), # W' (invariant)
            pl.BlockSpec((1, fout_pad), lambda i, k: (0, 0)),       # shift'
        ],
        out_specs=pl.BlockSpec((tile_n, fout_pad), lambda i, k: (i, 0)),
        scratch_shapes=[pltpu.VMEM((tile_n, fin_pad), jnp.float32)],
        compiler_params=_compiler_params(("parallel", "arbitrary"), vmem_need),
        cost_estimate=pl.CostEstimate(flops=int(flops), transcendentals=0,
                                      bytes_accessed=int(bytes_accessed)),
    )(a_pad, h, w, shift)


def gcn2_forward_layered(ahat, features, params, bn_eps=1e-5, tile_n=None):
    n = ahat.shape[0]
    n_total = len(params)
    assert n_total >= 2
    n_hidden = params[-2]["w"].shape[1]
    n_classes = params[-1]["w"].shape[1]

    if tile_n is None:
        tile_n, n_pad = _choose_tile(n)
    else:
        tile_n = max(128, _round_up(tile_n, 128))
        n_pad = _round_up(n, tile_n)
    tile_k = tile_n                                   # divides n_pad by construction

    # Ahat padded on BOTH dims (zero rows/cols -> padded nodes never contribute)
    a_pad = _pad_to(ahat, n_pad, n_pad).astype(jnp.bfloat16)

    fin0_pad = _round_up(features.shape[1], 128)
    h = _pad_to(features.astype(jnp.float32), n_pad, fin0_pad).astype(jnp.bfloat16)

    # TODO(synk): when fin_pad >> fout_pad a project-first ordering (H @ W' fused
    # into the K loop) would shrink the streamed operand further; with the 128-lane
    # padding it is a wash for these layer widths, so it is omitted.
    emb_pad = None
    for i, p in enumerate(params):
        last = i == n_total - 1
        fin, fout = p["w"].shape
        fin_pad, fout_pad = _round_up(fin, 128), _round_up(fout, 128)
        w, shift = _fold_bn(p, last, bn_eps, fin_pad, fout_pad)
        out_dtype = jnp.float32 if last else jnp.bfloat16
        h = _gcn_layer(a_pad, h, w, shift, apply_relu=not last,
                       tile_n=tile_n, tile_k=tile_k, out_dtype=out_dtype)
        if i == n_total - 2:
            emb_pad = h                                # g.ndata['emb']

    logits = h[:n, :n_classes]
    emb = emb_pad[:n, :n_hidden].astype(jnp.float32)
    return logits, emb


# ----------------------------------------------------------------------------
# fully fused kernel (small graphs, single-TC parts): all layers, one pallas_call
# ----------------------------------------------------------------------------
def _gcn2_fused_kernel(*refs, n_layers):
    a_ref, h_ref = refs[0], refs[1]
    w_refs = refs[2:2 + n_layers]
    s_refs = refs[2 + n_layers:2 + 2 * n_layers]
    logits_ref, emb_ref = refs[-2], refs[-1]

    a = a_ref[...]                          # bf16 (n_pad, n_pad)
    h = h_ref[...]                          # bf16 (n_pad, fin_pad)
    for l in range(n_layers):               # static unroll; activations stay in VMEM
        agg = jnp.dot(a, h, preferred_element_type=jnp.float32)
        out = jnp.dot(agg.astype(jnp.bfloat16), w_refs[l][...],
                      preferred_element_type=jnp.float32) + s_refs[l][...]
        if l < n_layers - 1:
            out = jnp.maximum(out, 0.0)     # BN already folded into W'/shift'
        if l == n_layers - 2:
            emb_ref[...] = out.astype(emb_ref.dtype)   # g.ndata['emb']
        if l == n_layers - 1:
            logits_ref[...] = out.astype(logits_ref.dtype)
        h = out.astype(jnp.bfloat16)


def gcn2_forward_fused(ahat, features, params, bn_eps=1e-5):
    n = ahat.shape[0]
    n_total = len(params)
    assert n_total >= 2
    n_pad = _round_up(n, 128)
    n_hidden = params[-2]["w"].shape[1]
    n_classes = params[-1]["w"].shape[1]
    hid_pad, cls_pad = _round_up(n_hidden, 128), _round_up(n_classes, 128)

    a = _pad_to(ahat, n_pad, n_pad).astype(jnp.bfloat16)
    fin0_pad = _round_up(features.shape[1], 128)
    h0 = _pad_to(features.astype(jnp.float32), n_pad, fin0_pad).astype(jnp.bfloat16)

    ws, shifts, flops, w_bytes, fmax_pad = [], [], 0, 0, fin0_pad
    for i, p in enumerate(params):
        fin, fout = p["w"].shape
        fin_pad, fout_pad = _round_up(fin, 128), _round_up(fout, 128)
        fmax_pad = max(fmax_pad, fin_pad, fout_pad)
        w, s = _fold_bn(p, i == n_total - 1, bn_eps, fin_pad, fout_pad)
        ws.append(w)
        shifts.append(s)
        flops += 2 * n_pad * n_pad * fin_pad + 2 * n_pad * fin_pad * fout_pad
        w_bytes += fin_pad * fout_pad * 2 + fout_pad * 4

    vmem_need = (n_pad * n_pad * 2 + n_pad * fin0_pad * 2 + w_bytes
                 + 3 * n_pad * fmax_pad * 4            # agg / out / bf16 temps
                 + n_pad * (hid_pad + cls_pad) * 4)
    bytes_accessed = (n_pad * n_pad * 2 + n_pad * fin0_pad * 2 + w_bytes
                      + n_pad * (hid_pad + cls_pad) * 4)

    logits, emb = pl.pallas_call(
        functools.partial(_gcn2_fused_kernel, n_layers=n_total),
        out_shape=(jax.ShapeDtypeStruct((n_pad, cls_pad), jnp.float32),
                   jax.ShapeDtypeStruct((n_pad, hid_pad), jnp.float32)),
        compiler_params=_compiler_params((), vmem_need),
        cost_estimate=pl.CostEstimate(flops=int(flops), transcendentals=0,
                                      bytes_accessed=int(bytes_accessed)),
    )(a, h0, *ws, *shifts)
    return logits[:n, :n_classes], emb[:n, :n_hidden]


# ----------------------------------------------------------------------------
# dispatch
# ----------------------------------------------------------------------------
def gcn2_forward(ahat, features, params, bn_eps=1e-5, tile_n=None):
    # TODO(synk): eval-mode only — training-mode batch statistics / dropout masks
    # are not modeled (dropout is identity, BN uses init-time running stats).
    n = ahat.shape[0]
    n_pad = _round_up(n, 128)
    fmax_pad = max(max(_round_up(p["w"].shape[0], 128),
                       _round_up(p["w"].shape[1], 128)) for p in params)
    fused_bytes = (n_pad * n_pad * 2 + n_pad * fmax_pad * 14
                   + sum(_round_up(p["w"].shape[0], 128)
                         * _round_up(p["w"].shape[1], 128) * 2 for p in params))
    fused_cap = min(24 * 1024 * 1024, _vmem_capacity_bytes() * 35 // 100)
    if (len(params) >= 2 and fused_bytes <= fused_cap
            and not _is_multi_tensorcore()):
        return gcn2_forward_fused(ahat, features, params, bn_eps)
    return gcn2_forward_layered(ahat, features, params, bn_eps, tile_n)


# ----------------------------------------------------------------------------
# params, adjacency normalization, pure-JAX reference
# ----------------------------------------------------------------------------
def init_gcn2_params(key, in_feats, n_hidden, n_classes, n_layers):
    dims = ([(in_feats, n_hidden)]
            + [(n_hidden, n_hidden)] * (n_layers - 1)
            + [(n_hidden, n_classes)])
    params = []
    for (fi, fo) in dims:
        key, kw, kb, kg, kbeta = jax.random.split(key, 5)
        params.append(dict(
            w=jax.random.normal(kw, (fi, fo), jnp.float32) / jnp.sqrt(fi),
            b=0.01 * jax.random.normal(kb, (fo,), jnp.float32),
            gamma=1.0 + 0.1 * jax.random.normal(kg, (fo,), jnp.float32),
            beta=0.1 * jax.random.normal(kbeta, (fo,), jnp.float32),
        ))
    return params


def normalized_adjacency(adj):
    # DGL GraphConv norm='both': D_in^{-1/2} A D_out^{-1/2}, degrees clamped >= 1
    deg_out = jnp.clip(adj.sum(axis=0), 1.0, None)
    deg_in = jnp.clip(adj.sum(axis=1), 1.0, None)
    return adj * (deg_in ** -0.5)[:, None] * (deg_out ** -0.5)[None, :]


def gcn2_forward_ref(ahat, features, params, bn_eps=1e-5):
    h = features
    emb = None
    n_total = len(params)
    for i, p in enumerate(params):
        last = i == n_total - 1
        h = ahat @ h @ p["w"] + p["b"][None, :]
        if not last:
            scale = p["gamma"] / jnp.sqrt(1.0 + bn_eps)
            h = h * scale[None, :] + p["beta"][None, :]
            h = jnp.maximum(h, 0.0)
        if i == n_total - 2:
            emb = h
    return h, emb


if __name__ == "__main__":
    N, IN_FEATS, N_HIDDEN, N_CLASSES, N_LAYERS = 300, 16, 32, 8, 2

    key = jax.random.PRNGKey(0)
    k_adj, k_feat, k_param = jax.random.split(key, 3)

    # random symmetric 0/1 graph without self-loops
    a = (jax.random.uniform(k_adj, (N, N)) < 0.1).astype(jnp.float32)
    a = jnp.maximum(a, a.T) * (1.0 - jnp.eye(N, dtype=jnp.float32))
    ahat = normalized_adjacency(a)

    features = jax.random.normal(k_feat, (N, IN_FEATS), jnp.float32)
    params = init_gcn2_params(k_param, IN_FEATS, N_HIDDEN, N_CLASSES, N_LAYERS)

    # dispatcher: fused single-kernel path for this small graph (layered on v7x)
    logits_f, emb_f = gcn2_forward(ahat, features, params)
    # explicitly exercise the K-tiled layered path: tile 128 -> N padded to 384,
    # grid (3 row tiles 'parallel') x (3 source chunks 'arbitrary') with a
    # f32 VMEM accumulator across the K axis.
    logits_t, emb_t = gcn2_forward_layered(ahat, features, params, tile_n=128)
    logits_f, emb_f, logits_t, emb_t = jax.block_until_ready(
        (logits_f, emb_f, logits_t, emb_t))

    ref_logits, ref_emb = gcn2_forward_ref(ahat, features, params)

    assert logits_f.shape == (N, N_CLASSES) and emb_f.shape == (N, N_HIDDEN)
    assert logits_t.shape == (N, N_CLASSES) and emb_t.shape == (N, N_HIDDEN)
    # bf16 MXU inputs with f32 accumulation -> loosened tolerance vs the f32 ref
    assert jnp.allclose(logits_f, ref_logits, atol=5e-2, rtol=5e-2)
    assert jnp.allclose(emb_f, ref_emb, atol=5e-2, rtol=5e-2)
    assert jnp.allclose(logits_t, ref_logits, atol=5e-2, rtol=5e-2)
    assert jnp.allclose(emb_t, ref_emb, atol=5e-2, rtol=5e-2)
    assert jnp.allclose(logits_f, logits_t, atol=3e-2, rtol=3e-2)

    print("KERNEL_OK")
</pallas_src>

<mosaic_0001>
module attributes {stable_mosaic.version = 11 : i64} {
  func.func @_gcn2_fused_kernel(%arg0: memref<384x384xbf16, #tpu.memory_space<vmem>>, %arg1: memref<384x128xbf16, #tpu.memory_space<vmem>>, %arg2: memref<128x128xbf16, #tpu.memory_space<vmem>>, %arg3: memref<128x128xbf16, #tpu.memory_space<vmem>>, %arg4: memref<128x128xbf16, #tpu.memory_space<vmem>>, %arg5: memref<1x128xf32, #tpu.memory_space<vmem>>, %arg6: memref<1x128xf32, #tpu.memory_space<vmem>>, %arg7: memref<1x128xf32, #tpu.memory_space<vmem>>, %arg8: memref<384x128xf32, #tpu.memory_space<vmem>>, %arg9: memref<384x128xf32, #tpu.memory_space<vmem>>) attributes {dimension_semantics = [], scalar_prefetch = 0 : i64, scratch_operands = 0 : i64, tpu.core_type = #tpu.core_type<tc>} {
    %c0 = arith.constant 0 : index
    %c0_0 = arith.constant 0 : index
    %0 = vector.load %arg0[%c0, %c0_0] : memref<384x384xbf16, #tpu.memory_space<vmem>>, vector<384x384xbf16>
    %c0_1 = arith.constant 0 : index
    %c0_2 = arith.constant 0 : index
    %1 = vector.load %arg1[%c0_1, %c0_2] : memref<384x128xbf16, #tpu.memory_space<vmem>>, vector<384x128xbf16>
    %cst = arith.constant dense<0.000000e+00> : vector<384x128xf32>
    %2 = tpu.matmul %0, %1, %cst {dimension_numbers = #tpu.dot_dimension_numbers<[1], [0], [0], [1], [0, 0, 1, 1], [], []>} : vector<384x384xbf16>, vector<384x128xbf16>, vector<384x128xf32> -> vector<384x128xf32>
    %3 = arith.truncf %2 : vector<384x128xf32> to vector<384x128xbf16>
    %c0_3 = arith.constant 0 : index
    %c0_4 = arith.constant 0 : index
    %4 = vector.load %arg2[%c0_3, %c0_4] : memref<128x128xbf16, #tpu.memory_space<vmem>>, vector<128x128xbf16>
    %cst_5 = arith.constant dense<0.000000e+00> : vector<384x128xf32>
    %5 = tpu.matmul %3, %4, %cst_5 {dimension_numbers = #tpu.dot_dimension_numbers<[1], [0], [0], [1], [0, 0, 1, 1], [], []>} : vector<384x128xbf16>, vector<128x128xbf16>, vector<384x128xf32> -> vector<384x128xf32>
    %c0_6 = arith.constant 0 : index
    %c0_7 = arith.constant 0 : index
    %6 = vector.load %arg5[%c0_6, %c0_7] : memref<1x128xf32, #tpu.memory_space<vmem>>, vector<1x128xf32>
    %7 = vector.broadcast %6 : vector<1x128xf32> to vector<384x128xf32>
    %8 = arith.addf %5, %7 : vector<384x128xf32>
    %cst_8 = arith.constant 0.000000e+00 : f32
    %9 = vector.broadcast %cst_8 : f32 to vector<384x128xf32>
    %10 = arith.maximumf %8, %9 : vector<384x128xf32>
    %11 = arith.truncf %10 : vector<384x128xf32> to vector<384x128xbf16>
    %cst_9 = arith.constant dense<0.000000e+00> : vector<384x128xf32>
    %12 = tpu.matmul %0, %11, %cst_9 {dimension_numbers = #tpu.dot_dimension_numbers<[1], [0], [0], [1], [0, 0, 1, 1], [], []>} : vector<384x384xbf16>, vector<384x128xbf16>, vector<384x128xf32> -> vector<384x128xf32>
    %13 = arith.truncf %12 : vector<384x128xf32> to vector<384x128xbf16>
    %c0_10 = arith.constant 0 : index
    %c0_11 = arith.constant 0 : index
    %14 = vector.load %arg3[%c0_10, %c0_11] : memref<128x128xbf16, #tpu.memory_space<vmem>>, vector<128x128xbf16>
    %cst_12 = arith.constant dense<0.000000e+00> : vector<384x128xf32>
    %15 = tpu.matmul %13, %14, %cst_12 {dimension_numbers = #tpu.dot_dimension_numbers<[1], [0], [0], [1], [0, 0, 1, 1], [], []>} : vector<384x128xbf16>, vector<128x128xbf16>, vector<384x128xf32> -> vector<384x128xf32>
    %c0_13 = arith.constant 0 : index
    %c0_14 = arith.constant 0 : index
    %16 = vector.load %arg6[%c0_13, %c0_14] : memref<1x128xf32, #tpu.memory_space<vmem>>, vector<1x128xf32>
    %17 = vector.broadcast %16 : vector<1x128xf32> to vector<384x128xf32>
    %18 = arith.addf %15, %17 : vector<384x128xf32>
    %cst_15 = arith.constant 0.000000e+00 : f32
    %19 = vector.broadcast %cst_15 : f32 to vector<384x128xf32>
    %20 = arith.maximumf %18, %19 : vector<384x128xf32>
    %c0_16 = arith.constant 0 : index
    %c0_17 = arith.constant 0 : index
    %21 = vector.load %arg9[%c0_16, %c0_17] : memref<384x128xf32, #tpu.memory_space<vmem>>, vector<384x128xf32>
    tpu.vector_store %arg9[%c0_16, %c0_17], %20 {strides = array<i32>} : memref<384x128xf32, #tpu.memory_space<vmem>>, vector<384x128xf32>,
    %22 = arith.truncf %20 : vector<384x128xf32> to vector<384x128xbf16>
    %cst_18 = arith.constant dense<0.000000e+00> : vector<384x128xf32>
    %23 = tpu.matmul %0, %22, %cst_18 {dimension_numbers = #tpu.dot_dimension_numbers<[1], [0], [0], [1], [0, 0, 1, 1], [], []>} : vector<384x384xbf16>, vector<384x128xbf16>, vector<384x128xf32> -> vector<384x128xf32>
    %24 = arith.truncf %23 : vector<384x128xf32> to vector<384x128xbf16>
    %c0_19 = arith.constant 0 : index
    %c0_20 = arith.constant 0 : index
    %25 = vector.load %arg4[%c0_19, %c0_20] : memref<128x128xbf16, #tpu.memory_space<vmem>>, vector<128x128xbf16>
    %cst_21 = arith.constant dense<0.000000e+00> : vector<384x128xf32>
    %26 = tpu.matmul %24, %25, %cst_21 {dimension_numbers = #tpu.dot_dimension_numbers<[1], [0], [0], [1], [0, 0, 1, 1], [], []>} : vector<384x128xbf16>, vector<128x128xbf16>, vector<384x128xf32> -> vector<384x128xf32>
    %c0_22 = arith.constant 0 : index
    %c0_23 = arith.constant 0 : index
    %27 = vector.load %arg7[%c0_22, %c0_23] : memref<1x128xf32, #tpu.memory_space<vmem>>, vector<1x128xf32>
    %28 = vector.broadcast %27 : vector<1x128xf32> to vector<384x128xf32>
    %29 = arith.addf %26, %28 : vector<384x128xf32>
    %c0_24 = arith.constant 0 : index
    %c0_25 = arith.constant 0 : index
    %30 = vector.load %arg8[%c0_24, %c0_25] : memref<384x128xf32, #tpu.memory_space<vmem>>, vector<384x128xf32>
    tpu.vector_store %arg8[%c0_24, %c0_25], %29 {strides = array<i32>} : memref<384x128xf32, #tpu.memory_space<vmem>>, vector<384x128xf32>,
    return
  }
}

</mosaic_0001>

<bundles_post_ra>
// kernel: tpu_custom_call.1
= control target key start
LH: loop header
LB: loop body
LE: loop exit
PB: predicated region body
PF: predicated region fallthrough
CT: control target
= control target key end

     0   :  { %15 = vsyncpa [#allocation3], 0  ;;  %s5048_s0 = inlined_call_operand.hbm [shape: bf16[384,384], index: 0, kind: input, shape index: {}]   ;;  %s5049_s1 = inlined_call_operand.hbm [shape: bf16[384,128], index: 1, kind: input, shape index: {}]   ;;  %s5050_s2 = inlined_call_operand.hbm [shape: bf16[128,128], index: 2, kind: input, shape index: {}]   ;;  %s5051_s3 = inlined_call_operand.hbm [shape: bf16[128,128], index: 3, kind: input, shape index: {}]   ;;  %s5052_s4 = inlined_call_operand.hbm [shape: bf16[128,128], index: 4, kind: input, shape index: {}]   ;;  %s5053_s5 = inlined_call_operand.vmem [shape: f32[1,128], index: 5, kind: input, shape index: {}]   ;;  %s5054_s6 = inlined_call_operand.vmem [shape: f32[1,128], index: 6, kind: input, shape index: {}]   ;;  %s5055_s7 = inlined_call_operand.vmem [shape: f32[1,128], index: 7, kind: input, shape index: {}]   ;;  %s5056_s8 = inlined_call_operand.hbm [shape: f32[384,128], index: 8, kind: output, shape index: {0}]   ;;  %s5057_s9 = inlined_call_operand.hbm [shape: f32[384,128], index: 9, kind: output, shape index: {1}]  }
   0x1   :  { %16 = vsyncpa [#allocation6], 0 }
   0x2   :  { %17 = vsyncpa [#allocation9], 0 }
   0x3   :  { %18 = vsyncpa [#allocation4], 0 }
   0x4   :  { %19 = vsyncpa [#allocation13], 0  ;;  %s4524_s30 = smov [#allocation5]  }
   0x5   :  { %s37_s10 = sshll.u32 %s4524_s30, 4  ;;  %s38_s10 = int_to_ptr.vmem [resolvable:$true] %s37_s10 }
   0x6   :  { %s4382_s11 = scalar_lea.vmem %s38_s10, 3072  ;;  %p4387_p1 = scmp.lt.s32.totalorder %s38_s10, %s38_s10 }
   0x7   :  { %p4383_p0 = scmp.ne.s32.totalorder %s38_s10, %s4382_s11  ;;  %p4388_p2 = scmp.lt.s32.totalorder %s4382_s11, %s4382_s11 }
   0x9   :  { %p4389_p3 = por %p4388_p2, %p4387_p1 }
   0xb   :  { %p4390_p4 = pnand %p4389_p3, %p4383_p0 }
   0xd   :  { %4393 = shalt.err (!%p4390_p4)
}
   0xe   :  { %s4525_s12 = smov 64   ;;  %s4526_s13 = smov 4  }
   0xf   :  { %43 = dma.hbm_to_vmem [thread:$0]  %s5049_s1, 3072, %s38_s10, [#allocation6], %s4525_s12, %s4525_s12, %s4526_s13  }
  0x10   :  { %s4527_s16 = smov [#allocation8]   ;;  %s4528_s18 = smov [#allocation2]  }
  0x11   :  { %s61_s17 = sshll.u32 %s4527_s16, 4  ;;  %s25_s19 = sshll.u32 %s4528_s18, 4  ;;  %s62_s17 = int_to_ptr.vmem [resolvable:$true] %s61_s17  ;;  %s26_s19 = int_to_ptr.vmem [resolvable:$true] %s25_s19 }
  0x12   :  { %s4402_s20 = scalar_lea.vmem %s62_s17, 1024  ;;  %p4407_p6 = scmp.lt.s32.totalorder %s62_s17, %s62_s17 }
  0x13   :  { %p4403_p5 = scmp.ne.s32.totalorder %s62_s17, %s4402_s20  ;;  %p4408_p7 = scmp.lt.s32.totalorder %s4402_s20, %s4402_s20 }
  0x15   :  { %p4409_p8 = por %p4408_p7, %p4407_p6 }
  0x17   :  { %p4410_p9 = pnand %p4409_p8, %p4403_p5 }
  0x19   :  { %4413 = shalt.err (!%p4410_p9)
}
  0x1a   :  { %67 = dma.hbm_to_vmem [thread:$0]  %s5051_s3, 1024, %s62_s17, [#allocation9], %s4525_s12, %s4525_s12, %s4526_s13  }
  0x1b   :  { %s4422_s1 = scalar_lea.vmem %s26_s19, 9216  ;;  %p4427_p11 = scmp.lt.s32.totalorder %s26_s19, %s26_s19 }
  0x1c   :  { %p4423_p10 = scmp.ne.s32.totalorder %s26_s19, %s4422_s1  ;;  %p4428_p12 = scmp.lt.s32.totalorder %s4422_s1, %s4422_s1 }
  0x1e   :  { %p4429_p13 = por %p4428_p12, %p4427_p11 }
  0x20   :  { %p4430_p0 = pnand %p4429_p13, %p4423_p10 }
  0x22   :  { %4433 = shalt.err (!%p4430_p0)
}
  0x23   :  { %s4529_s23 = smov 192   ;;  %s4530_s24 = smov 12  }
  0x24   :  { %31 = dma.hbm_to_vmem [thread:$0]  %s5048_s0, 9216, %s26_s19, [#allocation3], %s4529_s23, %s4529_s23, %s4530_s24  }
  0x25   :  { %s4531_s27 = smov [#allocation7]   ;;  %s4532_s29 = smov [#allocation10]  }
  0x26   :  { %s49_s28 = sshll.u32 %s4531_s27, 4  ;;  %s73_s30 = sshll.u32 %s4532_s29, 4  ;;  %s50_s28 = int_to_ptr.vmem [resolvable:$true] %s49_s28  ;;  %s74_s30 = int_to_ptr.vmem [resolvable:$true] %s73_s30 }
  0x27   :  { %s4442_s3 = scalar_lea.vmem %s50_s28, 1024  ;;  %p4447_p2 = scmp.lt.s32.totalorder %s50_s28, %s50_s28 }
  0x28   :  { %p4443_p1 = scmp.ne.s32.totalorder %s50_s28, %s4442_s3  ;;  %p4448_p3 = scmp.lt.s32.totalorder %s4442_s3, %s4442_s3 }
  0x2a   :  { %p4449_p4 = por %p4448_p3, %p4447_p2 }
  0x2c   :  { %p4450_p5 = pnand %p4449_p4, %p4443_p1 }
  0x2e   :  { %4453 = shalt.err (!%p4450_p5)
}
  0x2f   :  { %55 = dma.hbm_to_vmem [thread:$0]  %s5050_s2, 1024, %s50_s28, [#allocation6], %s4525_s12, %s4525_s12, %s4526_s13  }
  0x30   :  { %s4462_s0 = scalar_lea.vmem %s74_s30, 1024  ;;  %p4467_p7 = scmp.lt.s32.totalorder %s74_s30, %s74_s30 }
  0x31   :  { %p4463_p6 = scmp.ne.s32.totalorder %s74_s30, %s4462_s0  ;;  %p4468_p8 = scmp.lt.s32.totalorder %s4462_s0, %s4462_s0 }
  0x33   :  { %p4469_p9 = por %p4468_p8, %p4467_p7 }
  0x35   :  { %p4470_p10 = pnand %p4469_p9, %p4463_p6 }
  0x37   :  { %4473 = shalt.err (!%p4470_p10)
}
  0x38   :  { %79 = dma.hbm_to_vmem [thread:$0]  %s5052_s4, 1024, %s74_s30, [#allocation9], %s4525_s12, %s4525_s12, %s4526_s13  }
  0x39   :  { %4514 = dma.done.wait [#allocation3], 9216  }
  0x3a   :  { %4515 = vsyncadd [#allocation3], 4294958080 }
  0x3b   :  { %4516 = dma.done.wait [#allocation6], 4096  }
  0x3c   :  { %4517 = vsyncadd [#allocation6], 4294963200 }
  0x3d   :  { %4518 = dma.done.wait [#allocation9], 2048  }
  0x3e   :  { %4519 = vsyncadd [#allocation9], 4294965248  ;;  %v4533_v0 = vmov 0   ;;  %v4088_v1 = vld [vmem:[#allocation5 + $0x38] sm:$0xff]   ;;  %v4089_v2 = vld [vmem:[#allocation5 + $0x30] sm:$0xff]  }
  0x3f   :  { %774 = vmatprep.subr.bf16.mxu0 %v4533_v0  ;;  %v4090_v3 = vld [vmem:[#allocation5 + $0x28] sm:$0xff]   ;;  %v4096_v4 = vld [vmem:[#allocation5 + $0xb8] sm:$0xff]   ;;  %v4091_v5 = vld [vmem:[#allocation5 + $0x20] sm:$0xff]  }
  0x40   :  { %775 = vmatpush1.bf16.msra.mxu0 %v4088_v1  ;;  %3674 = vmatprep.subr.bf16.mxu1 %v4096_v4  ;;  %v4098_v6 = vld [vmem:[#allocation5 + $0xb0] sm:$0xff]   ;;  %v4100_v7 = vld [vmem:[#allocation5 + $0xa8] sm:$0xff]   ;;  %v4092_v8 = vld [vmem:[#allocation5 + $0x18] sm:$0xff]  }
  0x41   :  { %776 = vmatprep.subr.bf16.mxu0 %v4533_v0  ;;  %3675 = vmatpush3.bf16.msra.mxu1 %v4096_v4  ;;  %v4102_v9 = vld [vmem:[#allocation5 + $0xa0] sm:$0xff]   ;;  %v4093_v10 = vld [vmem:[#allocation5 + $0x10] sm:$0xff]   ;;  %v4104_v11 = vld [vmem:[#allocation5 + $0x98] sm:$0xff]  }
  0x42   :  { %3676 = vmatprep.subr.bf16.mxu1 %v4098_v6  ;;  %v4094_v12 = vld [vmem:[#allocation5 + $0x8] sm:$0xff]   ;;  %v4106_v13 = vld [vmem:[#allocation5 + $0x90] sm:$0xff]   ;;  %v4095_v15 = vld [vmem:[#allocation5] sm:$0xff]  }
  0x43   :  { %v4622_v14 = vld [vmem:[#allocation2 + $0x8] ss:$12 sps:$4 sm:$0xff]   ;;  %v4114_v16 = vld [vmem:[#allocation2 + $0x4] ss:$12 sps:$4 sm:$0xff]   ;;  %v4097_v18 = vld [vmem:[#allocation5 + $0x78] sm:$0xff]  }
  0x44   :  { %777 = vmatpush1.bf16.msra.mxu0 %v4089_v2  ;;  %3690 = vmatprep.mubr.bf16.mxu1 %v4622_v14  ;;  %v4108_v17 = vld [vmem:[#allocation5 + $0x88] sm:$0xff]   ;;  %v4110_v19 = vld [vmem:[#allocation5 + $0x80] sm:$0xff]   ;;  %v4099_v20 = vld [vmem:[#allocation5 + $0x70] sm:$0xff]  }
  0x45   :  { %778 = vmatprep.subr.bf16.mxu0 %v4533_v0  ;;  %3677 = vmatpush3.bf16.msra.mxu1 %v4098_v6  ;;  %v4101_v21 = vld [vmem:[#allocation5 + $0x68] sm:$0xff]   ;;  %v4120_v23 = vld [vmem:[#allocation2 + $0x38] ss:$12 sps:$4 sm:$0xff]   ;;  %v4121_v26 = vld [vmem:[#allocation2 + $0x50] ss:$12 sps:$4 sm:$0xff]  }
  0x46   :  { %3678 = vmatprep.subr.bf16.mxu1 %v4100_v7  ;;  %806 = vmatprep.mubr.bf16.mxu0 %v4114_v16  ;;  %v4113_v22 = vld [vmem:[#allocation2 + $0x20] ss:$12 sps:$4 sm:$0xff]   ;;  %v4105_v25 = vld [vmem:[#allocation5 + $0x58] sm:$0xff]   ;;  %v4128_v27 = vld [vmem:[#allocation2 + $0x68] ss:$12 sps:$4 sm:$0xff]  }
  0x47   :  { %v4103_v24 = vld [vmem:[#allocation5 + $0x60] sm:$0xff]   ;;  %v4107_v28 = vld [vmem:[#allocation5 + $0x50] sm:$0xff]   ;;  %v4109_v29 = vld [vmem:[#allocation5 + $0x48] sm:$0xff]  }
  0x48   :  { %779 = vmatpush1.bf16.msra.mxu0 %v4090_v3  ;;  %v4129_v30 = vld [vmem:[#allocation2 + $0x80] ss:$12 sps:$4 sm:$0xff]   ;;  %v4136_v31 = vld [vmem:[#allocation2 + $0x98] ss:$12 sps:$4 sm:$0xff]   ;;  %v4117_v34 = vld [vmem:[#allocation2 + $0x1c] ss:$12 sps:$4 sm:$0xff]  }
  0x49   :  { %780 = vmatprep.subr.bf16.mxu0 %v4533_v0  ;;  %3679 = vmatpush3.bf16.msra.mxu1 %v4100_v7  ;;  %v4111_v32 = vld [vmem:[#allocation5 + $0x40] sm:$0xff]   ;;  %v4137_v35 = vld [vmem:[#allocation2 + $0xb0] ss:$12 sps:$4 sm:$0xff]   ;;  %v4144_v36 = vld [vmem:[#allocation2 + $0xc8] ss:$12 sps:$4 sm:$0xff]  }
  0x4a   :  { %3680 = vmatprep.subr.bf16.mxu1 %v4102_v9  ;;  %v4116_v33 = vld [vmem:[#allocation2] ss:$12 sps:$4 sm:$0xff]   ;;  %v4119_v37 = vld [vmem:[#allocation2 + $0x18] ss:$12 sps:$4 sm:$0xff]   ;;  %v4124_v41 = vld [vmem:[#allocation2 + $0x30] ss:$12 sps:$4 sm:$0xff]  }
  0x4b   :  { %v4122_v38 = vld [vmem:[#allocation2 + $0x34] ss:$12 sps:$4 sm:$0xff]   ;;  %v4152_v40 = vld [vmem:[#allocation2 + $0xf8] ss:$12 sps:$4 sm:$0xff]   ;;  %v4153_v43 = vld [vmem:[#allocation2 + $0x110] ss:$12 sps:$4 sm:$0xff]  }
  0x4c   :  { %781 = vmatpush1.bf16.msra.mxu0 %v4091_v5  ;;  %v4145_v39 = vld [vmem:[#allocation2 + $0xe0] ss:$12 sps:$4 sm:$0xff]   ;;  %v4160_v44 = vld [vmem:[#allocation2 + $0x128] ss:$12 sps:$4 sm:$0xff]   ;;  %v4130_v46 = vld [vmem:[#allocation2 + $0x64] ss:$12 sps:$4 sm:$0xff]  }
  0x4d   :  { %782 = vmatprep.subr.bf16.mxu0 %v4533_v0  ;;  %3681 = vmatpush3.bf16.msra.mxu1 %v4102_v9  ;;  %v4125_v42 = vld [vmem:[#allocation2 + $0x4c] ss:$12 sps:$4 sm:$0xff]   ;;  %v4127_v45 = vld [vmem:[#allocation2 + $0x48] ss:$12 sps:$4 sm:$0xff]   ;;  %v4169_v51 = vld [vmem:[#allocation2 + $0x170] ss:$12 sps:$4 sm:$0xff]  }
  0x4e   :  { %3682 = vmatprep.subr.bf16.mxu1 %v4104_v11  ;;  %v4161_v47 = vld [vmem:[#allocation2 + $0x140] ss:$12 sps:$4 sm:$0xff]   ;;  %v4168_v48 = vld [vmem:[#allocation2 + $0x158] ss:$12 sps:$4 sm:$0xff]   ;;  %v4133_v50 = vld [vmem:[#allocation2 + $0x7c] ss:$12 sps:$4 sm:$0xff]  }
  0x4f   :  { %v4132_v49 = vld [vmem:[#allocation2 + $0x60] ss:$12 sps:$4 sm:$0xff]   ;;  %v4176_v52 = vld [vmem:[#allocation2 + $0x188] ss:$12 sps:$4 sm:$0xff]   ;;  %v4135_v53 = vld [vmem:[#allocation2 + $0x78] ss:$12 sps:$4 sm:$0xff]  }
  0x50   :  { %783 = vmatpush1.bf16.msra.mxu0 %v4092_v8  ;;  %v4138_v54 = vld [vmem:[#allocation2 + $0x94] ss:$12 sps:$4 sm:$0xff]   ;;  %v4184_v56 = vld [vmem:[#allocation2 + $0x1b8] ss:$12 sps:$4 sm:$0xff]   ;;  %v4140_v57 = vld [vmem:[#allocation2 + $0x90] ss:$12 sps:$4 sm:$0xff]  }
  0x51   :  { %784 = vmatprep.subr.bf16.mxu0 %v4533_v0  ;;  %3683 = vmatpush3.bf16.msra.mxu1 %v4104_v11  ;;  %v4177_v55 = vld [vmem:[#allocation2 + $0x1a0] ss:$12 sps:$4 sm:$0xff]   ;;  %v4185_v59 = vld [vmem:[#allocation2 + $0x1d0] ss:$12 sps:$4 sm:$0xff]   ;;  %v4192_v60 = vld [vmem:[#allocation2 + $0x1e8] ss:$12 sps:$4 sm:$0xff]  }
  0x52   :  { %3684 = vmatprep.subr.bf16.mxu1 %v4106_v13  ;;  %v4141_v58 = vld [vmem:[#allocation2 + $0xac] ss:$12 sps:$4 sm:$0xff]   ;;  %v4206_v62 = vld [vmem:[#allocation7 + $0x30] sm:$0xff]   ;;  %v4211_v5 = vld [vmem:[#allocation7 + $0x20] sm:$0xff]  }
  0x53   :  { %v4205_v61 = vld [vmem:[#allocation7 + $0x38] sm:$0xff]   ;;  %v4143_v63 = vld [vmem:[#allocation2 + $0xa8] ss:$12 sps:$4 sm:$0xff]   ;;  %v4146_v1 = vld [vmem:[#allocation2 + $0xc4] ss:$12 sps:$4 sm:$0xff]  }
  0x54   :  { %785 = vmatpush1.bf16.msra.mxu0 %v4093_v10  ;;  %v4193_v2 = vld [vmem:[#allocation2 + $0x200] ss:$12 sps:$4 sm:$0xff]   ;;  %v4200_v3 = vld [vmem:[#allocation2 + $0x218] ss:$12 sps:$4 sm:$0xff]   ;;  %v4149_v7 = vld [vmem:[#allocation2 + $0xdc] ss:$12 sps:$4 sm:$0xff]  }
  0x55   :  { %786 = vmatprep.subr.bf16.mxu0 %v4533_v0  ;;  %3685 = vmatpush3.bf16.msra.mxu1 %v4106_v13  ;;  %v4210_v4 = vld [vmem:[#allocation7 + $0x28] sm:$0xff]   ;;  %v4201_v8 = vld [vmem:[#allocation2 + $0x230] ss:$12 sps:$4 sm:$0xff]   ;;  %v4151_v11 = vld [vmem:[#allocation2 + $0xd8] ss:$12 sps:$4 sm:$0xff]  }
  0x56   :  { %3686 = vmatprep.subr.bf16.mxu1 %v4108_v17  ;;  %v4148_v6 = vld [vmem:[#allocation2 + $0xc0] ss:$12 sps:$4 sm:$0xff]   ;;  %v4212_v9 = vld [vmem:[#allocation7 + $0x18] sm:$0xff]   ;;  %v4213_v10 = vld [vmem:[#allocation7 + $0x10] sm:$0xff]  }
  0x57   :  { %v4214_v13 = vld [vmem:[#allocation7 + $0x8] sm:$0xff]   ;;  %v4156_v16 = vld [vmem:[#allocation2 + $0xf0] ss:$12 sps:$4 sm:$0xff]  }
  0x58   :  { %787 = vmatpush1.bf16.msra.mxu0 %v4094_v12  ;;  %v4154_v12 = vld [vmem:[#allocation2 + $0xf4] ss:$12 sps:$4 sm:$0xff]  }
  0x59   :  { %788 = vmatprep.subr.bf16.mxu0 %v4533_v0  ;;  %3687 = vmatpush3.bf16.msra.mxu1 %v4108_v17  ;;  %v4157_v17 = vld [vmem:[#allocation2 + $0x10c] ss:$12 sps:$4 sm:$0xff]  }
  0x5a   :  { %3688 = vmatprep.subr.bf16.mxu1 %v4110_v19 }
  0x5c   :  { %789 = vmatpush1.bf16.msra.mxu0 %v4095_v15  ;;  %v4215_v15 = vld [vmem:[#allocation7] sm:$0xff]  }
  0x5d   :  { %790 = vmatprep.subr.bf16.mxu0 %v4533_v0  ;;  %3689 = vmatpush3.bf16.msra.mxu1 %v4110_v19  ;;  %v4162_v19 = vld [vmem:[#allocation2 + $0x124] ss:$12 sps:$4 sm:$0xff]  }
  0x5e   :  { %3738 = vmatprep.subr.bf16.mxu1 %v4205_v61 }
  0x60   :  { %791 = vmatpush2.bf16.msra.mxu0 %v4097_v18  ;;  %3691 = vmatmul.mubr.bf16.vlgmr.msra.gmra.mxu1 %v4113_v22  ;;  %v4159_v18 = vld [vmem:[#allocation2 + $0x108] ss:$12 sps:$4 sm:$0xff]   ;;  %v4167_v22 = vld [vmem:[#allocation2 + $0x138] ss:$12 sps:$4 sm:$0xff]  }
  0x61   :  { %792 = vmatprep.subr.bf16.mxu0 %v4533_v0  ;;  %3694 = vmatprep.mubr.bf16.mxu1 %v4120_v23  ;;  %v4170_v23 = vld [vmem:[#allocation2 + $0x154] ss:$12 sps:$4 sm:$0xff]  }
  0x62   :  { %3739 = vmatpush3.bf16.msra.mxu1 %v4205_v61 }
  0x63   :  { %3740 = vmatprep.subr.bf16.mxu1 %v4206_v62 }
  0x64   :  { %793 = vmatpush2.bf16.msra.mxu0 %v4099_v20  ;;  %v4164_v20 = vld [vmem:[#allocation2 + $0x120] ss:$12 sps:$4 sm:$0xff]  }
  0x65   :  { %794 = vmatprep.subr.bf16.mxu0 %v4533_v0 }
  0x66   :  { %3741 = vmatpush3.bf16.msra.mxu1 %v4206_v62 }
  0x67   :  { %3742 = vmatprep.subr.bf16.mxu1 %v4210_v4 }
  0x68   :  { %795 = vmatpush2.bf16.msra.mxu0 %v4101_v21  ;;  %3695 = vmatmul.mubr.bf16.gmra.mxu1 %v4121_v26  ;;  %v4165_v21 = vld [vmem:[#allocation2 + $0x13c] ss:$12 sps:$4 sm:$0xff]  }
  0x69   :  { %796 = vmatprep.subr.bf16.mxu0 %v4533_v0  ;;  %3698 = vmatprep.mubr.bf16.mxu1 %v4128_v27  ;;  %v4175_v26 = vld [vmem:[#allocation2 + $0x168] ss:$12 sps:$4 sm:$0xff]   ;;  %v4178_v27 = vld [vmem:[#allocation2 + $0x184] ss:$12 sps:$4 sm:$0xff]  }
  0x6a   :  { %3743 = vmatpush3.bf16.msra.mxu1 %v4210_v4 }
  0x6b   :  { %3744 = vmatprep.subr.bf16.mxu1 %v4211_v5 }
  0x6c   :  { %797 = vmatpush2.bf16.msra.mxu0 %v4103_v24  ;;  %v4172_v24 = vld [vmem:[#allocation2 + $0x150] ss:$12 sps:$4 sm:$0xff]  }
  0x6d   :  { %798 = vmatprep.subr.bf16.mxu0 %v4533_v0 }
  0x6e   :  { %3745 = vmatpush3.bf16.msra.mxu1 %v4211_v5 }
  0x6f   :  { %3746 = vmatprep.subr.bf16.mxu1 %v4212_v9 }
  0x70   :  { %799 = vmatpush2.bf16.msra.mxu0 %v4105_v25  ;;  %3699 = vmatmul.mubr.bf16.gmra.mxu1 %v4129_v30  ;;  %v4173_v25 = vld [vmem:[#allocation2 + $0x16c] ss:$12 sps:$4 sm:$0xff]  }
  0x71   :  { %800 = vmatprep.subr.bf16.mxu0 %v4533_v0  ;;  %3702 = vmatprep.mubr.bf16.mxu1 %v4136_v31  ;;  %v4183_v30 = vld [vmem:[#allocation2 + $0x198] ss:$12 sps:$4 sm:$0xff]   ;;  %v4186_v31 = vld [vmem:[#allocation2 + $0x1b4] ss:$12 sps:$4 sm:$0xff]  }
  0x72   :  { %3747 = vmatpush3.bf16.msra.mxu1 %v4212_v9 }
  0x73   :  { %3748 = vmatprep.subr.bf16.mxu1 %v4213_v10 }
  0x74   :  { %801 = vmatpush2.bf16.msra.mxu0 %v4107_v28  ;;  %v4180_v28 = vld [vmem:[#allocation2 + $0x180] ss:$12 sps:$4 sm:$0xff]  }
  0x75   :  { %802 = vmatprep.subr.bf16.mxu0 %v4533_v0 }
  0x76   :  { %3749 = vmatpush3.bf16.msra.mxu1 %v4213_v10 }
  0x77   :  { %3750 = vmatprep.subr.bf16.mxu1 %v4214_v13 }
  0x78   :  { %803 = vmatpush2.bf16.msra.mxu0 %v4109_v29  ;;  %3703 = vmatmul.mubr.bf16.gmra.mxu1 %v4137_v35  ;;  %v4181_v29 = vld [vmem:[#allocation2 + $0x19c] ss:$12 sps:$4 sm:$0xff]   ;;  %v4194_v35 = vld [vmem:[#allocation2 + $0x1e4] ss:$12 sps:$4 sm:$0xff]  }
  0x79   :  { %804 = vmatprep.subr.bf16.mxu0 %v4533_v0  ;;  %3706 = vmatprep.mubr.bf16.mxu1 %v4144_v36  ;;  %v4196_v36 = vld [vmem:[#allocation2 + $0x1e0] ss:$12 sps:$4 sm:$0xff]  }
  0x7a   :  { %3751 = vmatpush3.bf16.msra.mxu1 %v4214_v13 }
  0x7b   :  { %3752 = vmatprep.subr.bf16.mxu1 %v4215_v15 }
  0x7c   :  { %805 = vmatpush2.bf16.msra.mxu0 %v4111_v32  ;;  %v4188_v32 = vld [vmem:[#allocation2 + $0x1b0] ss:$12 sps:$4 sm:$0xff]  }
  0x7e   :  { %3753 = vmatpush3.bf16.msra.mxu1 %v4215_v15 }
  0x7f   :  { %807 = vmatmul.mubr.bf16.vlgmr.msra.gmra.mxu0 %v4116_v33  ;;  %1616 = vmatprep.subr.bf16.mxu1 %v4533_v0  ;;  %v4189_v33 = vld [vmem:[#allocation2 + $0x1cc] ss:$12 sps:$4 sm:$0xff]  }
  0x80   :  { %814 = vmatprep.mubr.bf16.mxu0 %v4117_v34  ;;  %3707 = vmatmul.mubr.bf16.gmra.mxu1 %v4145_v39  ;;  %v4191_v34 = vld [vmem:[#allocation2 + $0x1c8] ss:$12 sps:$4 sm:$0xff]  }
  0x81   :  { %3710 = vmatprep.mubr.bf16.mxu1 %v4152_v40  ;;  %v4202_v39 = vld [vmem:[#allocation2 + $0x214] ss:$12 sps:$4 sm:$0xff]   ;;  %v4204_v40 = vld [vmem:[#allocation2 + $0x210] ss:$12 sps:$4 sm:$0xff]  }
  0x87   :  { %815 = vmatmul.mubr.bf16.gmra.mxu0 %v4119_v37  ;;  %v4197_v37 = vld [vmem:[#allocation2 + $0x1fc] ss:$12 sps:$4 sm:$0xff]  }
  0x88   :  { %822 = vmatprep.mubr.bf16.mxu0 %v4122_v38  ;;  %3711 = vmatmul.mubr.bf16.gmra.mxu1 %v4153_v43  ;;  %v4199_v38 = vld [vmem:[#allocation2 + $0x1f8] ss:$12 sps:$4 sm:$0xff]  }
  0x89   :  { %3714 = vmatprep.mubr.bf16.mxu1 %v4160_v44 }
  0x8f   :  { %823 = vmatmul.mubr.bf16.gmra.mxu0 %v4124_v41  ;;  %v4207_v41 = vld [vmem:[#allocation2 + $0x22c] ss:$12 sps:$4 sm:$0xff]  }
  0x90   :  { %830 = vmatprep.mubr.bf16.mxu0 %v4125_v42  ;;  %3715 = vmatmul.mubr.bf16.gmra.mxu1 %v4161_v47  ;;  %v4209_v42 = vld [vmem:[#allocation2 + $0x228] ss:$12 sps:$4 sm:$0xff]  }
  0x91   :  { %3718 = vmatprep.mubr.bf16.mxu1 %v4168_v48 }
  0x97   :  { %831 = vmatmul.mubr.bf16.gmra.mxu0 %v4127_v45 }
  0x98   :  { %838 = vmatprep.mubr.bf16.mxu0 %v4130_v46  ;;  %3719 = vmatmul.mubr.bf16.gmra.mxu1 %v4169_v51 }
  0x99   :  { %3722 = vmatprep.mubr.bf16.mxu1 %v4176_v52 }
  0x9f   :  { %839 = vmatmul.mubr.bf16.gmra.mxu0 %v4132_v49 }
  0xa0   :  { %846 = vmatprep.mubr.bf16.mxu0 %v4133_v50  ;;  %3723 = vmatmul.mubr.bf16.gmra.mxu1 %v4177_v55 }
  0xa1   :  { %3726 = vmatprep.mubr.bf16.mxu1 %v4184_v56 }
  0xa7   :  { %847 = vmatmul.mubr.bf16.gmra.mxu0 %v4135_v53 }
  0xa8   :  { %854 = vmatprep.mubr.bf16.mxu0 %v4138_v54  ;;  %3727 = vmatmul.mubr.bf16.gmra.mxu1 %v4185_v59 }
  0xa9   :  { %3730 = vmatprep.mubr.bf16.mxu1 %v4192_v60 }
  0xaf   :  { %855 = vmatmul.mubr.bf16.gmra.mxu0 %v4140_v57 }
  0xb0   :  { %862 = vmatprep.mubr.bf16.mxu0 %v4141_v58  ;;  %3731 = vmatmul.mubr.bf16.gmra.mxu1 %v4193_v2 }
  0xb1   :  { %3734 = vmatprep.mubr.bf16.mxu1 %v4200_v3 }
  0xb7   :  { %863 = vmatmul.mubr.bf16.gmra.mxu0 %v4143_v63 }
  0xb8   :  { %870 = vmatprep.mubr.bf16.mxu0 %v4146_v1  ;;  %3735 = vmatmul.mubr.bf16.gmra.mxu1 %v4201_v8 }
  0xbf   :  { %871 = vmatmul.mubr.bf16.gmra.mxu0 %v4148_v6 }
  0xc0   :  { %878 = vmatprep.mubr.bf16.mxu0 %v4149_v7 }
  0xc7   :  { %879 = vmatmul.mubr.bf16.gmra.mxu0 %v4151_v11 }
  0xc8   :  { %886 = vmatprep.mubr.bf16.mxu0 %v4154_v12 }
  0xcf   :  { %887 = vmatmul.mubr.bf16.gmra.mxu0 %v4156_v16 }
  0xd0   :  { %894 = vmatprep.mubr.bf16.mxu0 %v4157_v17 }
  0xd7   :  { %895 = vmatmul.mubr.bf16.gmra.mxu0 %v4159_v18 }
  0xd8   :  { %902 = vmatprep.mubr.bf16.mxu0 %v4162_v19 }
  0xdf   :  { %903 = vmatmul.mubr.bf16.gmra.mxu0 %v4164_v20 }
  0xe0   :  { %910 = vmatprep.mubr.bf16.mxu0 %v4165_v21 }
  0xe7   :  { %911 = vmatmul.mubr.bf16.gmra.mxu0 %v4167_v22 }
  0xe8   :  { %918 = vmatprep.mubr.bf16.mxu0 %v4170_v23 }
  0xef   :  { %919 = vmatmul.mubr.bf16.gmra.mxu0 %v4172_v24 }
  0xf0   :  { %926 = vmatprep.mubr.bf16.mxu0 %v4173_v25 }
  0xf7   :  { %927 = vmatmul.mubr.bf16.gmra.mxu0 %v4175_v26 }
  0xf8   :  { %934 = vmatprep.mubr.bf16.mxu0 %v4178_v27 }
  0xff   :  { %935 = vmatmul.mubr.bf16.gmra.mxu0 %v4180_v28 }
 0x100   :  { %942 = vmatprep.mubr.bf16.mxu0 %v4181_v29 }
 0x107   :  { %943 = vmatmul.mubr.bf16.gmra.mxu0 %v4183_v30 }
 0x108   :  { %950 = vmatprep.mubr.bf16.mxu0 %v4186_v31 }
 0x10f   :  { %951 = vmatmul.mubr.bf16.gmra.mxu0 %v4188_v32 }
 0x110   :  { %958 = vmatprep.mubr.bf16.mxu0 %v4189_v33 }
 0x117   :  { %959 = vmatmul.mubr.bf16.gmra.mxu0 %v4191_v34 }
 0x118   :  { %966 = vmatprep.mubr.bf16.mxu0 %v4194_v35 }
 0x11f   :  { %967 = vmatmul.mubr.bf16.gmra.mxu0 %v4196_v36 }
 0x120   :  { %974 = vmatprep.mubr.bf16.mxu0 %v4197_v37  ;;  %v3692_v43 = vpop.f32.mrf.mxu1 }
 0x122   :  { %v1033_v44 = vpop.f32.mrf.mxu1 }
 0x124   :  { %v3693_v45 = vpop.f32.mrf.mxu1 }
 0x126   :  { %v1036_v48 = vpop.f32.mrf.mxu1 }
 0x127   :  { %975 = vmatmul.mubr.bf16.gmra.mxu0 %v4199_v38 }
 0x128   :  { %982 = vmatprep.mubr.bf16.mxu0 %v4202_v39  ;;  %v3696_v53 = vpop.f32.mrf.mxu1 }
 0x12a   :  { %v1049_v57 = vpop.f32.mrf.mxu1 }
 0x12f   :  { %983 = vmatmul.mubr.bf16.gmra.mxu0 %v4204_v40 }
 0x130   :  { %990 = vmatprep.mubr.bf16.mxu0 %v4207_v41 }
 0x137   :  { %991 = vmatmul.mubr.bf16.gmra.mxu0 %v4209_v42 }
 0x138   :  { %3818 = vmatprep.mubr.bf16.mxu0 %v4622_v14  ;;  %v3697_v14 = vpop.f32.mrf.mxu1 }
 0x13a   :  { %v1052_v2 = vpop.f32.mrf.mxu1 }
 0x13c   :  { %v3700_v7 = vpop.f32.mrf.mxu1 }
 0x13e   :  { %v1065_v11 = vpop.f32.mrf.mxu1 }
 0x13f   :  { %v808_v46 = vpop.f32.mrf.mxu0 }
 0x140   :  { %v1034_v50 = vadd.f32 %v1033_v44, %v808_v46  ;;  %v3701_v17 = vpop.f32.mrf.mxu1 }
 0x141   :  { %v810_v47 = vpop.f32.mrf.mxu0 }
 0x142   :  { %v1068_v21 = vpop.f32.mrf.mxu1 }
 0x143   :  { %v811_v49 = vpop.f32.mrf.mxu0 }
 0x144   :  { %v1037_v51 = vadd.f32 %v1036_v48, %v811_v49  ;;  %v3704_v26 = vpop.f32.mrf.mxu1 }
 0x145   :  { %v813_v52 = vpop.f32.mrf.mxu0 }
 0x146   :  { %v1224_v54 = vpack.c.bf16 %v1037_v51, %v1034_v50  ;;  %v1081_v30 = vpop.f32.mrf.mxu1 }
 0x147   :  { %v816_v55 = vpop.f32.mrf.mxu0 }
 0x148   :  { %3754 = vmatprep.mubr.bf16.mxu1 %v1224_v54  ;;  %v1042_v59 = vadd.f32 %v3692_v43, %v816_v55  ;;  %v3705_v35 = vpop.f32.mrf.mxu1 }
 0x149   :  { %v818_v56 = vpop.f32.mrf.mxu0 }
 0x14a   :  { %v1084_v39 = vpop.f32.mrf.mxu1 }
 0x14b   :  { %v819_v58 = vpop.f32.mrf.mxu0 }
 0x14c   :  { %v1045_v60 = vadd.f32 %v3693_v45, %v819_v58  ;;  %v3708_v44 = vpop.f32.mrf.mxu1 }
 0x14d   :  { %v821_v61 = vpop.f32.mrf.mxu0 }
 0x14e   :  { %v1225_v62 = vpack.c.bf16 %v1045_v60, %v1042_v59  ;;  %v1097_v48 = vpop.f32.mrf.mxu1 }
 0x14f   :  { %v824_v63 = vpop.f32.mrf.mxu0 }
 0x150   :  { %3755 = vmatmul.mubr.bf16.vlgmr.msra.gmra.mxu1 %v1225_v62  ;;  %v1050_v4 = vadd.f32 %v1049_v57, %v824_v63 }
 0x151   :  { %v826_v1 = vpop.f32.mrf.mxu0 }
 0x153   :  { %v827_v3 = vpop.f32.mrf.mxu0 }
 0x154   :  { %v1053_v5 = vadd.f32 %v1052_v2, %v827_v3 }
 0x155   :  { %v829_v6 = vpop.f32.mrf.mxu0 }
 0x156   :  { %v1226_v8 = vpack.c.bf16 %v1053_v5, %v1050_v4 }
 0x157   :  { %v832_v9 = vpop.f32.mrf.mxu0 }
 0x158   :  { %3758 = vmatprep.mubr.bf16.mxu1 %v1226_v8  ;;  %v1058_v13 = vadd.f32 %v3696_v53, %v832_v9  ;;  %v3709_v53 = vpop.f32.mrf.mxu1 }
 0x159   :  { %v834_v10 = vpop.f32.mrf.mxu0 }
 0x15a   :  { %v1100_v57 = vpop.f32.mrf.mxu1 }
 0x15b   :  { %v835_v12 = vpop.f32.mrf.mxu0 }
 0x15c   :  { %v1061_v15 = vadd.f32 %v3697_v14, %v835_v12  ;;  %v3712_v14 = vpop.f32.mrf.mxu1 }
 0x15d   :  { %v837_v16 = vpop.f32.mrf.mxu0 }
 0x15e   :  { %v1227_v18 = vpack.c.bf16 %v1061_v15, %v1058_v13  ;;  %v1113_v2 = vpop.f32.mrf.mxu1 }
 0x15f   :  { %v840_v19 = vpop.f32.mrf.mxu0 }
 0x160   :  { %3759 = vmatmul.mubr.bf16.gmra.mxu1 %v1227_v18  ;;  %v1066_v23 = vadd.f32 %v1065_v11, %v840_v19 }
 0x161   :  { %v842_v20 = vpop.f32.mrf.mxu0 }
 0x163   :  { %v843_v22 = vpop.f32.mrf.mxu0 }
 0x164   :  { %v1069_v24 = vadd.f32 %v1068_v21, %v843_v22 }
 0x165   :  { %v845_v25 = vpop.f32.mrf.mxu0 }
 0x166   :  { %v1228_v27 = vpack.c.bf16 %v1069_v24, %v1066_v23 }
 0x167   :  { %v848_v28 = vpop.f32.mrf.mxu0 }
 0x168   :  { %3762 = vmatprep.mubr.bf16.mxu1 %v1228_v27  ;;  %v1074_v32 = vadd.f32 %v3700_v7, %v848_v28  ;;  %v3713_v7 = vpop.f32.mrf.mxu1 }
 0x169   :  { %v850_v29 = vpop.f32.mrf.mxu0 }
 0x16a   :  { %v1116_v11 = vpop.f32.mrf.mxu1 }
 0x16b   :  { %v851_v31 = vpop.f32.mrf.mxu0 }
 0x16c   :  { %v1077_v33 = vadd.f32 %v3701_v17, %v851_v31  ;;  %v3716_v17 = vpop.f32.mrf.mxu1 }
 0x16d   :  { %v853_v34 = vpop.f32.mrf.mxu0 }
 0x16e   :  { %v1229_v36 = vpack.c.bf16 %v1077_v33, %v1074_v32  ;;  %v1129_v21 = vpop.f32.mrf.mxu1 }
 0x16f   :  { %v856_v37 = vpop.f32.mrf.mxu0 }
 0x170   :  { %3763 = vmatmul.mubr.bf16.gmra.mxu1 %v1229_v36  ;;  %v1082_v41 = vadd.f32 %v1081_v30, %v856_v37 }
 0x171   :  { %v858_v38 = vpop.f32.mrf.mxu0 }
 0x173   :  { %v859_v40 = vpop.f32.mrf.mxu0 }
 0x174   :  { %v1085_v42 = vadd.f32 %v1084_v39, %v859_v40 }
 0x175   :  { %v861_v43 = vpop.f32.mrf.mxu0 }
 0x176   :  { %v1230_v45 = vpack.c.bf16 %v1085_v42, %v1082_v41 }
 0x177   :  { %v864_v46 = vpop.f32.mrf.mxu0 }
 0x178   :  { %3766 = vmatprep.mubr.bf16.mxu1 %v1230_v45  ;;  %v1090_v50 = vadd.f32 %v3704_v26, %v864_v46  ;;  %v3717_v26 = vpop.f32.mrf.mxu1 }
 0x179   :  { %v866_v47 = vpop.f32.mrf.mxu0 }
 0x17a   :  { %v1132_v30 = vpop.f32.mrf.mxu1 }
 0x17b   :  { %v867_v49 = vpop.f32.mrf.mxu0 }
 0x17c   :  { %v1093_v51 = vadd.f32 %v3705_v35, %v867_v49  ;;  %v3720_v35 = vpop.f32.mrf.mxu1 }
 0x17d   :  { %v869_v52 = vpop.f32.mrf.mxu0 }
 0x17e   :  { %v1231_v54 = vpack.c.bf16 %v1093_v51, %v1090_v50  ;;  %v1145_v39 = vpop.f32.mrf.mxu1 }
 0x17f   :  { %v872_v55 = vpop.f32.mrf.mxu0 }
 0x180   :  { %3767 = vmatmul.mubr.bf16.gmra.mxu1 %v1231_v54  ;;  %v1098_v59 = vadd.f32 %v1097_v48, %v872_v55 }
 0x181   :  { %v874_v56 = vpop.f32.mrf.mxu0 }
 0x183   :  { %v875_v58 = vpop.f32.mrf.mxu0 }
 0x184   :  { %v1101_v60 = vadd.f32 %v1100_v57, %v875_v58 }
 0x185   :  { %v877_v61 = vpop.f32.mrf.mxu0 }
 0x186   :  { %v1232_v62 = vpack.c.bf16 %v1101_v60, %v1098_v59 }
 0x187   :  { %v880_v63 = vpop.f32.mrf.mxu0 }
 0x188   :  { %3770 = vmatprep.mubr.bf16.mxu1 %v1232_v62  ;;  %v1106_v4 = vadd.f32 %v3708_v44, %v880_v63  ;;  %v3721_v44 = vpop.f32.mrf.mxu1 }
 0x189   :  { %v882_v1 = vpop.f32.mrf.mxu0 }
 0x18a   :  { %v1148_v48 = vpop.f32.mrf.mxu1 }
 0x18b   :  { %v883_v3 = vpop.f32.mrf.mxu0 }
 0x18c   :  { %v1109_v5 = vadd.f32 %v3709_v53, %v883_v3  ;;  %v3724_v53 = vpop.f32.mrf.mxu1 }
 0x18d   :  { %v885_v6 = vpop.f32.mrf.mxu0 }
 0x18e   :  { %v1233_v8 = vpack.c.bf16 %v1109_v5, %v1106_v4  ;;  %v1161_v57 = vpop.f32.mrf.mxu1 }
 0x18f   :  { %v888_v9 = vpop.f32.mrf.mxu0 }
 0x190   :  { %3771 = vmatmul.mubr.bf16.gmra.mxu1 %v1233_v8  ;;  %v1114_v13 = vadd.f32 %v1113_v2, %v888_v9 }
 0x191   :  { %v890_v10 = vpop.f32.mrf.mxu0 }
 0x193   :  { %v891_v12 = vpop.f32.mrf.mxu0 }
 0x194   :  { %v1117_v15 = vadd.f32 %v1116_v11, %v891_v12 }
 0x195   :  { %v893_v16 = vpop.f32.mrf.mxu0 }
 0x196   :  { %v1234_v18 = vpack.c.bf16 %v1117_v15, %v1114_v13 }
 0x197   :  { %v896_v19 = vpop.f32.mrf.mxu0 }
 0x198   :  { %3774 = vmatprep.mubr.bf16.mxu1 %v1234_v18  ;;  %v1122_v23 = vadd.f32 %v3712_v14, %v896_v19  ;;  %v3725_v14 = vpop.f32.mrf.mxu1 }
 0x199   :  { %v898_v20 = vpop.f32.mrf.mxu0 }
 0x19a   :  { %v1164_v2 = vpop.f32.mrf.mxu1 }
 0x19b   :  { %v899_v22 = vpop.f32.mrf.mxu0 }
 0x19c   :  { %v1125_v24 = vadd.f32 %v3713_v7, %v899_v22  ;;  %v3728_v7 = vpop.f32.mrf.mxu1 }
 0x19d   :  { %v901_v25 = vpop.f32.mrf.mxu0 }
 0x19e   :  { %v1235_v27 = vpack.c.bf16 %v1125_v24, %v1122_v23  ;;  %v1177_v11 = vpop.f32.mrf.mxu1 }
 0x19f   :  { %v904_v28 = vpop.f32.mrf.mxu0 }
 0x1a0   :  { %3775 = vmatmul.mubr.bf16.gmra.mxu1 %v1235_v27  ;;  %v1130_v32 = vadd.f32 %v1129_v21, %v904_v28 }
 0x1a1   :  { %v906_v29 = vpop.f32.mrf.mxu0 }
 0x1a3   :  { %v907_v31 = vpop.f32.mrf.mxu0 }
 0x1a4   :  { %v1133_v33 = vadd.f32 %v1132_v30, %v907_v31 }
 0x1a5   :  { %v909_v34 = vpop.f32.mrf.mxu0 }
 0x1a6   :  { %v1236_v36 = vpack.c.bf16 %v1133_v33, %v1130_v32 }
 0x1a7   :  { %v912_v37 = vpop.f32.mrf.mxu0 }
 0x1a8   :  { %3778 = vmatprep.mubr.bf16.mxu1 %v1236_v36  ;;  %v1138_v41 = vadd.f32 %v3716_v17, %v912_v37  ;;  %v3729_v17 = vpop.f32.mrf.mxu1 }
 0x1a9   :  { %v914_v38 = vpop.f32.mrf.mxu0 }
 0x1aa   :  { %v1180_v21 = vpop.f32.mrf.mxu1 }
 0x1ab   :  { %v915_v40 = vpop.f32.mrf.mxu0 }
 0x1ac   :  { %v1141_v42 = vadd.f32 %v3717_v26, %v915_v40  ;;  %v3732_v26 = vpop.f32.mrf.mxu1 }
 0x1ad   :  { %v917_v43 = vpop.f32.mrf.mxu0 }
 0x1ae   :  { %v1237_v45 = vpack.c.bf16 %v1141_v42, %v1138_v41  ;;  %v1193_v30 = vpop.f32.mrf.mxu1 }
 0x1af   :  { %v920_v46 = vpop.f32.mrf.mxu0 }
 0x1b0   :  { %3779 = vmatmul.mubr.bf16.gmra.mxu1 %v1237_v45  ;;  %v1146_v50 = vadd.f32 %v1145_v39, %v920_v46 }
 0x1b1   :  { %v922_v47 = vpop.f32.mrf.mxu0 }
 0x1b3   :  { %v923_v49 = vpop.f32.mrf.mxu0 }
 0x1b4   :  { %v1149_v51 = vadd.f32 %v1148_v48, %v923_v49 }
 0x1b5   :  { %v925_v52 = vpop.f32.mrf.mxu0 }
 0x1b6   :  { %v1238_v54 = vpack.c.bf16 %v1149_v51, %v1146_v50 }
 0x1b7   :  { %v928_v55 = vpop.f32.mrf.mxu0 }
 0x1b8   :  { %3782 = vmatprep.mubr.bf16.mxu1 %v1238_v54  ;;  %v1154_v59 = vadd.f32 %v3720_v35, %v928_v55  ;;  %v3733_v35 = vpop.f32.mrf.mxu1 }
 0x1b9   :  { %v930_v56 = vpop.f32.mrf.mxu0 }
 0x1ba   :  { %v1196_v39 = vpop.f32.mrf.mxu1 }
 0x1bb   :  { %v931_v58 = vpop.f32.mrf.mxu0 }
 0x1bc   :  { %v1157_v60 = vadd.f32 %v3721_v44, %v931_v58  ;;  %v3736_v44 = vpop.f32.mrf.mxu1 }
 0x1bd   :  { %v933_v61 = vpop.f32.mrf.mxu0 }
 0x1be   :  { %v1239_v62 = vpack.c.bf16 %v1157_v60, %v1154_v59  ;;  %v1209_v48 = vpop.f32.mrf.mxu1 }
 0x1bf   :  { %v936_v63 = vpop.f32.mrf.mxu0 }
 0x1c0   :  { %3783 = vmatmul.mubr.bf16.gmra.mxu1 %v1239_v62  ;;  %v1162_v4 = vadd.f32 %v1161_v57, %v936_v63 }
 0x1c1   :  { %v938_v1 = vpop.f32.mrf.mxu0 }
 0x1c3   :  { %v939_v3 = vpop.f32.mrf.mxu0 }
 0x1c4   :  { %v1165_v5 = vadd.f32 %v1164_v2, %v939_v3 }
 0x1c5   :  { %v941_v6 = vpop.f32.mrf.mxu0 }
 0x1c6   :  { %v1240_v8 = vpack.c.bf16 %v1165_v5, %v1162_v4  ;;  %v4636_v6 = vld [vmem:[#allocation2 + $0x4] ss:$12 sps:$4 sm:$0xff]  }
 0x1c7   :  { %v944_v9 = vpop.f32.mrf.mxu0 }
 0x1c8   :  { %3786 = vmatprep.mubr.bf16.mxu1 %v1240_v8  ;;  %v1170_v13 = vadd.f32 %v3724_v53, %v944_v9  ;;  %v3737_v53 = vpop.f32.mrf.mxu1 }
 0x1c9   :  { %v946_v10 = vpop.f32.mrf.mxu0 }
 0x1ca   :  { %v1212_v57 = vpop.f32.mrf.mxu1 }
 0x1cb   :  { %v947_v12 = vpop.f32.mrf.mxu0 }
 0x1cc   :  { %v1173_v15 = vadd.f32 %v3725_v14, %v947_v12 }
 0x1cd   :  { %v949_v16 = vpop.f32.mrf.mxu0 }
 0x1ce   :  { %v1241_v18 = vpack.c.bf16 %v1173_v15, %v1170_v13 }
 0x1cf   :  { %v952_v19 = vpop.f32.mrf.mxu0 }
 0x1d0   :  { %3787 = vmatmul.mubr.bf16.gmra.mxu1 %v1241_v18  ;;  %v1178_v23 = vadd.f32 %v1177_v11, %v952_v19 }
 0x1d1   :  { %v954_v20 = vpop.f32.mrf.mxu0 }
 0x1d3   :  { %v955_v22 = vpop.f32.mrf.mxu0 }
 0x1d4   :  { %v1181_v24 = vadd.f32 %v1180_v21, %v955_v22  ;;  %v4644_v21 = vld [vmem:[%s5053_s5] ss:$0 sm:$0xff] }
 0x1d5   :  { %v957_v25 = vpop.f32.mrf.mxu0 }
 0x1d6   :  { %v1242_v27 = vpack.c.bf16 %v1181_v24, %v1178_v23 }
 0x1d7   :  { %v960_v28 = vpop.f32.mrf.mxu0 }
 0x1d8   :  { %3790 = vmatprep.mubr.bf16.mxu1 %v1242_v27  ;;  %v1186_v32 = vadd.f32 %v3728_v7, %v960_v28 }
 0x1d9   :  { %v962_v29 = vpop.f32.mrf.mxu0 }
 0x1db   :  { %v963_v31 = vpop.f32.mrf.mxu0 }
 0x1dc   :  { %v1189_v33 = vadd.f32 %v3729_v17, %v963_v31 }
 0x1dd   :  { %v965_v34 = vpop.f32.mrf.mxu0 }
 0x1de   :  { %v1243_v36 = vpack.c.bf16 %v1189_v33, %v1186_v32 }
 0x1df   :  { %v968_v37 = vpop.f32.mrf.mxu0 }
 0x1e0   :  { %3791 = vmatmul.mubr.bf16.gmra.mxu1 %v1243_v36  ;;  %v1194_v41 = vadd.f32 %v1193_v30, %v968_v37 }
 0x1e1   :  { %v970_v38 = vpop.f32.mrf.mxu0 }
 0x1e3   :  { %v971_v40 = vpop.f32.mrf.mxu0 }
 0x1e4   :  { %v1197_v42 = vadd.f32 %v1196_v39, %v971_v40 }
 0x1e5   :  { %v973_v43 = vpop.f32.mrf.mxu0 }
 0x1e6   :  { %v1244_v45 = vpack.c.bf16 %v1197_v42, %v1194_v41 }
 0x1e7   :  { %v976_v46 = vpop.f32.mrf.mxu0 }
 0x1e8   :  { %3794 = vmatprep.mubr.bf16.mxu1 %v1244_v45  ;;  %v1202_v50 = vadd.f32 %v3732_v26, %v976_v46 }
 0x1e9   :  { %v978_v47 = vpop.f32.mrf.mxu0 }
 0x1eb   :  { %v979_v49 = vpop.f32.mrf.mxu0 }
 0x1ec   :  { %v1205_v51 = vadd.f32 %v3733_v35, %v979_v49 }
 0x1ed   :  { %v981_v52 = vpop.f32.mrf.mxu0 }
 0x1ee   :  { %v1245_v54 = vpack.c.bf16 %v1205_v51, %v1202_v50 }
 0x1ef   :  { %v984_v55 = vpop.f32.mrf.mxu0 }
 0x1f0   :  { %3795 = vmatmul.mubr.bf16.gmra.mxu1 %v1245_v54  ;;  %v1210_v59 = vadd.f32 %v1209_v48, %v984_v55 }
 0x1f1   :  { %v986_v56 = vpop.f32.mrf.mxu0 }
 0x1f3   :  { %v987_v58 = vpop.f32.mrf.mxu0 }
 0x1f4   :  { %v1213_v60 = vadd.f32 %v1212_v57, %v987_v58 }
 0x1f5   :  { %v989_v61 = vpop.f32.mrf.mxu0 }
 0x1f6   :  { %v1246_v14 = vpack.c.bf16 %v1213_v60, %v1210_v59 }
 0x1f7   :  { %v992_v62 = vpop.f32.mrf.mxu0 }
 0x1f8   :  { %3798 = vmatprep.mubr.bf16.mxu1 %v1246_v14  ;;  %v1218_v2 = vadd.f32 %v3736_v44, %v992_v62 }
 0x1f9   :  { %v994_v63 = vpop.f32.mrf.mxu0 }
 0x1fb   :  { %v995_v1 = vpop.f32.mrf.mxu0 }
 0x1fc   :  { %v1221_v3 = vadd.f32 %v3737_v53, %v995_v1 }
 0x1fd   :  { %v997_v4 = vpop.f32.mrf.mxu0 }
 0x1fe   :  { %v1247_v5 = vpack.c.bf16 %v1221_v3, %v1218_v2 }
 0x200   :  { %3799 = vmatmul.mubr.bf16.gmra.mxu1 %v1247_v5 }
 0x201   :  { %1648 = vmatprep.mubr.bf16.mxu1 %v4636_v6 }
 0x210   :  { %v3756_v7 = vpop.f32.mrf.mxu1 }
 0x211   :  { %v1362_v56 = vadd.f32 %v3756_v7, %v4644_v21 }
 0x212   :  { %v4639_v8 = vpop.f32.mrf.mxu1 }
 0x213   :  { %v1546_v14 = vmax.f32 %v1362_v56, 0.0  ;;  %v1354_v62 = vadd.f32 %v4644_v21, %v4639_v8 }
 0x214   :  { %v3757_v9 = vpop.f32.mrf.mxu1 }
 0x215   :  { %v1365_v52 = vadd.f32 %v3757_v9, %v4644_v21  ;;  %v1544_v3 = vmax.f32 %v1354_v62, 0.0 }
 0x216   :  { %v1356_v10 = vpop.f32.mrf.mxu1 }
 0x217   :  { %v1547_v58 = vmax.f32 %v1365_v52, 0.0  ;;  %v1357_v59 = vadd.f32 %v4644_v21, %v1356_v10 }
 0x219   :  { %v1593_v63 = vpack.c.bf16 %v1547_v58, %v1546_v14  ;;  %v1545_v1 = vmax.f32 %v1357_v59, 0.0 }
 0x21b   :  { %v1592_v5 = vpack.c.bf16 %v1545_v1, %v1544_v3  ;;  %v4233_v3 = vld [vmem:[#allocation2] ss:$12 sps:$4 sm:$0xff]  }
 0x220   :  { %v3760_v11 = vpop.f32.mrf.mxu1 }
 0x221   :  { %v1378_v44 = vadd.f32 %v3760_v11, %v4644_v21 }
 0x222   :  { %v1369_v12 = vpop.f32.mrf.mxu1 }
 0x223   :  { %v1550_v50 = vmax.f32 %v1378_v44, 0.0  ;;  %v1370_v51 = vadd.f32 %v4644_v21, %v1369_v12 }
 0x224   :  { %v3761_v13 = vpop.f32.mrf.mxu1 }
 0x225   :  { %v1381_v41 = vadd.f32 %v3761_v13, %v4644_v21  ;;  %v1548_v57 = vmax.f32 %v1370_v51, 0.0 }
 0x226   :  { %v1372_v15 = vpop.f32.mrf.mxu1 }
 0x227   :  { %v1551_v46 = vmax.f32 %v1381_v41, 0.0  ;;  %v1373_v47 = vadd.f32 %v4644_v21, %v1372_v15 }
 0x229   :  { %v1595_v53 = vpack.c.bf16 %v1551_v46, %v1550_v50  ;;  %v1549_v54 = vmax.f32 %v1373_v47, 0.0 }
 0x22b   :  { %v1594_v60 = vpack.c.bf16 %v1549_v54, %v1548_v57 }
 0x230   :  { %v3764_v16 = vpop.f32.mrf.mxu1 }
 0x231   :  { %v1394_v34 = vadd.f32 %v3764_v16, %v4644_v21 }
 0x232   :  { %v1385_v17 = vpop.f32.mrf.mxu1 }
 0x233   :  { %v1554_v39 = vmax.f32 %v1394_v34, 0.0  ;;  %v1386_v40 = vadd.f32 %v4644_v21, %v1385_v17 }
 0x234   :  { %v3765_v18 = vpop.f32.mrf.mxu1 }
 0x235   :  { %v1397_v31 = vadd.f32 %v3765_v18, %v4644_v21  ;;  %v1552_v45 = vmax.f32 %v1386_v40, 0.0 }
 0x236   :  { %v1388_v19 = vpop.f32.mrf.mxu1 }
 0x237   :  { %v1555_v36 = vmax.f32 %v1397_v31, 0.0  ;;  %v1389_v37 = vadd.f32 %v4644_v21, %v1388_v19 }
 0x239   :  { %v1597_v42 = vpack.c.bf16 %v1555_v36, %v1554_v39  ;;  %v1553_v43 = vmax.f32 %v1389_v37, 0.0 }
 0x23b   :  { %v1596_v48 = vpack.c.bf16 %v1553_v43, %v1552_v45 }
 0x240   :  { %v3768_v20 = vpop.f32.mrf.mxu1 }
 0x241   :  { %v1410_v23 = vadd.f32 %v3768_v20, %v4644_v21 }
 0x242   :  { %v1401_v22 = vpop.f32.mrf.mxu1 }
 0x243   :  { %v1558_v27 = vmax.f32 %v1410_v23, 0.0  ;;  %v1402_v28 = vadd.f32 %v4644_v21, %v1401_v22 }
 0x244   :  { %v3769_v24 = vpop.f32.mrf.mxu1 }
 0x245   :  { %v1413_v25 = vadd.f32 %v3769_v24, %v4644_v21  ;;  %v1556_v35 = vmax.f32 %v1402_v28, 0.0 }
 0x246   :  { %v1404_v26 = vpop.f32.mrf.mxu1 }
 0x247   :  { %v1559_v29 = vmax.f32 %v1413_v25, 0.0  ;;  %v1405_v30 = vadd.f32 %v4644_v21, %v1404_v26 }
 0x249   :  { %v1599_v32 = vpack.c.bf16 %v1559_v29, %v1558_v27  ;;  %v1557_v33 = vmax.f32 %v1405_v30, 0.0 }
 0x24b   :  { %1617 = vmatpush1.bf16.msra.mxu1 %v1599_v32  ;;  %v1598_v38 = vpack.c.bf16 %v1557_v33, %v1556_v35 }
 0x24c   :  { %1618 = vmatprep.subr.bf16.mxu1 %v4533_v0 }
 0x24f   :  { %1619 = vmatpush1.bf16.msra.mxu1 %v1598_v38 }
 0x250   :  { %1620 = vmatprep.subr.bf16.mxu1 %v4533_v0  ;;  %v4660_v49 = vpop.f32.mrf.mxu1 }
 0x251   :  { %v1426_v52 = vadd.f32 %v4660_v49, %v4644_v21 }
 0x252   :  { %v4665_v55 = vpop.f32.mrf.mxu1 }
 0x253   :  { %1621 = vmatpush1.bf16.msra.mxu1 %v1597_v42  ;;  %v1562_v59 = vmax.f32 %v1426_v52, 0.0 }
 0x254   :  { %1622 = vmatprep.subr.bf16.mxu1 %v4533_v0  ;;  %v3773_v61 = vpop.f32.mrf.mxu1 }
 0x255   :  { %v1429_v47 = vadd.f32 %v3773_v61, %v4644_v21 }
 0x256   :  { %v4673_v2 = vpop.f32.mrf.mxu1 }
 0x257   :  { %1623 = vmatpush1.bf16.msra.mxu1 %v1596_v48  ;;  %v1563_v54 = vmax.f32 %v1429_v47, 0.0  ;;  %v1421_v56 = vadd.f32 %v4644_v21, %v4673_v2  ;;  %v4243_v47 = vld [vmem:[#allocation2 + $0x78] ss:$12 sps:$4 sm:$0xff]  }
 0x258   :  { %1624 = vmatprep.subr.bf16.mxu1 %v4533_v0 }
 0x259   :  { %v1601_v61 = vpack.c.bf16 %v1563_v54, %v1562_v59  ;;  %v1561_v49 = vmax.f32 %v1421_v56, 0.0 }
 0x25b   :  { %1625 = vmatpush1.bf16.msra.mxu1 %v1595_v53 }
 0x25c   :  { %1626 = vmatprep.subr.bf16.mxu1 %v4533_v0 }
 0x25f   :  { %1627 = vmatpush1.bf16.msra.mxu1 %v1594_v60  ;;  %v1418_v60 = vadd.f32 %v4644_v21, %v4665_v55  ;;  %v4234_v55 = vld [vmem:[#allocation2 + $0x1c] ss:$12 sps:$4 sm:$0xff]  }
 0x260   :  { %1628 = vmatprep.subr.bf16.mxu1 %v4533_v0  ;;  %v3776_v4 = vpop.f32.mrf.mxu1 }
 0x261   :  { %v1442_v39 = vadd.f32 %v3776_v4, %v4644_v21  ;;  %v1560_v62 = vmax.f32 %v1418_v60, 0.0 }
 0x262   :  { %v1433_v7 = vpop.f32.mrf.mxu1 }
 0x263   :  { %1629 = vmatpush1.bf16.msra.mxu1 %v1593_v63  ;;  %v1566_v45 = vmax.f32 %v1442_v39, 0.0  ;;  %v1434_v46 = vadd.f32 %v4644_v21, %v1433_v7  ;;  %v1600_v1 = vpack.c.bf16 %v1561_v49, %v1560_v62  ;;  %v4245_v62 = vld [vmem:[#allocation2 + $0x90] ss:$12 sps:$4 sm:$0xff]  }
 0x264   :  { %1630 = vmatprep.subr.bf16.mxu1 %v4533_v0  ;;  %v3777_v9 = vpop.f32.mrf.mxu1 }
 0x265   :  { %v1445_v36 = vadd.f32 %v3777_v9, %v4644_v21  ;;  %v1564_v53 = vmax.f32 %v1434_v46, 0.0  ;;  %v4235_v9 = vld [vmem:[#allocation2 + $0x18] ss:$12 sps:$4 sm:$0xff]  }
 0x266   :  { %v1436_v10 = vpop.f32.mrf.mxu1 }
 0x267   :  { %1631 = vmatpush1.bf16.msra.mxu1 %v1592_v5  ;;  %v1567_v41 = vmax.f32 %v1445_v36, 0.0  ;;  %v1437_v42 = vadd.f32 %v4644_v21, %v1436_v10  ;;  %v4236_v10 = vld [vmem:[#allocation2 + $0x34] ss:$12 sps:$4 sm:$0xff]  }
 0x268   :  { %1632 = vmatprep.subr.bf16.mxu1 %v4533_v0 }
 0x269   :  { %v1603_v48 = vpack.c.bf16 %v1567_v41, %v1566_v45  ;;  %v1565_v50 = vmax.f32 %v1437_v42, 0.0 }
 0x26b   :  { %v1602_v57 = vpack.c.bf16 %v1565_v50, %v1564_v53  ;;  %v4244_v53 = vld [vmem:[#allocation2 + $0x94] ss:$12 sps:$4 sm:$0xff]  }
 0x270   :  { %v3780_v8 = vpop.f32.mrf.mxu1 }
 0x271   :  { %v1458_v29 = vadd.f32 %v3780_v8, %v4644_v21 }
 0x272   :  { %v1449_v11 = vpop.f32.mrf.mxu1 }
 0x273   :  { %v1570_v34 = vmax.f32 %v1458_v29, 0.0  ;;  %v1450_v35 = vadd.f32 %v4644_v21, %v1449_v11 }
 0x274   :  { %v3781_v12 = vpop.f32.mrf.mxu1 }
 0x275   :  { %v1461_v26 = vadd.f32 %v3781_v12, %v4644_v21  ;;  %v1568_v40 = vmax.f32 %v1450_v35, 0.0  ;;  %v4237_v12 = vld [vmem:[#allocation2 + $0x30] ss:$12 sps:$4 sm:$0xff]  }
 0x276   :  { %v1452_v13 = vpop.f32.mrf.mxu1 }
 0x277   :  { %v1571_v31 = vmax.f32 %v1461_v26, 0.0  ;;  %v1453_v32 = vadd.f32 %v4644_v21, %v1452_v13  ;;  %v4238_v13 = vld [vmem:[#allocation2 + $0x4c] ss:$12 sps:$4 sm:$0xff]  }
 0x279   :  { %v1605_v37 = vpack.c.bf16 %v1571_v31, %v1570_v34  ;;  %v1569_v38 = vmax.f32 %v1453_v32, 0.0  ;;  %v4241_v34 = vld [vmem:[#allocation2 + $0x60] ss:$12 sps:$4 sm:$0xff]  }
 0x27b   :  { %v1604_v43 = vpack.c.bf16 %v1569_v38, %v1568_v40  ;;  %v4242_v38 = vld [vmem:[#allocation2 + $0x7c] ss:$12 sps:$4 sm:$0xff]  }
 0x280   :  { %v3784_v15 = vpop.f32.mrf.mxu1 }
 0x281   :  { %v1474_v17 = vadd.f32 %v3784_v15, %v4644_v21 }
 0x282   :  { %v1465_v16 = vpop.f32.mrf.mxu1 }
 0x283   :  { %v1574_v22 = vmax.f32 %v1474_v17, 0.0  ;;  %v1466_v23 = vadd.f32 %v4644_v21, %v1465_v16 }
 0x284   :  { %v3785_v18 = vpop.f32.mrf.mxu1 }
 0x285   :  { %v1477_v19 = vadd.f32 %v3785_v18, %v4644_v21  ;;  %v1572_v30 = vmax.f32 %v1466_v23, 0.0  ;;  %v4239_v18 = vld [vmem:[#allocation2 + $0x48] ss:$12 sps:$4 sm:$0xff]  }
 0x286   :  { %v1468_v20 = vpop.f32.mrf.mxu1 }
 0x287   :  { %v1575_v24 = vmax.f32 %v1477_v19, 0.0  ;;  %v1469_v25 = vadd.f32 %v4644_v21, %v1468_v20  ;;  %v4240_v20 = vld [vmem:[#allocation2 + $0x64] ss:$12 sps:$4 sm:$0xff]  }
 0x289   :  { %v1607_v27 = vpack.c.bf16 %v1575_v24, %v1574_v22  ;;  %v1573_v28 = vmax.f32 %v1469_v25, 0.0 }
 0x28b   :  { %1633 = vmatpush2.bf16.msra.mxu1 %v1607_v27  ;;  %v1606_v33 = vpack.c.bf16 %v1573_v28, %v1572_v30 }
 0x28c   :  { %1634 = vmatprep.subr.bf16.mxu1 %v4533_v0 }
 0x28f   :  { %1635 = vmatpush2.bf16.msra.mxu1 %v1606_v33 }
 0x290   :  { %1636 = vmatprep.subr.bf16.mxu1 %v4533_v0  ;;  %v4691_v44 = vpop.f32.mrf.mxu1 }
 0x292   :  { %v4696_v51 = vpop.f32.mrf.mxu1 }
 0x293   :  { %1637 = vmatpush2.bf16.msra.mxu1 %v1605_v37 }
 0x294   :  { %1638 = vmatprep.subr.bf16.mxu1 %v4533_v0  ;;  %v4703_v58 = vpop.f32.mrf.mxu1 }
 0x296   :  { %v4708_v14 = vpop.f32.mrf.mxu1 }
 0x297   :  { %1639 = vmatpush2.bf16.msra.mxu1 %v1604_v43 }
 0x298   :  { %1640 = vmatprep.subr.bf16.mxu1 %v4533_v0 }
 0x29b   :  { %1641 = vmatpush2.bf16.msra.mxu1 %v1603_v48 }
 0x29c   :  { %1642 = vmatprep.subr.bf16.mxu1 %v4533_v0 }
 0x29f   :  { %1643 = vmatpush2.bf16.msra.mxu1 %v1602_v57  ;;  %v1493_v57 = vadd.f32 %v4703_v58, %v4644_v21  ;;  %v1482_v58 = vadd.f32 %v4644_v21, %v4696_v51  ;;  %v4253_v51 = vld [vmem:[#allocation2 + $0xd8] ss:$12 sps:$4 sm:$0xff]  }
 0x2a0   :  { %1644 = vmatprep.subr.bf16.mxu1 %v4533_v0  ;;  %v3792_v63 = vpop.f32.mrf.mxu1 }
 0x2a1   :  { %v1506_v45 = vadd.f32 %v3792_v63, %v4644_v21  ;;  %v1579_v63 = vmax.f32 %v1493_v57, 0.0  ;;  %v4285_v57 = vld [vmem:[#allocation2 + $0x198] ss:$12 sps:$4 sm:$0xff]  }
 0x2a2   :  { %v4711_v2 = vpop.f32.mrf.mxu1 }
 0x2a3   :  { %1645 = vmatpush2.bf16.msra.mxu1 %v1601_v61  ;;  %v1582_v54 = vmax.f32 %v1506_v45, 0.0  ;;  %v1498_v56 = vadd.f32 %v4644_v21, %v4711_v2  ;;  %v1490_v61 = vadd.f32 %v4691_v44, %v4644_v21  ;;  %v4246_v2 = vld [vmem:[#allocation2 + $0xac] ss:$12 sps:$4 sm:$0xff]   ;;  %v1576_v44 = vmax.f32 %v1482_v58, 0.0  ;;  %v4279_v45 = vld [vmem:[#allocation2 + $0x184] ss:$12 sps:$4 sm:$0xff]  }
 0x2a4   :  { %1646 = vmatprep.subr.bf16.mxu1 %v4533_v0  ;;  %v3793_v4 = vpop.f32.mrf.mxu1  ;;  %v4296_v58 = vld [vmem:[#allocation2 + $0x1e0] ss:$12 sps:$4 sm:$0xff]  }
 0x2a5   :  { %v1509_v41 = vadd.f32 %v3793_v4, %v4644_v21  ;;  %v1580_v49 = vmax.f32 %v1498_v56, 0.0  ;;  %v4223_v56 = vld [vmem:[#allocation8] sm:$0xff]  }
 0x2a6   :  { %v1500_v5 = vpop.f32.mrf.mxu1 }
 0x2a7   :  { %1647 = vmatpush2.bf16.msra.mxu1 %v1600_v1  ;;  %v1583_v48 = vmax.f32 %v1509_v41, 0.0  ;;  %v1501_v50 = vadd.f32 %v4644_v21, %v1500_v5  ;;  %v1485_v1 = vadd.f32 %v4644_v21, %v4708_v14  ;;  %v4249_v14 = vld [vmem:[#allocation2 + $0xc0] ss:$12 sps:$4 sm:$0xff]   ;;  %v4276_v41 = vld [vmem:[#allocation2 + $0x158] ss:$12 sps:$4 sm:$0xff]  }
 0x2a8   :  { %2506 = vmatprep.subr.bf16.mxu1 %v4533_v0 }
 0x2a9   :  { %v1611_v59 = vpack.c.bf16 %v1583_v48, %v1582_v54  ;;  %v1581_v60 = vmax.f32 %v1501_v50, 0.0  ;;  %v1577_v5 = vmax.f32 %v1485_v1, 0.0  ;;  %v4281_v48 = vld [vmem:[#allocation2 + $0x180] ss:$12 sps:$4 sm:$0xff]   ;;  %v4282_v50 = vld [vmem:[#allocation2 + $0x19c] ss:$12 sps:$4 sm:$0xff]  }
 0x2aa   :  { %1649 = vmatmul.mubr.bf16.vlgmr.msra.gmra.mxu1 %v4233_v3  ;;  %v4222_v54 = vld [vmem:[#allocation8 + $0x8] sm:$0xff]   ;;  %v4292_v1 = vld [vmem:[#allocation2 + $0x218] ss:$12 sps:$4 sm:$0xff]  }
 0x2ab   :  { %1656 = vmatprep.mubr.bf16.mxu1 %v4234_v55  ;;  %v1610_v3 = vpack.c.bf16 %v1581_v60, %v1580_v49  ;;  %v1578_v55 = vmax.f32 %v1490_v61, 0.0  ;;  %v4287_v60 = vld [vmem:[#allocation2 + $0x1d0] ss:$12 sps:$4 sm:$0xff]   ;;  %v4288_v61 = vld [vmem:[#allocation2 + $0x1e8] ss:$12 sps:$4 sm:$0xff]  }
 0x2ac   :  { %v4289_v49 = vld [vmem:[#allocation2 + $0x1b0] ss:$12 sps:$4 sm:$0xff]  }
 0x2ad   :  { %v1609_v4 = vpack.c.bf16 %v1579_v63, %v1578_v55  ;;  %v4291_v63 = vld [vmem:[#allocation2 + $0x200] ss:$12 sps:$4 sm:$0xff]   ;;  %v4295_v55 = vld [vmem:[#allocation2 + $0x230] ss:$12 sps:$4 sm:$0xff]  }
 0x2b0   :  { %v3796_v7 = vpop.f32.mrf.mxu1 }
 0x2b1   :  { %v1522_v30 = vadd.f32 %v3796_v7, %v4644_v21  ;;  %v4247_v7 = vld [vmem:[#allocation2 + $0xa8] ss:$12 sps:$4 sm:$0xff]  }
 0x2b2   :  { %1657 = vmatmul.mubr.bf16.gmra.mxu1 %v4235_v9  ;;  %v1513_v8 = vpop.f32.mrf.mxu1  ;;  %v1608_v9 = vpack.c.bf16 %v1577_v5, %v1576_v44  ;;  %v4298_v5 = vld [vmem:[#allocation2 + $0x1f8] ss:$12 sps:$4 sm:$0xff]   ;;  %v4299_v44 = vld [vmem:[#allocation2 + $0x214] ss:$12 sps:$4 sm:$0xff]  }
 0x2b3   :  { %1664 = vmatprep.mubr.bf16.mxu1 %v4236_v10  ;;  %v1586_v39 = vmax.f32 %v1522_v30, 0.0  ;;  %v1514_v40 = vadd.f32 %v4644_v21, %v1513_v8  ;;  %v4248_v10 = vld [vmem:[#allocation2 + $0xc4] ss:$12 sps:$4 sm:$0xff]   ;;  %v4250_v8 = vld [vmem:[#allocation2 + $0x20] ss:$12 sps:$4 sm:$0xff]  }
 0x2b4   :  { %v3797_v11 = vpop.f32.mrf.mxu1  ;;  %v4268_v30 = vld [vmem:[#allocation2 + $0xf8] ss:$12 sps:$4 sm:$0xff]  }
 0x2b5   :  { %v1525_v26 = vadd.f32 %v3797_v11, %v4644_v21  ;;  %v1584_v46 = vmax.f32 %v1514_v40, 0.0  ;;  %v4251_v11 = vld [vmem:[#allocation2 + $0xdc] ss:$12 sps:$4 sm:$0xff]   ;;  %v4275_v40 = vld [vmem:[#allocation2 + $0x16c] ss:$12 sps:$4 sm:$0xff]  }
 0x2b6   :  { %v1516_v15 = vpop.f32.mrf.mxu1 }
 0x2b7   :  { %v1587_v35 = vmax.f32 %v1525_v26, 0.0  ;;  %v1517_v36 = vadd.f32 %v4644_v21, %v1516_v15  ;;  %v4256_v15 = vld [vmem:[#allocation2 + $0x68] ss:$12 sps:$4 sm:$0xff]   ;;  %v4265_v26 = vld [vmem:[#allocation2 + $0x120] ss:$12 sps:$4 sm:$0xff]  }
 0x2b9   :  { %v1613_v42 = vpack.c.bf16 %v1587_v35, %v1586_v39  ;;  %v1585_v43 = vmax.f32 %v1517_v36, 0.0  ;;  %v4271_v35 = vld [vmem:[#allocation2 + $0x154] ss:$12 sps:$4 sm:$0xff]  }
 0x2ba   :  { %1665 = vmatmul.mubr.bf16.gmra.mxu1 %v4237_v12  ;;  %v4254_v12 = vld [vmem:[#allocation2 + $0x50] ss:$12 sps:$4 sm:$0xff]   ;;  %v4272_v36 = vld [vmem:[#allocation2 + $0x128] ss:$12 sps:$4 sm:$0xff]   ;;  %v4274_v39 = vld [vmem:[#allocation2 + $0x140] ss:$12 sps:$4 sm:$0xff]  }
 0x2bb   :  { %1672 = vmatprep.mubr.bf16.mxu1 %v4238_v13  ;;  %v1612_v52 = vpack.c.bf16 %v1585_v43, %v1584_v46  ;;  %v4255_v13 = vld [vmem:[#allocation2 + $0xf4] ss:$12 sps:$4 sm:$0xff]   ;;  %v4278_v43 = vld [vmem:[#allocation2 + $0x170] ss:$12 sps:$4 sm:$0xff]  }
 0x2bc   :  { %v4280_v46 = vld [vmem:[#allocation2 + $0x188] ss:$12 sps:$4 sm:$0xff]  }
 0x2c0   :  { %v3800_v16 = vpop.f32.mrf.mxu1 }
 0x2c1   :  { %v1538_v19 = vadd.f32 %v3800_v16, %v4644_v21  ;;  %v4257_v16 = vld [vmem:[#allocation2 + $0xf0] ss:$12 sps:$4 sm:$0xff]  }
 0x2c2   :  { %v1529_v17 = vpop.f32.mrf.mxu1  ;;  %1673 = vmatmul.mubr.bf16.gmra.mxu1 %v4239_v18  ;;  %v4259_v18 = vld [vmem:[#allocation2 + $0x10c] ss:$12 sps:$4 sm:$0xff]  }
 0x2c3   :  { %1680 = vmatprep.mubr.bf16.mxu1 %v4240_v20  ;;  %v1530_v23 = vadd.f32 %v4644_v21, %v1529_v17  ;;  %v1590_v27 = vmax.f32 %v1538_v19, 0.0  ;;  %v4258_v17 = vld [vmem:[#allocation2 + $0x80] ss:$12 sps:$4 sm:$0xff]   ;;  %v4260_v19 = vld [vmem:[#allocation2 + $0x98] ss:$12 sps:$4 sm:$0xff]  }
 0x2c4   :  { %v3801_v22 = vpop.f32.mrf.mxu1  ;;  %v4261_v20 = vld [vmem:[#allocation2 + $0x108] ss:$12 sps:$4 sm:$0xff]  }
 0x2c5   :  { %v1541_v24 = vadd.f32 %v3801_v22, %v4644_v21  ;;  %v1588_v31 = vmax.f32 %v1530_v23, 0.0  ;;  %v4262_v22 = vld [vmem:[#allocation2 + $0xb0] ss:$12 sps:$4 sm:$0xff]  }
 0x2c6   :  { %v1532_v25 = vpop.f32.mrf.mxu1  ;;  %v4263_v23 = vld [vmem:[#allocation2 + $0x124] ss:$12 sps:$4 sm:$0xff]  }
 0x2c7   :  { %v1591_v28 = vmax.f32 %v1541_v24, 0.0  ;;  %v1533_v29 = vadd.f32 %v4644_v21, %v1532_v25  ;;  %v4252_v21 = vld [vmem:[#allocation2 + $0x38] ss:$12 sps:$4 sm:$0xff]   ;;  %v4264_v24 = vld [vmem:[#allocation2 + $0xc8] ss:$12 sps:$4 sm:$0xff]  }
 0x2c8   :  { %v4216_v25 = vld [vmem:[#allocation8 + $0x38] sm:$0xff]  }
 0x2c9   :  { %v1615_v32 = vpack.c.bf16 %v1591_v28, %v1590_v27  ;;  %v1589_v33 = vmax.f32 %v1533_v29, 0.0  ;;  %v4217_v27 = vld [vmem:[#allocation8 + $0x30] sm:$0xff]   ;;  %v4266_v28 = vld [vmem:[#allocation2 + $0xe0] ss:$12 sps:$4 sm:$0xff]   ;;  %v4267_v29 = vld [vmem:[#allocation2 + $0x13c] ss:$12 sps:$4 sm:$0xff]  }
 0x2ca   :  { %1681 = vmatmul.mubr.bf16.gmra.mxu1 %v4241_v34  ;;  %v4270_v34 = vld [vmem:[#allocation2 + $0x110] ss:$12 sps:$4 sm:$0xff]  }
 0x2cb   :  { %3802 = vmatprep.subr.bf16.mxu0 %v1615_v32  ;;  %v1614_v37 = vpack.c.bf16 %v1589_v33, %v1588_v31  ;;  %1688 = vmatprep.mubr.bf16.mxu1 %v4242_v38  ;;  %v4218_v31 = vld [vmem:[#allocation8 + $0x28] sm:$0xff]   ;;  %v4219_v33 = vld [vmem:[#allocation8 + $0x20] sm:$0xff]   ;;  %v4273_v38 = vld [vmem:[#allocation2 + $0x150] ss:$12 sps:$4 sm:$0xff]  }
 0x2cc   :  { %3803 = vmatpush3.bf16.msra.mxu0 %v1615_v32  ;;  %v4269_v32 = vld [vmem:[#allocation2 + $0x138] ss:$12 sps:$4 sm:$0xff]  }
 0x2cd   :  { %3804 = vmatprep.subr.bf16.mxu0 %v1614_v37 }
 0x2d0   :  { %3805 = vmatpush3.bf16.msra.mxu0 %v1614_v37  ;;  %v4220_v37 = vld [vmem:[#allocation8 + $0x18] sm:$0xff]  }
 0x2d1   :  { %3806 = vmatprep.subr.bf16.mxu0 %v1613_v42 }
 0x2d2   :  { %1689 = vmatmul.mubr.bf16.gmra.mxu1 %v4243_v47  ;;  %v4221_v47 = vld [vmem:[#allocation8 + $0x10] sm:$0xff]  }
 0x2d3   :  { %1696 = vmatprep.mubr.bf16.mxu1 %v4244_v53  ;;  %v4284_v53 = vld [vmem:[#allocation2 + $0x1b8] ss:$12 sps:$4 sm:$0xff]  }
 0x2d4   :  { %3807 = vmatpush3.bf16.msra.mxu0 %v1613_v42  ;;  %v4277_v42 = vld [vmem:[#allocation2 + $0x168] ss:$12 sps:$4 sm:$0xff]  }
 0x2d5   :  { %3808 = vmatprep.subr.bf16.mxu0 %v1612_v52 }
 0x2d8   :  { %3809 = vmatpush3.bf16.msra.mxu0 %v1612_v52  ;;  %v4283_v52 = vld [vmem:[#allocation2 + $0x1a0] ss:$12 sps:$4 sm:$0xff]  }
 0x2d9   :  { %3810 = vmatprep.subr.bf16.mxu0 %v1611_v59 }
 0x2da   :  { %1697 = vmatmul.mubr.bf16.gmra.mxu1 %v4245_v62  ;;  %v4290_v62 = vld [vmem:[#allocation2 + $0x1cc] ss:$12 sps:$4 sm:$0xff]  }
 0x2db   :  { %1704 = vmatprep.mubr.bf16.mxu1 %v4246_v2  ;;  %v4294_v2 = vld [vmem:[#allocation2 + $0x1e4] ss:$12 sps:$4 sm:$0xff]  }
 0x2dc   :  { %3811 = vmatpush3.bf16.msra.mxu0 %v1611_v59  ;;  %v4286_v59 = vld [vmem:[#allocation2 + $0x1b4] ss:$12 sps:$4 sm:$0xff]  }
 0x2dd   :  { %3812 = vmatprep.subr.bf16.mxu0 %v1610_v3 }
 0x2e0   :  { %3813 = vmatpush3.bf16.msra.mxu0 %v1610_v3  ;;  %v4293_v3 = vld [vmem:[#allocation2 + $0x1c8] ss:$12 sps:$4 sm:$0xff]  }
 0x2e1   :  { %3814 = vmatprep.subr.bf16.mxu0 %v1609_v4 }
 0x2e2   :  { %1705 = vmatmul.mubr.bf16.gmra.mxu1 %v4247_v7  ;;  %v4300_v7 = vld [vmem:[#allocation2 + $0x210] ss:$12 sps:$4 sm:$0xff]  }
 0x2e3   :  { %1712 = vmatprep.mubr.bf16.mxu1 %v4248_v10  ;;  %v4302_v10 = vld [vmem:[#allocation2 + $0x228] ss:$12 sps:$4 sm:$0xff]  }
 0x2e4   :  { %3815 = vmatpush3.bf16.msra.mxu0 %v1609_v4  ;;  %v4297_v4 = vld [vmem:[#allocation2 + $0x1fc] ss:$12 sps:$4 sm:$0xff]  }
 0x2e5   :  { %3816 = vmatprep.subr.bf16.mxu0 %v1608_v9 }
 0x2e8   :  { %3817 = vmatpush3.bf16.msra.mxu0 %v1608_v9  ;;  %v4301_v9 = vld [vmem:[#allocation2 + $0x22c] ss:$12 sps:$4 sm:$0xff]  }
 0x2e9   :  { %3866 = vmatprep.subr.bf16.mxu0 %v4216_v25 }
 0x2ea   :  { %1713 = vmatmul.mubr.bf16.gmra.mxu1 %v4249_v14 }
 0x2eb   :  { %3819 = vmatmul.mubr.bf16.vlgmr.msra.gmra.mxu0 %v4250_v8  ;;  %1720 = vmatprep.mubr.bf16.mxu1 %v4251_v11 }
 0x2ec   :  { %3822 = vmatprep.mubr.bf16.mxu0 %v4252_v21  ;;  %3867 = vmatpush3.bf16.msra.mxu0 %v4216_v25 }
 0x2ed   :  { %3868 = vmatprep.subr.bf16.mxu0 %v4217_v27 }
 0x2f0   :  { %3869 = vmatpush3.bf16.msra.mxu0 %v4217_v27 }
 0x2f1   :  { %3870 = vmatprep.subr.bf16.mxu0 %v4218_v31 }
 0x2f2   :  { %1721 = vmatmul.mubr.bf16.gmra.mxu1 %v4253_v51 }
 0x2f3   :  { %3823 = vmatmul.mubr.bf16.gmra.mxu0 %v4254_v12  ;;  %1728 = vmatprep.mubr.bf16.mxu1 %v4255_v13 }
 0x2f4   :  { %3826 = vmatprep.mubr.bf16.mxu0 %v4256_v15  ;;  %3871 = vmatpush3.bf16.msra.mxu0 %v4218_v31 }
 0x2f5   :  { %3872 = vmatprep.subr.bf16.mxu0 %v4219_v33 }
 0x2f8   :  { %3873 = vmatpush3.bf16.msra.mxu0 %v4219_v33 }
 0x2f9   :  { %3874 = vmatprep.subr.bf16.mxu0 %v4220_v37 }
 0x2fa   :  { %1729 = vmatmul.mubr.bf16.gmra.mxu1 %v4257_v16 }
 0x2fb   :  { %3827 = vmatmul.mubr.bf16.gmra.mxu0 %v4258_v17  ;;  %1736 = vmatprep.mubr.bf16.mxu1 %v4259_v18 }
 0x2fc   :  { %3830 = vmatprep.mubr.bf16.mxu0 %v4260_v19  ;;  %3875 = vmatpush3.bf16.msra.mxu0 %v4220_v37 }
 0x2fd   :  { %3876 = vmatprep.subr.bf16.mxu0 %v4221_v47 }
 0x300   :  { %3877 = vmatpush3.bf16.msra.mxu0 %v4221_v47 }
 0x301   :  { %3878 = vmatprep.subr.bf16.mxu0 %v4222_v54 }
 0x302   :  { %1737 = vmatmul.mubr.bf16.gmra.mxu1 %v4261_v20 }
 0x303   :  { %3831 = vmatmul.mubr.bf16.gmra.mxu0 %v4262_v22  ;;  %1744 = vmatprep.mubr.bf16.mxu1 %v4263_v23 }
 0x304   :  { %3834 = vmatprep.mubr.bf16.mxu0 %v4264_v24  ;;  %3879 = vmatpush3.bf16.msra.mxu0 %v4222_v54 }
 0x305   :  { %3880 = vmatprep.subr.bf16.mxu0 %v4223_v56 }
 0x308   :  { %3881 = vmatpush3.bf16.msra.mxu0 %v4223_v56 }
 0x30a   :  { %1745 = vmatmul.mubr.bf16.gmra.mxu1 %v4265_v26 }
 0x30b   :  { %3835 = vmatmul.mubr.bf16.gmra.mxu0 %v4266_v28  ;;  %1752 = vmatprep.mubr.bf16.mxu1 %v4267_v29 }
 0x30c   :  { %3838 = vmatprep.mubr.bf16.mxu0 %v4268_v30 }
 0x312   :  { %1753 = vmatmul.mubr.bf16.gmra.mxu1 %v4269_v32 }
 0x313   :  { %3839 = vmatmul.mubr.bf16.gmra.mxu0 %v4270_v34  ;;  %1760 = vmatprep.mubr.bf16.mxu1 %v4271_v35 }
 0x314   :  { %3842 = vmatprep.mubr.bf16.mxu0 %v4272_v36 }
 0x31a   :  { %1761 = vmatmul.mubr.bf16.gmra.mxu1 %v4273_v38 }
 0x31b   :  { %3843 = vmatmul.mubr.bf16.gmra.mxu0 %v4274_v39  ;;  %1768 = vmatprep.mubr.bf16.mxu1 %v4275_v40 }
 0x31c   :  { %3846 = vmatprep.mubr.bf16.mxu0 %v4276_v41 }
 0x322   :  { %1769 = vmatmul.mubr.bf16.gmra.mxu1 %v4277_v42 }
 0x323   :  { %3847 = vmatmul.mubr.bf16.gmra.mxu0 %v4278_v43  ;;  %1776 = vmatprep.mubr.bf16.mxu1 %v4279_v45 }
 0x324   :  { %3850 = vmatprep.mubr.bf16.mxu0 %v4280_v46 }
 0x32a   :  { %1777 = vmatmul.mubr.bf16.gmra.mxu1 %v4281_v48 }
 0x32b   :  { %1784 = vmatprep.mubr.bf16.mxu1 %v4282_v50  ;;  %3851 = vmatmul.mubr.bf16.gmra.mxu0 %v4283_v52 }
 0x32c   :  { %3854 = vmatprep.mubr.bf16.mxu0 %v4284_v53 }
 0x332   :  { %1785 = vmatmul.mubr.bf16.gmra.mxu1 %v4285_v57 }
 0x333   :  { %1792 = vmatprep.mubr.bf16.mxu1 %v4286_v59  ;;  %3855 = vmatmul.mubr.bf16.gmra.mxu0 %v4287_v60 }
 0x334   :  { %3858 = vmatprep.mubr.bf16.mxu0 %v4288_v61 }
 0x33a   :  { %1793 = vmatmul.mubr.bf16.gmra.mxu1 %v4289_v49 }
 0x33b   :  { %1800 = vmatprep.mubr.bf16.mxu1 %v4290_v62  ;;  %3859 = vmatmul.mubr.bf16.gmra.mxu0 %v4291_v63 }
 0x33c   :  { %3862 = vmatprep.mubr.bf16.mxu0 %v4292_v1 }
 0x342   :  { %1801 = vmatmul.mubr.bf16.gmra.mxu1 %v4293_v3 }
 0x343   :  { %1808 = vmatprep.mubr.bf16.mxu1 %v4294_v2  ;;  %3863 = vmatmul.mubr.bf16.gmra.mxu0 %v4295_v55 }
 0x34a   :  { %1809 = vmatmul.mubr.bf16.gmra.mxu1 %v4296_v58 }
 0x34b   :  { %1816 = vmatprep.mubr.bf16.mxu1 %v4297_v4 }
 0x352   :  { %1817 = vmatmul.mubr.bf16.gmra.mxu1 %v4298_v5 }
 0x353   :  { %1824 = vmatprep.mubr.bf16.mxu1 %v4299_v44 }
 0x35a   :  { %1825 = vmatmul.mubr.bf16.gmra.mxu1 %v4300_v7 }
 0x35b   :  { %1832 = vmatprep.mubr.bf16.mxu1 %v4301_v9 }
 0x362   :  { %1833 = vmatmul.mubr.bf16.gmra.mxu1 %v4302_v10 }
 0x363   :  { %2538 = vmatprep.mubr.bf16.mxu1 %v4636_v6 }
 0x36a   :  { %v1650_v14 = vpop.f32.mrf.mxu1 }
 0x36c   :  { %v1652_v8 = vpop.f32.mrf.mxu1 }
 0x36e   :  { %v1653_v11 = vpop.f32.mrf.mxu1 }
 0x370   :  { %v1655_v21 = vpop.f32.mrf.mxu1 }
 0x372   :  { %v1658_v51 = vpop.f32.mrf.mxu1 }
 0x374   :  { %v1660_v12 = vpop.f32.mrf.mxu1 }
 0x376   :  { %v1661_v13 = vpop.f32.mrf.mxu1 }
 0x378   :  { %v1663_v15 = vpop.f32.mrf.mxu1 }
 0x37a   :  { %v1666_v16 = vpop.f32.mrf.mxu1 }
 0x37c   :  { %v1668_v17 = vpop.f32.mrf.mxu1 }
 0x37e   :  { %v1669_v18 = vpop.f32.mrf.mxu1 }
 0x380   :  { %v1671_v19 = vpop.f32.mrf.mxu1 }
 0x382   :  { %v1674_v20 = vpop.f32.mrf.mxu1 }
 0x384   :  { %v1676_v22 = vpop.f32.mrf.mxu1 }
 0x386   :  { %v1677_v23 = vpop.f32.mrf.mxu1 }
 0x388   :  { %v1679_v24 = vpop.f32.mrf.mxu1 }
 0x38a   :  { %v1682_v25 = vpop.f32.mrf.mxu1 }
 0x38c   :  { %v1684_v26 = vpop.f32.mrf.mxu1 }
 0x38e   :  { %v1685_v27 = vpop.f32.mrf.mxu1 }
 0x390   :  { %v1687_v6 = vpop.f32.mrf.mxu1 }
 0x392   :  { %v1690_v28 = vpop.f32.mrf.mxu1 }
 0x394   :  { %v1692_v29 = vpop.f32.mrf.mxu1 }
 0x396   :  { %v1693_v30 = vpop.f32.mrf.mxu1 }
 0x398   :  { %v1695_v31 = vpop.f32.mrf.mxu1 }
 0x39a   :  { %v4736_v32 = vpop.f32.mrf.mxu1 }
 0x39c   :  { %v1700_v33 = vpop.f32.mrf.mxu1 }
 0x39e   :  { %v4738_v34 = vpop.f32.mrf.mxu1 }
 0x3a0   :  { %v1703_v35 = vpop.f32.mrf.mxu1 }
 0x3a2   :  { %v4740_v36 = vpop.f32.mrf.mxu1 }
 0x3a4   :  { %v1708_v37 = vpop.f32.mrf.mxu1 }
 0x3a6   :  { %v1709_v38 = vpop.f32.mrf.mxu1 }
 0x3a8   :  { %v1711_v39 = vpop.f32.mrf.mxu1 }
 0x3aa   :  { %v4742_v40 = vpop.f32.mrf.mxu1 }
 0x3ab   :  { %v3820_v41 = vpop.f32.mrf.mxu0 }
 0x3ac   :  { %v1716_v42 = vpop.f32.mrf.mxu1  ;;  %v1884_v56 = vadd.f32 %v3820_v41, %v1658_v51 }
 0x3ad   :  { %v1875_v43 = vpop.f32.mrf.mxu0 }
 0x3ae   :  { %v4744_v45 = vpop.f32.mrf.mxu1  ;;  %v1876_v52 = vadd.f32 %v1875_v43, %v1650_v14 }
 0x3af   :  { %v3821_v46 = vpop.f32.mrf.mxu0 }
 0x3b0   :  { %v1719_v47 = vpop.f32.mrf.mxu1  ;;  %v1887_v48 = vadd.f32 %v3821_v46, %v1661_v13 }
 0x3b1   :  { %v1878_v50 = vpop.f32.mrf.mxu0 }
 0x3b2   :  { %v1879_v53 = vadd.f32 %v1878_v50, %v1653_v11  ;;  %v4746_v54 = vpop.f32.mrf.mxu1  ;;  %v2067_v61 = vpack.c.bf16 %v1887_v48, %v1884_v56 }
 0x3b3   :  { %v3824_v57 = vpop.f32.mrf.mxu0 }
 0x3b4   :  { %v2066_v59 = vpack.c.bf16 %v1879_v53, %v1876_v52  ;;  %v1724_v60 = vpop.f32.mrf.mxu1  ;;  %v1900_v5 = vadd.f32 %v3824_v57, %v1674_v20 }
 0x3b5   :  { %v1891_v49 = vpop.f32.mrf.mxu0 }
 0x3b6   :  { %3882 = vmatprep.mubr.bf16.mxu0 %v2066_v59  ;;  %v1725_v62 = vpop.f32.mrf.mxu1  ;;  %v1892_v55 = vadd.f32 %v1891_v49, %v1666_v16 }
 0x3b7   :  { %v3825_v63 = vpop.f32.mrf.mxu0  ;;  %3883 = vmatmul.mubr.bf16.vlgmr.msra.gmra.mxu0 %v2067_v61 }
 0x3b8   :  { %v1727_v1 = vpop.f32.mrf.mxu1  ;;  %v1903_v3 = vadd.f32 %v3825_v63, %v1677_v23 }
 0x3b9   :  { %v1894_v2 = vpop.f32.mrf.mxu0 }
 0x3ba   :  { %v1895_v58 = vadd.f32 %v1894_v2, %v1669_v18  ;;  %v1730_v4 = vpop.f32.mrf.mxu1  ;;  %v2069_v10 = vpack.c.bf16 %v1903_v3, %v1900_v5 }
 0x3bb   :  { %v3828_v44 = vpop.f32.mrf.mxu0 }
 0x3bc   :  { %v2068_v7 = vpack.c.bf16 %v1895_v58, %v1892_v55  ;;  %v1732_v9 = vpop.f32.mrf.mxu1  ;;  %v1916_v19 = vadd.f32 %v3828_v44, %v1690_v28 }
 0x3bd   :  { %v1907_v14 = vpop.f32.mrf.mxu0 }
 0x3be   :  { %3886 = vmatprep.mubr.bf16.mxu0 %v2068_v7  ;;  %v1733_v8 = vpop.f32.mrf.mxu1  ;;  %v1908_v13 = vadd.f32 %v1907_v14, %v1682_v25 }
 0x3bf   :  { %v3829_v11 = vpop.f32.mrf.mxu0  ;;  %3887 = vmatmul.mubr.bf16.gmra.mxu0 %v2069_v10 }
 0x3c0   :  { %v1735_v21 = vpop.f32.mrf.mxu1  ;;  %v1919_v51 = vadd.f32 %v3829_v11, %v1693_v30 }
 0x3c1   :  { %v1910_v12 = vpop.f32.mrf.mxu0 }
 0x3c2   :  { %v1911_v15 = vadd.f32 %v1910_v12, %v1685_v27  ;;  %v1738_v17 = vpop.f32.mrf.mxu1  ;;  %v2071_v20 = vpack.c.bf16 %v1919_v51, %v1916_v19 }
 0x3c3   :  { %v3832_v16 = vpop.f32.mrf.mxu0 }
 0x3c4   :  { %v2070_v18 = vpack.c.bf16 %v1911_v15, %v1908_v13  ;;  %v1740_v22 = vpop.f32.mrf.mxu1  ;;  %v1932_v27 = vadd.f32 %v3832_v16, %v4740_v36 }
 0x3c5   :  { %v1923_v23 = vpop.f32.mrf.mxu0 }
 0x3c6   :  { %3890 = vmatprep.mubr.bf16.mxu0 %v2070_v18  ;;  %v1741_v24 = vpop.f32.mrf.mxu1  ;;  %v1924_v33 = vadd.f32 %v1923_v23, %v4736_v32 }
 0x3c7   :  { %v3833_v26 = vpop.f32.mrf.mxu0  ;;  %3891 = vmatmul.mubr.bf16.gmra.mxu0 %v2071_v20 }
 0x3c8   :  { %v1743_v6 = vpop.f32.mrf.mxu1  ;;  %v1935_v29 = vadd.f32 %v3833_v26, %v1709_v38 }
 0x3c9   :  { %v1926_v31 = vpop.f32.mrf.mxu0 }
 0x3ca   :  { %v1927_v30 = vadd.f32 %v1926_v31, %v4738_v34  ;;  %v1746_v25 = vpop.f32.mrf.mxu1  ;;  %v2073_v39 = vpack.c.bf16 %v1935_v29, %v1932_v27 }
 0x3cb   :  { %v3836_v28 = vpop.f32.mrf.mxu0 }
 0x3cc   :  { %v2072_v35 = vpack.c.bf16 %v1927_v30, %v1924_v33  ;;  %v1748_v37 = vpop.f32.mrf.mxu1  ;;  %v1948_v50 = vadd.f32 %v3836_v28, %v4746_v54 }
 0x3cd   :  { %v1939_v41 = vpop.f32.mrf.mxu0 }
 0x3ce   :  { %3894 = vmatprep.mubr.bf16.mxu0 %v2072_v35  ;;  %v1749_v42 = vpop.f32.mrf.mxu1  ;;  %v1940_v48 = vadd.f32 %v1939_v41, %v4742_v40 }
 0x3cf   :  { %3895 = vmatmul.mubr.bf16.gmra.mxu0 %v2073_v39  ;;  %v3837_v43 = vpop.f32.mrf.mxu0 }
 0x3d0   :  { %v1751_v46 = vpop.f32.mrf.mxu1  ;;  %v1951_v47 = vadd.f32 %v3837_v43, %v1725_v62 }
 0x3d1   :  { %v1942_v38 = vpop.f32.mrf.mxu0 }
 0x3d2   :  { %v1943_v32 = vadd.f32 %v1942_v38, %v4744_v45  ;;  %v1754_v34 = vpop.f32.mrf.mxu1  ;;  %v2075_v56 = vpack.c.bf16 %v1951_v47, %v1948_v50 }
 0x3d3   :  { %v3840_v36 = vpop.f32.mrf.mxu0 }
 0x3d4   :  { %v2074_v52 = vpack.c.bf16 %v1943_v32, %v1940_v48  ;;  %v1756_v53 = vpop.f32.mrf.mxu1  ;;  %v1964_v3 = vadd.f32 %v3840_v36, %v1738_v17 }
 0x3d5   :  { %v1955_v57 = vpop.f32.mrf.mxu0 }
 0x3d6   :  { %3898 = vmatprep.mubr.bf16.mxu0 %v2074_v52  ;;  %v1757_v59 = vpop.f32.mrf.mxu1  ;;  %v1956_v63 = vadd.f32 %v1955_v57, %v1730_v4 }
 0x3d7   :  { %v3841_v60 = vpop.f32.mrf.mxu0  ;;  %3899 = vmatmul.mubr.bf16.gmra.mxu0 %v2075_v56 }
 0x3d8   :  { %v1759_v61 = vpop.f32.mrf.mxu1  ;;  %v1967_v49 = vadd.f32 %v3841_v60, %v1741_v24 }
 0x3d9   :  { %v1958_v62 = vpop.f32.mrf.mxu0 }
 0x3da   :  { %v1959_v1 = vadd.f32 %v1958_v62, %v1733_v8  ;;  %v1762_v40 = vpop.f32.mrf.mxu1  ;;  %v2077_v54 = vpack.c.bf16 %v1967_v49, %v1964_v3 }
 0x3db   :  { %v3844_v45 = vpop.f32.mrf.mxu0 }
 0x3dc   :  { %v2076_v2 = vpack.c.bf16 %v1959_v1, %v1956_v63  ;;  %v1764_v55 = vpop.f32.mrf.mxu1  ;;  %v1980_v51 = vadd.f32 %v3844_v45, %v1754_v34 }
 0x3dd   :  { %v1971_v58 = vpop.f32.mrf.mxu0 }
 0x3de   :  { %3902 = vmatprep.mubr.bf16.mxu0 %v2076_v2  ;;  %v1765_v5 = vpop.f32.mrf.mxu1  ;;  %v1972_v14 = vadd.f32 %v1971_v58, %v1746_v25 }
 0x3df   :  { %v3845_v44 = vpop.f32.mrf.mxu0  ;;  %3903 = vmatmul.mubr.bf16.gmra.mxu0 %v2077_v54 }
 0x3e0   :  { %v1767_v7 = vpop.f32.mrf.mxu1  ;;  %v1983_v9 = vadd.f32 %v3845_v44, %v1757_v59 }
 0x3e1   :  { %v1974_v10 = vpop.f32.mrf.mxu0 }
 0x3e2   :  { %v1975_v11 = vadd.f32 %v1974_v10, %v1749_v42  ;;  %v1770_v21 = vpop.f32.mrf.mxu1  ;;  %v2079_v13 = vpack.c.bf16 %v1983_v9, %v1980_v51 }
 0x3e3   :  { %v3848_v4 = vpop.f32.mrf.mxu0 }
 0x3e4   :  { %v2078_v8 = vpack.c.bf16 %v1975_v11, %v1972_v14  ;;  %v1772_v12 = vpop.f32.mrf.mxu1  ;;  %v1996_v26 = vadd.f32 %v3848_v4, %v1770_v21 }
 0x3e5   :  { %v1987_v15 = vpop.f32.mrf.mxu0 }
 0x3e6   :  { %3906 = vmatprep.mubr.bf16.mxu0 %v2078_v8  ;;  %v1773_v17 = vpop.f32.mrf.mxu1  ;;  %v1988_v20 = vadd.f32 %v1987_v15, %v1762_v40 }
 0x3e7   :  { %v3849_v19 = vpop.f32.mrf.mxu0  ;;  %3907 = vmatmul.mubr.bf16.gmra.mxu0 %v2079_v13 }
 0x3e8   :  { %v1775_v16 = vpop.f32.mrf.mxu1  ;;  %v1999_v22 = vadd.f32 %v3849_v19, %v1773_v17 }
 0x3e9   :  { %v1990_v18 = vpop.f32.mrf.mxu0 }
 0x3ea   :  { %v1991_v23 = vadd.f32 %v1990_v18, %v1765_v5  ;;  %v1778_v24 = vpop.f32.mrf.mxu1  ;;  %v2081_v33 = vpack.c.bf16 %v1999_v22, %v1996_v26 }
 0x3eb   :  { %v3852_v6 = vpop.f32.mrf.mxu0 }
 0x3ec   :  { %v2080_v29 = vpack.c.bf16 %v1991_v23, %v1988_v20  ;;  %v1780_v31 = vpop.f32.mrf.mxu1 }
 0x3ed   :  { %v2003_v30 = vpop.f32.mrf.mxu0 }
 0x3ee   :  { %3910 = vmatprep.mubr.bf16.mxu0 %v2080_v29  ;;  %v1781_v25 = vpop.f32.mrf.mxu1  ;;  %v2004_v35 = vadd.f32 %v2003_v30, %v1778_v24 }
 0x3ef   :  { %3911 = vmatmul.mubr.bf16.gmra.mxu0 %v2081_v33  ;;  %v3853_v27 = vpop.f32.mrf.mxu0 }
 0x3f0   :  { %v1783_v28 = vpop.f32.mrf.mxu1 }
 0x3f1   :  { %v2006_v37 = vpop.f32.mrf.mxu0 }
 0x3f2   :  { %v1786_v39 = vpop.f32.mrf.mxu1  ;;  %v2007_v41 = vadd.f32 %v2006_v37, %v1781_v25 }
 0x3f3   :  { %v3856_v42 = vpop.f32.mrf.mxu0  ;;  %v2012_v47 = vadd.f32 %v3852_v6, %v1786_v39  ;;  %v4303_v39 = vld [vmem:[#allocation2 + $0x8] ss:$12 sps:$4 sm:$0xff]  }
 0x3f4   :  { %v1788_v43 = vpop.f32.mrf.mxu1  ;;  %v2082_v46 = vpack.c.bf16 %v2007_v41, %v2004_v35  ;;  %v4757_v41 = vld [vmem:[%s5054_s6] ss:$0 sm:$0xff] }
 0x3f5   :  { %v2019_v38 = vpop.f32.mrf.mxu0 }
 0x3f6   :  { %v1789_v48 = vpop.f32.mrf.mxu1  ;;  %3914 = vmatprep.mubr.bf16.mxu0 %v2082_v46 }
 0x3f7   :  { %v2015_v32 = vadd.f32 %v3853_v27, %v1789_v48  ;;  %v3857_v50 = vpop.f32.mrf.mxu0 }
 0x3f8   :  { %v1791_v34 = vpop.f32.mrf.mxu1 }
 0x3f9   :  { %v2083_v36 = vpack.c.bf16 %v2015_v32, %v2012_v47  ;;  %v2022_v56 = vpop.f32.mrf.mxu0 }
 0x3fa   :  { %v1794_v52 = vpop.f32.mrf.mxu1 }
 0x3fb   :  { %3915 = vmatmul.mubr.bf16.gmra.mxu0 %v2083_v36  ;;  %v2020_v57 = vadd.f32 %v2019_v38, %v1794_v52  ;;  %v3860_v49 = vpop.f32.mrf.mxu0 }
 0x3fc   :  { %v1796_v53 = vpop.f32.mrf.mxu1 }
 0x3fd   :  { %v2035_v40 = vpop.f32.mrf.mxu0 }
 0x3fe   :  { %v1797_v59 = vpop.f32.mrf.mxu1 }
 0x3ff   :  { %v2023_v60 = vadd.f32 %v2022_v56, %v1797_v59  ;;  %v3861_v54 = vpop.f32.mrf.mxu0 }
 0x400   :  { %v1799_v61 = vpop.f32.mrf.mxu1 }
 0x401   :  { %v2084_v62 = vpack.c.bf16 %v2023_v60, %v2020_v57  ;;  %v2038_v7 = vpop.f32.mrf.mxu0 }
 0x402   :  { %v1802_v63 = vpop.f32.mrf.mxu1 }
 0x403   :  { %3918 = vmatprep.mubr.bf16.mxu0 %v2084_v62  ;;  %v2028_v3 = vadd.f32 %v3856_v42, %v1802_v63  ;;  %v3864_v21 = vpop.f32.mrf.mxu0 }
 0x404   :  { %v1804_v1 = vpop.f32.mrf.mxu1 }
 0x405   :  { %v2051_v12 = vpop.f32.mrf.mxu0 }
 0x406   :  { %v1805_v45 = vpop.f32.mrf.mxu1 }
 0x407   :  { %v2031_v2 = vadd.f32 %v3857_v50, %v1805_v45  ;;  %v3865_v16 = vpop.f32.mrf.mxu0 }
 0x408   :  { %v1807_v55 = vpop.f32.mrf.mxu1 }
 0x409   :  { %v2085_v58 = vpack.c.bf16 %v2031_v2, %v2028_v3  ;;  %v2054_v23 = vpop.f32.mrf.mxu0 }
 0x40a   :  { %v1810_v5 = vpop.f32.mrf.mxu1 }
 0x40b   :  { %3919 = vmatmul.mubr.bf16.gmra.mxu0 %v2085_v58  ;;  %v2036_v9 = vadd.f32 %v2035_v40, %v1810_v5 }
 0x40c   :  { %v1812_v44 = vpop.f32.mrf.mxu1 }
 0x40e   :  { %v1813_v10 = vpop.f32.mrf.mxu1 }
 0x40f   :  { %v2039_v14 = vadd.f32 %v2038_v7, %v1813_v10 }
 0x410   :  { %v1815_v11 = vpop.f32.mrf.mxu1 }
 0x411   :  { %v2086_v51 = vpack.c.bf16 %v2039_v14, %v2036_v9 }
 0x412   :  { %v1818_v4 = vpop.f32.mrf.mxu1 }
 0x413   :  { %3922 = vmatprep.mubr.bf16.mxu0 %v2086_v51  ;;  %v2044_v13 = vadd.f32 %v3860_v49, %v1818_v4 }
 0x414   :  { %v1820_v8 = vpop.f32.mrf.mxu1 }
 0x416   :  { %v1821_v15 = vpop.f32.mrf.mxu1 }
 0x417   :  { %v2047_v17 = vadd.f32 %v3861_v54, %v1821_v15 }
 0x418   :  { %v1823_v19 = vpop.f32.mrf.mxu1 }
 0x419   :  { %v2087_v18 = vpack.c.bf16 %v2047_v17, %v2044_v13 }
 0x41a   :  { %v1826_v22 = vpop.f32.mrf.mxu1 }
 0x41b   :  { %3923 = vmatmul.mubr.bf16.gmra.mxu0 %v2087_v18  ;;  %v2052_v24 = vadd.f32 %v2051_v12, %v1826_v22 }
 0x41c   :  { %v1828_v20 = vpop.f32.mrf.mxu1 }
 0x41e   :  { %v1829_v26 = vpop.f32.mrf.mxu1 }
 0x41f   :  { %v2055_v6 = vadd.f32 %v2054_v23, %v1829_v26 }
 0x420   :  { %v1831_v29 = vpop.f32.mrf.mxu1 }
 0x421   :  { %v2088_v31 = vpack.c.bf16 %v2055_v6, %v2052_v24 }
 0x422   :  { %v1834_v33 = vpop.f32.mrf.mxu1 }
 0x423   :  { %3926 = vmatprep.mubr.bf16.mxu0 %v2088_v31  ;;  %v2060_v25 = vadd.f32 %v3864_v21, %v1834_v33 }
 0x424   :  { %v1836_v30 = vpop.f32.mrf.mxu1 }
 0x426   :  { %v1837_v27 = vpop.f32.mrf.mxu1 }
 0x427   :  { %v2063_v28 = vadd.f32 %v3865_v16, %v1837_v27 }
 0x428   :  { %v1839_v35 = vpop.f32.mrf.mxu1 }
 0x429   :  { %v2089_v37 = vpack.c.bf16 %v2063_v28, %v2060_v25 }
 0x42b   :  { %3927 = vmatmul.mubr.bf16.gmra.mxu0 %v2089_v37 }
 0x42c   :  { %3946 = vmatprep.mubr.bf16.mxu0 %v4303_v39 }
 0x477   :  { %v3884_v42 = vpop.f32.mrf.mxu0 }
 0x478   :  { %v4760_v43 = vadd.f32 %v3884_v42, %v4757_v41 }
 0x479   :  { %v2195_v46 = vpop.f32.mrf.mxu0 }
 0x47a   :  { %v2388_v47 = vmax.f32 %v4760_v43, 0.0  ;;  %v4764_v38 = vadd.f32 %v4757_v41, %v2195_v46 }
 0x47b   :  { %v3885_v48 = vpop.f32.mrf.mxu0 }
 0x47c   :  { %2436 = vst [vmem:[#allocation12 + $0x10] sm:$0xff] %v2388_v47  ;;  %v2386_v32 = vmax.f32 %v4764_v38, 0.0  ;;  %v4770_v34 = vadd.f32 %v3885_v48, %v4757_v41 }
 0x47d   :  { %v2198_v50 = vpop.f32.mrf.mxu0 }
 0x47e   :  { %2434 = vst [vmem:[#allocation12] sm:$0xff] %v2386_v32  ;;  %v2389_v36 = vmax.f32 %v4770_v34, 0.0  ;;  %v4776_v52 = vadd.f32 %v4757_v41, %v2198_v50 }
 0x47f   :  { %v3888_v53 = vpop.f32.mrf.mxu0 }
 0x480   :  { %2437 = vst [vmem:[#allocation12 + $0x18] sm:$0xff] %v2389_v36  ;;  %v2387_v56 = vmax.f32 %v4776_v52, 0.0  ;;  %v4782_v57 = vadd.f32 %v3888_v53, %v4757_v41 }
 0x481   :  { %v2211_v59 = vpop.f32.mrf.mxu0 }
 0x482   :  { %2435 = vst [vmem:[#allocation12 + $0x8] sm:$0xff] %v2387_v56  ;;  %v2392_v60 = vmax.f32 %v4782_v57, 0.0  ;;  %v4788_v61 = vadd.f32 %v4757_v41, %v2211_v59  ;;  %v2482_v43 = vpack.c.bf16 %v2387_v56, %v2386_v32 }
 0x483   :  { %v3889_v49 = vpop.f32.mrf.mxu0 }
 0x484   :  { %2440 = vst [vmem:[#allocation12 + $0x30] sm:$0xff] %v2392_v60  ;;  %v2390_v62 = vmax.f32 %v4788_v61, 0.0  ;;  %v4794_v63 = vadd.f32 %v3889_v49, %v4757_v41  ;;  %v2483_v61 = vpack.c.bf16 %v2389_v36, %v2388_v47 }
 0x485   :  { %v2214_v1 = vpop.f32.mrf.mxu0 }
 0x486   :  { %2438 = vst [vmem:[#allocation12 + $0x20] sm:$0xff] %v2390_v62  ;;  %v2393_v40 = vmax.f32 %v4794_v63, 0.0  ;;  %v4800_v3 = vadd.f32 %v4757_v41, %v2214_v1 }
 0x487   :  { %v3892_v45 = vpop.f32.mrf.mxu0 }
 0x488   :  { %2441 = vst [vmem:[#allocation12 + $0x38] sm:$0xff] %v2393_v40  ;;  %v2391_v2 = vmax.f32 %v4800_v3, 0.0  ;;  %v2236_v55 = vadd.f32 %v3892_v45, %v4757_v41 }
 0x489   :  { %v2227_v54 = vpop.f32.mrf.mxu0 }
 0x48a   :  { %2439 = vst [vmem:[#allocation12 + $0x28] sm:$0xff] %v2391_v2  ;;  %v2396_v58 = vmax.f32 %v2236_v55, 0.0  ;;  %v2228_v5 = vadd.f32 %v4757_v41, %v2227_v54 }
 0x48b   :  { %v3893_v44 = vpop.f32.mrf.mxu0 }
 0x48c   :  { %2444 = vst [vmem:[#allocation12 + $0x50] sm:$0xff] %v2396_v58  ;;  %v2394_v7 = vmax.f32 %v2228_v5, 0.0  ;;  %v2239_v9 = vadd.f32 %v3893_v44, %v4757_v41 }
 0x48d   :  { %v2230_v10 = vpop.f32.mrf.mxu0 }
 0x48e   :  { %2442 = vst [vmem:[#allocation12 + $0x40] sm:$0xff] %v2394_v7  ;;  %v2397_v14 = vmax.f32 %v2239_v9, 0.0  ;;  %v2231_v11 = vadd.f32 %v4757_v41, %v2230_v10 }
 0x48f   :  { %v3896_v21 = vpop.f32.mrf.mxu0 }
 0x490   :  { %2445 = vst [vmem:[#allocation12 + $0x58] sm:$0xff] %v2397_v14  ;;  %v2395_v51 = vmax.f32 %v2231_v11, 0.0  ;;  %v2252_v4 = vadd.f32 %v3896_v21, %v4757_v41  ;;  %v2487_v42 = vpack.c.bf16 %v2397_v14, %v2396_v58 }
 0x491   :  { %v2243_v8 = vpop.f32.mrf.mxu0 }
 0x492   :  { %2443 = vst [vmem:[#allocation12 + $0x48] sm:$0xff] %v2395_v51  ;;  %v2400_v12 = vmax.f32 %v2252_v4, 0.0  ;;  %v2244_v13 = vadd.f32 %v4757_v41, %v2243_v8  ;;  %v2486_v1 = vpack.c.bf16 %v2395_v51, %v2394_v7  ;;  %v2485_v7 = vpack.c.bf16 %v2393_v40, %v2392_v60 }
 0x493   :  { %v3897_v15 = vpop.f32.mrf.mxu0  ;;  %v2484_v60 = vpack.c.bf16 %v2391_v2, %v2390_v62 }
 0x494   :  { %2448 = vst [vmem:[#allocation12 + $0x70] sm:$0xff] %v2400_v12  ;;  %v2398_v17 = vmax.f32 %v2244_v13, 0.0  ;;  %v2255_v19 = vadd.f32 %v3897_v15, %v4757_v41 }
 0x495   :  { %v2246_v16 = vpop.f32.mrf.mxu0 }
 0x496   :  { %2446 = vst [vmem:[#allocation12 + $0x60] sm:$0xff] %v2398_v17  ;;  %v2401_v18 = vmax.f32 %v2255_v19, 0.0  ;;  %v2247_v22 = vadd.f32 %v4757_v41, %v2246_v16 }
 0x497   :  { %v3900_v20 = vpop.f32.mrf.mxu0 }
 0x498   :  { %2449 = vst [vmem:[#allocation12 + $0x78] sm:$0xff] %v2401_v18  ;;  %v2489_v23 = vpack.c.bf16 %v2401_v18, %v2400_v12  ;;  %v2399_v24 = vmax.f32 %v2247_v22, 0.0  ;;  %v4816_v26 = vadd.f32 %v3900_v20, %v4757_v41 }
 0x499   :  { %v2259_v6 = vpop.f32.mrf.mxu0 }
 0x49a   :  { %2447 = vst [vmem:[#allocation12 + $0x68] sm:$0xff] %v2399_v24  ;;  %2507 = vmatpush1.bf16.msra.mxu1 %v2489_v23  ;;  %v2404_v29 = vmax.f32 %v4816_v26, 0.0  ;;  %v4820_v31 = vadd.f32 %v4757_v41, %v2259_v6  ;;  %v2488_v30 = vpack.c.bf16 %v2399_v24, %v2398_v17 }
 0x49b   :  { %2508 = vmatprep.subr.bf16.mxu1 %v4533_v0  ;;  %v3901_v33 = vpop.f32.mrf.mxu0 }
 0x49c   :  { %2452 = vst [vmem:[#allocation12 + $0x90] sm:$0xff] %v2404_v29  ;;  %v2402_v25 = vmax.f32 %v4820_v31, 0.0  ;;  %v4827_v27 = vadd.f32 %v3901_v33, %v4757_v41 }
 0x49d   :  { %v2262_v28 = vpop.f32.mrf.mxu0 }
 0x49e   :  { %2509 = vmatpush1.bf16.msra.mxu1 %v2488_v30  ;;  %2450 = vst [vmem:[#allocation12 + $0x80] sm:$0xff] %v2402_v25  ;;  %v2405_v35 = vmax.f32 %v4827_v27, 0.0  ;;  %v4833_v37 = vadd.f32 %v4757_v41, %v2262_v28 }
 0x49f   :  { %2510 = vmatprep.subr.bf16.mxu1 %v4533_v0  ;;  %v3904_v39 = vpop.f32.mrf.mxu0 }
 0x4a0   :  { %2453 = vst [vmem:[#allocation12 + $0x98] sm:$0xff] %v2405_v35  ;;  %v2403_v46 = vmax.f32 %v4833_v37, 0.0  ;;  %v4840_v48 = vadd.f32 %v3904_v39, %v4757_v41 }
 0x4a1   :  { %v2275_v50 = vpop.f32.mrf.mxu0 }
 0x4a2   :  { %2511 = vmatpush1.bf16.msra.mxu1 %v2487_v42  ;;  %2451 = vst [vmem:[#allocation12 + $0x88] sm:$0xff] %v2403_v46  ;;  %v2408_v53 = vmax.f32 %v4840_v48, 0.0  ;;  %v4846_v59 = vadd.f32 %v4757_v41, %v2275_v50 }
 0x4a3   :  { %2512 = vmatprep.subr.bf16.mxu1 %v4533_v0  ;;  %v3905_v49 = vpop.f32.mrf.mxu0 }
 0x4a4   :  { %2456 = vst [vmem:[#allocation12 + $0xb0] sm:$0xff] %v2408_v53  ;;  %v2406_v45 = vmax.f32 %v4846_v59, 0.0  ;;  %v4853_v55 = vadd.f32 %v3905_v49, %v4757_v41  ;;  %v2491_v59 = vpack.c.bf16 %v2405_v35, %v2404_v29  ;;  %v2490_v29 = vpack.c.bf16 %v2403_v46, %v2402_v25  ;;  %v4304_v35 = vld [vmem:[#allocation2] ss:$12 sps:$4 sm:$0xff]  }
 0x4a5   :  { %v2278_v54 = vpop.f32.mrf.mxu0 }
 0x4a6   :  { %2513 = vmatpush1.bf16.msra.mxu1 %v2486_v1  ;;  %2454 = vst [vmem:[#allocation12 + $0xa0] sm:$0xff] %v2406_v45  ;;  %v2409_v58 = vmax.f32 %v4853_v55, 0.0  ;;  %v4859_v5 = vadd.f32 %v4757_v41, %v2278_v54 }
 0x4a7   :  { %2514 = vmatprep.subr.bf16.mxu1 %v4533_v0  ;;  %v3908_v44 = vpop.f32.mrf.mxu0 }
 0x4a8   :  { %2457 = vst [vmem:[#allocation12 + $0xb8] sm:$0xff] %v2409_v58  ;;  %v2407_v9 = vmax.f32 %v4859_v5, 0.0  ;;  %v2300_v10 = vadd.f32 %v3908_v44, %v4757_v41  ;;  %v2493_v44 = vpack.c.bf16 %v2409_v58, %v2408_v53 }
 0x4a9   :  { %v2291_v14 = vpop.f32.mrf.mxu0 }
 0x4aa   :  { %2515 = vmatpush1.bf16.msra.mxu1 %v2485_v7  ;;  %2455 = vst [vmem:[#allocation12 + $0xa8] sm:$0xff] %v2407_v9  ;;  %v2412_v11 = vmax.f32 %v2300_v10, 0.0  ;;  %v2292_v21 = vadd.f32 %v4757_v41, %v2291_v14  ;;  %v2492_v10 = vpack.c.bf16 %v2407_v9, %v2406_v45  ;;  %v4305_v9 = vld [vmem:[#allocation2 + $0x1c] ss:$12 sps:$4 sm:$0xff]  }
 0x4ab   :  { %2516 = vmatprep.subr.bf16.mxu1 %v4533_v0  ;;  %v3909_v57 = vpop.f32.mrf.mxu0 }
 0x4ac   :  { %2460 = vst [vmem:[#allocation12 + $0xd0] sm:$0xff] %v2412_v11  ;;  %v2410_v63 = vmax.f32 %v2292_v21, 0.0  ;;  %v2303_v40 = vadd.f32 %v3909_v57, %v4757_v41 }
 0x4ad   :  { %v2294_v51 = vpop.f32.mrf.mxu0 }
 0x4ae   :  { %2517 = vmatpush1.bf16.msra.mxu1 %v2484_v60  ;;  %2458 = vst [vmem:[#allocation12 + $0xc0] sm:$0xff] %v2410_v63  ;;  %v2413_v4 = vmax.f32 %v2303_v40, 0.0  ;;  %v2295_v8 = vadd.f32 %v4757_v41, %v2294_v51  ;;  %v4306_v51 = vld [vmem:[#allocation2 + $0x18] ss:$12 sps:$4 sm:$0xff]  }
 0x4af   :  { %2518 = vmatprep.subr.bf16.mxu1 %v4533_v0  ;;  %v3912_v12 = vpop.f32.mrf.mxu0 }
 0x4b0   :  { %2461 = vst [vmem:[#allocation12 + $0xd8] sm:$0xff] %v2413_v4  ;;  %v2411_v62 = vmax.f32 %v2295_v8, 0.0  ;;  %v2316_v3 = vadd.f32 %v3912_v12, %v4757_v41  ;;  %v2495_v6 = vpack.c.bf16 %v2413_v4, %v2412_v11  ;;  %v4307_v12 = vld [vmem:[#allocation2 + $0x34] ss:$12 sps:$4 sm:$0xff]  }
 0x4b1   :  { %v2307_v2 = vpop.f32.mrf.mxu0 }
 0x4b2   :  { %2519 = vmatpush1.bf16.msra.mxu1 %v2483_v61  ;;  %2459 = vst [vmem:[#allocation12 + $0xc8] sm:$0xff] %v2411_v62  ;;  %v2416_v13 = vmax.f32 %v2316_v3, 0.0  ;;  %v2308_v15 = vadd.f32 %v4757_v41, %v2307_v2  ;;  %v2494_v50 = vpack.c.bf16 %v2411_v62, %v2410_v63  ;;  %v4308_v62 = vld [vmem:[#allocation2 + $0x30] ss:$12 sps:$4 sm:$0xff]   ;;  %v4309_v3 = vld [vmem:[#allocation2 + $0x4c] ss:$12 sps:$4 sm:$0xff]  }
 0x4b3   :  { %2520 = vmatprep.subr.bf16.mxu1 %v4533_v0  ;;  %v3913_v17 = vpop.f32.mrf.mxu0 }
 0x4b4   :  { %2464 = vst [vmem:[#allocation12 + $0xf0] sm:$0xff] %v2416_v13  ;;  %v2414_v47 = vmax.f32 %v2308_v15, 0.0  ;;  %v2319_v34 = vadd.f32 %v3913_v17, %v4757_v41 }
 0x4b5   :  { %v2310_v36 = vpop.f32.mrf.mxu0 }
 0x4b6   :  { %2521 = vmatpush1.bf16.msra.mxu1 %v2482_v43  ;;  %2462 = vst [vmem:[#allocation12 + $0xe0] sm:$0xff] %v2414_v47  ;;  %v2417_v19 = vmax.f32 %v2319_v34, 0.0  ;;  %v2311_v16 = vadd.f32 %v4757_v41, %v2310_v36 }
 0x4b7   :  { %2522 = vmatprep.subr.bf16.mxu1 %v4533_v0 }
 0x4b8   :  { %2465 = vst [vmem:[#allocation12 + $0xf8] sm:$0xff] %v2417_v19  ;;  %v2497_v18 = vpack.c.bf16 %v2417_v19, %v2416_v13  ;;  %v2415_v22 = vmax.f32 %v2311_v16, 0.0  ;;  %v4310_v16 = vld [vmem:[#allocation2 + $0x48] ss:$12 sps:$4 sm:$0xff]  }
 0x4ba   :  { %2463 = vst [vmem:[#allocation12 + $0xe8] sm:$0xff] %v2415_v22  ;;  %2523 = vmatpush2.bf16.msra.mxu1 %v2497_v18  ;;  %v2496_v32 = vpack.c.bf16 %v2415_v22, %v2414_v47 }
 0x4bb   :  { %2524 = vmatprep.subr.bf16.mxu1 %v4533_v0  ;;  %v3916_v38 = vpop.f32.mrf.mxu0 }
 0x4bc   :  { %v2332_v52 = vadd.f32 %v3916_v38, %v4757_v41  ;;  %v4311_v38 = vld [vmem:[#allocation2 + $0x64] ss:$12 sps:$4 sm:$0xff]  }
 0x4bd   :  { %v2323_v56 = vpop.f32.mrf.mxu0 }
 0x4be   :  { %2525 = vmatpush2.bf16.msra.mxu1 %v2496_v32  ;;  %v2420_v20 = vmax.f32 %v2332_v52, 0.0  ;;  %v2324_v23 = vadd.f32 %v4757_v41, %v2323_v56 }
 0x4bf   :  { %2526 = vmatprep.subr.bf16.mxu1 %v4533_v0  ;;  %v3917_v24 = vpop.f32.mrf.mxu0 }
 0x4c0   :  { %2468 = vst [vmem:[#allocation12 + $0x110] sm:$0xff] %v2420_v20  ;;  %v2418_v33 = vmax.f32 %v2324_v23, 0.0  ;;  %v2335_v30 = vadd.f32 %v3917_v24, %v4757_v41  ;;  %v4312_v23 = vld [vmem:[#allocation2 + $0x60] ss:$12 sps:$4 sm:$0xff]   ;;  %v4313_v24 = vld [vmem:[#allocation2 + $0x7c] ss:$12 sps:$4 sm:$0xff]  }
 0x4c1   :  { %v2326_v28 = vpop.f32.mrf.mxu0 }
 0x4c2   :  { %2527 = vmatpush2.bf16.msra.mxu1 %v2495_v6  ;;  %2466 = vst [vmem:[#allocation12 + $0x100] sm:$0xff] %v2418_v33  ;;  %v2421_v39 = vmax.f32 %v2335_v30, 0.0  ;;  %v2327_v42 = vadd.f32 %v4757_v41, %v2326_v28  ;;  %v4314_v6 = vld [vmem:[#allocation2 + $0x78] ss:$12 sps:$4 sm:$0xff]   ;;  %v4315_v30 = vld [vmem:[#allocation2 + $0x94] ss:$12 sps:$4 sm:$0xff]  }
 0x4c3   :  { %2528 = vmatprep.subr.bf16.mxu1 %v4533_v0 }
 0x4c4   :  { %2469 = vst [vmem:[#allocation12 + $0x118] sm:$0xff] %v2421_v39  ;;  %v4902_v49 = vpack.c.bf16 %v2421_v39, %v2420_v20  ;;  %v2419_v1 = vmax.f32 %v2327_v42, 0.0  ;;  %v4316_v39 = vld [vmem:[#allocation2 + $0x90] ss:$12 sps:$4 sm:$0xff]   ;;  %v4317_v42 = vld [vmem:[#allocation2 + $0xac] ss:$12 sps:$4 sm:$0xff]  }
 0x4c6   :  { %2529 = vmatpush2.bf16.msra.mxu1 %v2494_v50  ;;  %2467 = vst [vmem:[#allocation12 + $0x108] sm:$0xff] %v2419_v1  ;;  %v4904_v54 = vpack.c.bf16 %v2419_v1, %v2418_v33  ;;  %v4318_v50 = vld [vmem:[#allocation2 + $0xa8] ss:$12 sps:$4 sm:$0xff]   ;;  %v4319_v1 = vld [vmem:[#allocation2 + $0xc4] ss:$12 sps:$4 sm:$0xff]  }
 0x4c7   :  { %2530 = vmatprep.subr.bf16.mxu1 %v4533_v0 }
 0x4ca   :  { %2531 = vmatpush2.bf16.msra.mxu1 %v2493_v44  ;;  %v4320_v44 = vld [vmem:[#allocation2 + $0x20] ss:$12 sps:$4 sm:$0xff]  }
 0x4cb   :  { %2532 = vmatprep.subr.bf16.mxu1 %v4533_v0  ;;  %v3920_v7 = vpop.f32.mrf.mxu0 }
 0x4cc   :  { %v4917_v14 = vadd.f32 %v3920_v7, %v4757_v41  ;;  %v4321_v7 = vld [vmem:[#allocation2 + $0x38] ss:$12 sps:$4 sm:$0xff]  }
 0x4cd   :  { %v2339_v11 = vpop.f32.mrf.mxu0 }
 0x4ce   :  { %2533 = vmatpush2.bf16.msra.mxu1 %v2492_v10  ;;  %v2424_v21 = vmax.f32 %v4917_v14, 0.0  ;;  %v4921_v48 = vadd.f32 %v4757_v41, %v2339_v11  ;;  %v4322_v10 = vld [vmem:[#allocation2 + $0xc0] ss:$12 sps:$4 sm:$0xff]   ;;  %v4323_v14 = vld [vmem:[#allocation2 + $0xdc] ss:$12 sps:$4 sm:$0xff]  }
 0x4cf   :  { %2534 = vmatprep.subr.bf16.mxu1 %v4533_v0  ;;  %v3921_v53 = vpop.f32.mrf.mxu0  ;;  %v4325_v11 = vld [vmem:[#allocation2 + $0x68] ss:$12 sps:$4 sm:$0xff]  }
 0x4d0   :  { %2472 = vst [vmem:[#allocation12 + $0x130] sm:$0xff] %v2424_v21  ;;  %v2422_v45 = vmax.f32 %v4921_v48, 0.0  ;;  %v4932_v55 = vadd.f32 %v3921_v53, %v4757_v41  ;;  %v4327_v48 = vld [vmem:[#allocation2 + $0xf4] ss:$12 sps:$4 sm:$0xff]   ;;  %v4224_v53 = vld [vmem:[#allocation10 + $0x38] sm:$0xff]  }
 0x4d1   :  { %v2342_v58 = vpop.f32.mrf.mxu0 }
 0x4d2   :  { %2535 = vmatpush2.bf16.msra.mxu1 %v2491_v59  ;;  %2470 = vst [vmem:[#allocation12 + $0x120] sm:$0xff] %v2422_v45  ;;  %v2425_v5 = vmax.f32 %v4932_v55, 0.0  ;;  %v4938_v26 = vadd.f32 %v4757_v41, %v2342_v58  ;;  %v4328_v59 = vld [vmem:[#allocation2 + $0x80] ss:$12 sps:$4 sm:$0xff]   ;;  %v4225_v55 = vld [vmem:[#allocation10 + $0x30] sm:$0xff]  }
 0x4d3   :  { %2536 = vmatprep.subr.bf16.mxu1 %v4533_v0  ;;  %v4331_v58 = vld [vmem:[#allocation2 + $0x10c] ss:$12 sps:$4 sm:$0xff]  }
 0x4d4   :  { %2473 = vst [vmem:[#allocation12 + $0x138] sm:$0xff] %v2425_v5  ;;  %v2423_v27 = vmax.f32 %v4938_v26, 0.0  ;;  %v2501_v33 = vpack.c.bf16 %v2425_v5, %v2424_v21  ;;  %v4326_v21 = vld [vmem:[#allocation2 + $0xd8] ss:$12 sps:$4 sm:$0xff]   ;;  %v4226_v5 = vld [vmem:[#allocation10 + $0x28] sm:$0xff]  }
 0x4d5   :  { %v4332_v26 = vld [vmem:[#allocation2 + $0xb0] ss:$12 sps:$4 sm:$0xff]  }
 0x4d6   :  { %2537 = vmatpush2.bf16.msra.mxu1 %v2490_v29  ;;  %2471 = vst [vmem:[#allocation12 + $0x128] sm:$0xff] %v2423_v27  ;;  %v2500_v28 = vpack.c.bf16 %v2423_v27, %v2422_v45  ;;  %v4330_v45 = vld [vmem:[#allocation2 + $0xf0] ss:$12 sps:$4 sm:$0xff]   ;;  %v4333_v29 = vld [vmem:[#allocation2 + $0xc8] ss:$12 sps:$4 sm:$0xff]  }
 0x4d7   :  { %v4334_v27 = vld [vmem:[#allocation2 + $0x108] ss:$12 sps:$4 sm:$0xff]  }
 0x4d9   :  { %2539 = vmatmul.mubr.bf16.vlgmr.msra.gmra.mxu1 %v4304_v35  ;;  %v4227_v35 = vld [vmem:[#allocation10 + $0x20] sm:$0xff]  }
 0x4da   :  { %2546 = vmatprep.mubr.bf16.mxu1 %v4305_v9  ;;  %v4335_v9 = vld [vmem:[#allocation2 + $0x124] ss:$12 sps:$4 sm:$0xff]  }
 0x4db   :  { %v3924_v57 = vpop.f32.mrf.mxu0 }
 0x4dc   :  { %v2364_v0 = vadd.f32 %v3924_v57, %v4757_v41  ;;  %v4228_v57 = vld [vmem:[#allocation10 + $0x18] sm:$0xff]  }
 0x4dd   :  { %v2355_v31 = vpop.f32.mrf.mxu0 }
 0x4de   :  { %v2428_v60 = vmax.f32 %v2364_v0, 0.0  ;;  %v2356_v25 = vadd.f32 %v4757_v41, %v2355_v31  ;;  %v4336_v0 = vld [vmem:[#allocation2 + $0xe0] ss:$12 sps:$4 sm:$0xff]   ;;  %v4337_v31 = vld [vmem:[#allocation2 + $0xf8] ss:$12 sps:$4 sm:$0xff]  }
 0x4df   :  { %v3925_v37 = vpop.f32.mrf.mxu0 }
 0x4e0   :  { %2476 = vst [vmem:[#allocation12 + $0x150] sm:$0xff] %v2428_v60  ;;  %v2426_v46 = vmax.f32 %v2356_v25, 0.0  ;;  %v2367_v63 = vadd.f32 %v3925_v37, %v4757_v41  ;;  %v4339_v25 = vld [vmem:[#allocation2 + $0x13c] ss:$12 sps:$4 sm:$0xff]  }
 0x4e1   :  { %v2358_v40 = vpop.f32.mrf.mxu0  ;;  %2547 = vmatmul.mubr.bf16.gmra.mxu1 %v4306_v51  ;;  %v4340_v37 = vld [vmem:[#allocation2 + $0x110] ss:$12 sps:$4 sm:$0xff]   ;;  %v4344_v51 = vld [vmem:[#allocation2 + $0x140] ss:$12 sps:$4 sm:$0xff]  }
 0x4e2   :  { %2474 = vst [vmem:[#allocation12 + $0x140] sm:$0xff] %v2426_v46  ;;  %v2429_v4 = vmax.f32 %v2367_v63, 0.0  ;;  %v2359_v8 = vadd.f32 %v4757_v41, %v2358_v40  ;;  %2554 = vmatprep.mubr.bf16.mxu1 %v4307_v12  ;;  %v4342_v63 = vld [vmem:[#allocation2 + $0x138] ss:$12 sps:$4 sm:$0xff]   ;;  %v4343_v40 = vld [vmem:[#allocation2 + $0x154] ss:$12 sps:$4 sm:$0xff]  }
 0x4e3   :  { %v4347_v12 = vld [vmem:[#allocation2 + $0x16c] ss:$12 sps:$4 sm:$0xff]  }
 0x4e4   :  { %2477 = vst [vmem:[#allocation12 + $0x158] sm:$0xff] %v2429_v4  ;;  %v2427_v61 = vmax.f32 %v2359_v8, 0.0  ;;  %v2503_v20 = vpack.c.bf16 %v2429_v4, %v2428_v60  ;;  %v4338_v60 = vld [vmem:[#allocation2 + $0x120] ss:$12 sps:$4 sm:$0xff]   ;;  %v4345_v4 = vld [vmem:[#allocation2 + $0x158] ss:$12 sps:$4 sm:$0xff]  }
 0x4e5   :  { %v4346_v8 = vld [vmem:[#allocation2 + $0x150] ss:$12 sps:$4 sm:$0xff]  }
 0x4e6   :  { %2475 = vst [vmem:[#allocation12 + $0x148] sm:$0xff] %v2427_v61 }
 0x4e9   :  { %2555 = vmatmul.mubr.bf16.gmra.mxu1 %v4308_v62  ;;  %v4349_v62 = vld [vmem:[#allocation2 + $0x188] ss:$12 sps:$4 sm:$0xff]  }
 0x4ea   :  { %2562 = vmatprep.mubr.bf16.mxu1 %v4309_v3  ;;  %v4350_v3 = vld [vmem:[#allocation2 + $0x168] ss:$12 sps:$4 sm:$0xff]  }
 0x4eb   :  { %v3928_v2 = vpop.f32.mrf.mxu0 }
 0x4ec   :  { %v2380_v13 = vadd.f32 %v3928_v2, %v4757_v41  ;;  %v4351_v2 = vld [vmem:[#allocation2 + $0x184] ss:$12 sps:$4 sm:$0xff]  }
 0x4ed   :  { %v2371_v15 = vpop.f32.mrf.mxu0 }
 0x4ee   :  { %v2432_v17 = vmax.f32 %v2380_v13, 0.0  ;;  %v2372_v43 = vadd.f32 %v4757_v41, %v2371_v15  ;;  %v4229_v13 = vld [vmem:[#allocation10 + $0x10] sm:$0xff]   ;;  %v4352_v15 = vld [vmem:[#allocation2 + $0x1a0] ss:$12 sps:$4 sm:$0xff]  }
 0x4ef   :  { %v3929_v47 = vpop.f32.mrf.mxu0 }
 0x4f0   :  { %2480 = vst [vmem:[#allocation12 + $0x170] sm:$0xff] %v2432_v17  ;;  %v2430_v34 = vmax.f32 %v2372_v43, 0.0  ;;  %v2383_v36 = vadd.f32 %v3929_v47, %v4757_v41  ;;  %v4230_v43 = vld [vmem:[#allocation10 + $0x8] sm:$0xff]  }
 0x4f1   :  { %v2374_v19 = vpop.f32.mrf.mxu0  ;;  %2563 = vmatmul.mubr.bf16.gmra.mxu1 %v4310_v16  ;;  %v4354_v47 = vld [vmem:[#allocation2 + $0x180] ss:$12 sps:$4 sm:$0xff]   ;;  %v4357_v16 = vld [vmem:[#allocation2 + $0x198] ss:$12 sps:$4 sm:$0xff]  }
 0x4f2   :  { %2478 = vst [vmem:[#allocation12 + $0x160] sm:$0xff] %v2430_v34  ;;  %v2433_v18 = vmax.f32 %v2383_v36, 0.0  ;;  %v2375_v22 = vadd.f32 %v4757_v41, %v2374_v19  ;;  %2570 = vmatprep.mubr.bf16.mxu1 %v4311_v38  ;;  %v2502_v41 = vpack.c.bf16 %v2427_v61, %v2426_v46  ;;  %v4341_v46 = vld [vmem:[#allocation2 + $0x128] ss:$12 sps:$4 sm:$0xff]   ;;  %v4348_v61 = vld [vmem:[#allocation2 + $0x170] ss:$12 sps:$4 sm:$0xff]  }
 0x4f3   :  { %v4231_v36 = vld [vmem:[#allocation10] sm:$0xff]   ;;  %v4356_v19 = vld [vmem:[#allocation2 + $0x1d0] ss:$12 sps:$4 sm:$0xff]   ;;  %v4360_v38 = vld [vmem:[#allocation2 + $0x1cc] ss:$12 sps:$4 sm:$0xff]  }
 0x4f4   :  { %2481 = vst [vmem:[#allocation12 + $0x178] sm:$0xff] %v2433_v18  ;;  %v2505_v32 = vpack.c.bf16 %v2433_v18, %v2432_v17  ;;  %v2431_v52 = vmax.f32 %v2375_v22, 0.0  ;;  %v4353_v17 = vld [vmem:[#allocation2 + $0x1b8] ss:$12 sps:$4 sm:$0xff]   ;;  %v4358_v18 = vld [vmem:[#allocation2 + $0x1b4] ss:$12 sps:$4 sm:$0xff]  }
 0x4f5   :  { %v4359_v22 = vld [vmem:[#allocation2 + $0x1b0] ss:$12 sps:$4 sm:$0xff]  }
 0x4f6   :  { %2479 = vst [vmem:[#allocation12 + $0x168] sm:$0xff] %v2431_v52  ;;  %v2504_v56 = vpack.c.bf16 %v2431_v52, %v2430_v34  ;;  %3930 = vmatprep.subr.bf16.mxu0 %v2505_v32  ;;  %4058 = vmatprep.subr.bf16.mxu1 %v2505_v32  ;;  %v4355_v34 = vld [vmem:[#allocation2 + $0x19c] ss:$12 sps:$4 sm:$0xff]   ;;  %v4362_v52 = vld [vmem:[#allocation2 + $0x1e4] ss:$12 sps:$4 sm:$0xff]  }
 0x4f7   :  { %3931 = vmatpush3.bf16.msra.mxu0 %v2505_v32  ;;  %4066 = vmatpush3.bf16.msra.mxu1 %v2505_v32  ;;  %v4361_v32 = vld [vmem:[#allocation2 + $0x1c8] ss:$12 sps:$4 sm:$0xff]  }
 0x4f8   :  { %3932 = vmatprep.subr.bf16.mxu0 %v2504_v56  ;;  %4059 = vmatprep.subr.bf16.mxu1 %v2504_v56 }
 0x4f9   :  { %2571 = vmatmul.mubr.bf16.gmra.mxu1 %v4312_v23  ;;  %v4365_v23 = vld [vmem:[#allocation2 + $0x1f8] ss:$12 sps:$4 sm:$0xff]  }
 0x4fa   :  { %2578 = vmatprep.mubr.bf16.mxu1 %v4313_v24  ;;  %v4366_v24 = vld [vmem:[#allocation2 + $0x214] ss:$12 sps:$4 sm:$0xff]  }
 0x4fb   :  { %3933 = vmatpush3.bf16.msra.mxu0 %v2504_v56  ;;  %4067 = vmatpush3.bf16.msra.mxu1 %v2504_v56  ;;  %v4363_v56 = vld [vmem:[#allocation2 + $0x1e0] ss:$12 sps:$4 sm:$0xff]  }
 0x4fc   :  { %3934 = vmatprep.subr.bf16.mxu0 %v2503_v20  ;;  %4060 = vmatprep.subr.bf16.mxu1 %v2503_v20 }
 0x4ff   :  { %3935 = vmatpush3.bf16.msra.mxu0 %v2503_v20  ;;  %4068 = vmatpush3.bf16.msra.mxu1 %v2503_v20  ;;  %v4364_v20 = vld [vmem:[#allocation2 + $0x1fc] ss:$12 sps:$4 sm:$0xff]  }
 0x500   :  { %3936 = vmatprep.subr.bf16.mxu0 %v2502_v41  ;;  %4061 = vmatprep.subr.bf16.mxu1 %v2502_v41 }
 0x501   :  { %2579 = vmatmul.mubr.bf16.gmra.mxu1 %v4314_v6  ;;  %v4368_v6 = vld [vmem:[#allocation2 + $0x22c] ss:$12 sps:$4 sm:$0xff]  }
 0x502   :  { %2586 = vmatprep.mubr.bf16.mxu1 %v4315_v30  ;;  %v4370_v30 = vld [vmem:[#allocation2 + $0x1e8] ss:$12 sps:$4 sm:$0xff]  }
 0x503   :  { %3937 = vmatpush3.bf16.msra.mxu0 %v2502_v41  ;;  %4069 = vmatpush3.bf16.msra.mxu1 %v2502_v41  ;;  %v4367_v41 = vld [vmem:[#allocation2 + $0x210] ss:$12 sps:$4 sm:$0xff]  }
 0x504   :  { %3938 = vmatprep.subr.bf16.mxu0 %v2501_v33  ;;  %4062 = vmatprep.subr.bf16.mxu1 %v2501_v33 }
 0x507   :  { %3939 = vmatpush3.bf16.msra.mxu0 %v2501_v33  ;;  %4070 = vmatpush3.bf16.msra.mxu1 %v2501_v33  ;;  %v4369_v33 = vld [vmem:[#allocation2 + $0x228] ss:$12 sps:$4 sm:$0xff]  }
 0x508   :  { %3940 = vmatprep.subr.bf16.mxu0 %v2500_v28  ;;  %4063 = vmatprep.subr.bf16.mxu1 %v2500_v28 }
 0x509   :  { %2587 = vmatmul.mubr.bf16.gmra.mxu1 %v4316_v39  ;;  %v4371_v39 = vld [vmem:[#allocation2 + $0x200] ss:$12 sps:$4 sm:$0xff]  }
 0x50a   :  { %2594 = vmatprep.mubr.bf16.mxu1 %v4317_v42  ;;  %v4372_v42 = vld [vmem:[#allocation2 + $0x218] ss:$12 sps:$4 sm:$0xff]  }
 0x50b   :  { %3941 = vmatpush3.bf16.msra.mxu0 %v2500_v28  ;;  %4071 = vmatpush3.bf16.msra.mxu1 %v2500_v28 }
 0x50c   :  { %3942 = vmatprep.subr.bf16.mxu0 %v4902_v49  ;;  %4064 = vmatprep.subr.bf16.mxu1 %v4902_v49 }
 0x50f   :  { %3943 = vmatpush3.bf16.msra.mxu0 %v4902_v49  ;;  %4072 = vmatpush3.bf16.msra.mxu1 %v4902_v49  ;;  %v4324_v49 = vld [vmem:[#allocation2 + $0x50] ss:$12 sps:$4 sm:$0xff]  }
 0x510   :  { %3944 = vmatprep.subr.bf16.mxu0 %v4904_v54  ;;  %4065 = vmatprep.subr.bf16.mxu1 %v4904_v54 }
 0x511   :  { %2595 = vmatmul.mubr.bf16.gmra.mxu1 %v4318_v50 }
 0x512   :  { %2602 = vmatprep.mubr.bf16.mxu1 %v4319_v1 }
 0x513   :  { %3945 = vmatpush3.bf16.msra.mxu0 %v4904_v54  ;;  %4073 = vmatpush3.bf16.msra.mxu1 %v4904_v54  ;;  %v4329_v54 = vld [vmem:[#allocation2 + $0x98] ss:$12 sps:$4 sm:$0xff]  }
 0x514   :  { %3994 = vmatprep.subr.bf16.mxu0 %v4224_v53 }
 0x516   :  { %3947 = vmatmul.mubr.bf16.vlgmr.msra.gmra.mxu0 %v4320_v44 }
 0x517   :  { %3950 = vmatprep.mubr.bf16.mxu0 %v4321_v7  ;;  %3995 = vmatpush3.bf16.msra.mxu0 %v4224_v53 }
 0x518   :  { %3996 = vmatprep.subr.bf16.mxu0 %v4225_v55 }
 0x519   :  { %2603 = vmatmul.mubr.bf16.gmra.mxu1 %v4322_v10  ;;  %v4373_v10 = vld [vmem:[#allocation2 + $0x230] ss:$12 sps:$4 sm:$0xff]  }
 0x51a   :  { %2610 = vmatprep.mubr.bf16.mxu1 %v4323_v14 }
 0x51b   :  { %3997 = vmatpush3.bf16.msra.mxu0 %v4225_v55 }
 0x51c   :  { %3998 = vmatprep.subr.bf16.mxu0 %v4226_v5 }
 0x51e   :  { %3951 = vmatmul.mubr.bf16.gmra.mxu0 %v4324_v49 }
 0x51f   :  { %3954 = vmatprep.mubr.bf16.mxu0 %v4325_v11  ;;  %3999 = vmatpush3.bf16.msra.mxu0 %v4226_v5 }
 0x520   :  { %4000 = vmatprep.subr.bf16.mxu0 %v4227_v35 }
 0x521   :  { %2611 = vmatmul.mubr.bf16.gmra.mxu1 %v4326_v21 }
 0x522   :  { %2618 = vmatprep.mubr.bf16.mxu1 %v4327_v48 }
 0x523   :  { %4001 = vmatpush3.bf16.msra.mxu0 %v4227_v35 }
 0x524   :  { %4002 = vmatprep.subr.bf16.mxu0 %v4228_v57 }
 0x526   :  { %3955 = vmatmul.mubr.bf16.gmra.mxu0 %v4328_v59 }
 0x527   :  { %3958 = vmatprep.mubr.bf16.mxu0 %v4329_v54  ;;  %4003 = vmatpush3.bf16.msra.mxu0 %v4228_v57 }
 0x528   :  { %4004 = vmatprep.subr.bf16.mxu0 %v4229_v13 }
 0x529   :  { %2619 = vmatmul.mubr.bf16.gmra.mxu1 %v4330_v45 }
 0x52a   :  { %2626 = vmatprep.mubr.bf16.mxu1 %v4331_v58 }
 0x52b   :  { %4005 = vmatpush3.bf16.msra.mxu0 %v4229_v13 }
 0x52c   :  { %4006 = vmatprep.subr.bf16.mxu0 %v4230_v43 }
 0x52e   :  { %3959 = vmatmul.mubr.bf16.gmra.mxu0 %v4332_v26 }
 0x52f   :  { %3962 = vmatprep.mubr.bf16.mxu0 %v4333_v29  ;;  %4007 = vmatpush3.bf16.msra.mxu0 %v4230_v43 }
 0x530   :  { %4008 = vmatprep.subr.bf16.mxu0 %v4231_v36 }
 0x531   :  { %2627 = vmatmul.mubr.bf16.gmra.mxu1 %v4334_v27 }
 0x532   :  { %2634 = vmatprep.mubr.bf16.mxu1 %v4335_v9 }
 0x533   :  { %4009 = vmatpush3.bf16.msra.mxu0 %v4231_v36 }
 0x536   :  { %3963 = vmatmul.mubr.bf16.gmra.mxu0 %v4336_v0 }
 0x537   :  { %3966 = vmatprep.mubr.bf16.mxu0 %v4337_v31 }
 0x539   :  { %2635 = vmatmul.mubr.bf16.gmra.mxu1 %v4338_v60 }
 0x53a   :  { %2642 = vmatprep.mubr.bf16.mxu1 %v4339_v25 }
 0x53e   :  { %3967 = vmatmul.mubr.bf16.gmra.mxu0 %v4340_v37 }
 0x53f   :  { %3970 = vmatprep.mubr.bf16.mxu0 %v4341_v46 }
 0x541   :  { %2643 = vmatmul.mubr.bf16.gmra.mxu1 %v4342_v63 }
 0x542   :  { %2650 = vmatprep.mubr.bf16.mxu1 %v4343_v40 }
 0x546   :  { %3971 = vmatmul.mubr.bf16.gmra.mxu0 %v4344_v51 }
 0x547   :  { %3974 = vmatprep.mubr.bf16.mxu0 %v4345_v4 }
 0x549   :  { %2651 = vmatmul.mubr.bf16.gmra.mxu1 %v4346_v8 }
 0x54a   :  { %2658 = vmatprep.mubr.bf16.mxu1 %v4347_v12 }
 0x54e   :  { %3975 = vmatmul.mubr.bf16.gmra.mxu0 %v4348_v61 }
 0x54f   :  { %3978 = vmatprep.mubr.bf16.mxu0 %v4349_v62 }
 0x551   :  { %2659 = vmatmul.mubr.bf16.gmra.mxu1 %v4350_v3 }
 0x552   :  { %2666 = vmatprep.mubr.bf16.mxu1 %v4351_v2 }
 0x556   :  { %3979 = vmatmul.mubr.bf16.gmra.mxu0 %v4352_v15 }
 0x557   :  { %3982 = vmatprep.mubr.bf16.mxu0 %v4353_v17 }
 0x559   :  { %2667 = vmatmul.mubr.bf16.gmra.mxu1 %v4354_v47 }
 0x55a   :  { %2674 = vmatprep.mubr.bf16.mxu1 %v4355_v34 }
 0x55e   :  { %3983 = vmatmul.mubr.bf16.gmra.mxu0 %v4356_v19 }
 0x561   :  { %2675 = vmatmul.mubr.bf16.gmra.mxu1 %v4357_v16 }
 0x562   :  { %2682 = vmatprep.mubr.bf16.mxu1 %v4358_v18 }
 0x569   :  { %2683 = vmatmul.mubr.bf16.gmra.mxu1 %v4359_v22 }
 0x56a   :  { %2690 = vmatprep.mubr.bf16.mxu1 %v4360_v38 }
 0x571   :  { %2691 = vmatmul.mubr.bf16.gmra.mxu1 %v4361_v32 }
 0x572   :  { %2698 = vmatprep.mubr.bf16.mxu1 %v4362_v52 }
 0x579   :  { %2699 = vmatmul.mubr.bf16.gmra.mxu1 %v4363_v56 }
 0x57a   :  { %2706 = vmatprep.mubr.bf16.mxu1 %v4364_v20 }
 0x581   :  { %2707 = vmatmul.mubr.bf16.gmra.mxu1 %v4365_v23 }
 0x582   :  { %2714 = vmatprep.mubr.bf16.mxu1 %v4366_v24 }
 0x589   :  { %2715 = vmatmul.mubr.bf16.gmra.mxu1 %v4367_v41 }
 0x58a   :  { %2722 = vmatprep.mubr.bf16.mxu1 %v4368_v6 }
 0x591   :  { %2723 = vmatmul.mubr.bf16.gmra.mxu1 %v4369_v33 }
 0x592   :  { %3986 = vmatprep.mubr.bf16.mxu1 %v4370_v30 }
 0x599   :  { %v2540_v28 = vpop.f32.mrf.mxu1  ;;  %3987 = vmatmul.mubr.bf16.vlgmr.msra.gmra.mxu1 %v4371_v39 }
 0x59a   :  { %3990 = vmatprep.mubr.bf16.mxu1 %v4372_v42 }
 0x59b   :  { %v2542_v50 = vpop.f32.mrf.mxu1 }
 0x59d   :  { %v2543_v1 = vpop.f32.mrf.mxu1 }
 0x59f   :  { %v2545_v44 = vpop.f32.mrf.mxu1 }
 0x5a1   :  { %v2548_v7 = vpop.f32.mrf.mxu1  ;;  %3991 = vmatmul.mubr.bf16.gmra.mxu1 %v4373_v10 }
 0x5a3   :  { %v2550_v14 = vpop.f32.mrf.mxu1 }
 0x5a5   :  { %v2551_v49 = vpop.f32.mrf.mxu1 }
 0x5a7   :  { %v2553_v11 = vpop.f32.mrf.mxu1 }
 0x5a9   :  { %v2556_v21 = vpop.f32.mrf.mxu1 }
 0x5ab   :  { %v2558_v48 = vpop.f32.mrf.mxu1 }
 0x5ad   :  { %v2559_v53 = vpop.f32.mrf.mxu1 }
 0x5af   :  { %v2561_v59 = vpop.f32.mrf.mxu1 }
 0x5b1   :  { %v2564_v54 = vpop.f32.mrf.mxu1 }
 0x5b3   :  { %v2566_v45 = vpop.f32.mrf.mxu1 }
 0x5b5   :  { %v2567_v55 = vpop.f32.mrf.mxu1 }
 0x5b7   :  { %v2569_v58 = vpop.f32.mrf.mxu1 }
 0x5b9   :  { %v2572_v5 = vpop.f32.mrf.mxu1 }
 0x5bb   :  { %v2574_v26 = vpop.f32.mrf.mxu1 }
 0x5bd   :  { %v2575_v29 = vpop.f32.mrf.mxu1 }
 0x5bf   :  { %v2577_v27 = vpop.f32.mrf.mxu1 }
 0x5c1   :  { %v2580_v35 = vpop.f32.mrf.mxu1 }
 0x5c3   :  { %v2582_v9 = vpop.f32.mrf.mxu1 }
 0x5c5   :  { %v2583_v57 = vpop.f32.mrf.mxu1 }
 0x5c7   :  { %v2585_v0 = vpop.f32.mrf.mxu1 }
 0x5c9   :  { %v4974_v31 = vpop.f32.mrf.mxu1 }
 0x5cb   :  { %v2590_v60 = vpop.f32.mrf.mxu1 }
 0x5cd   :  { %v2591_v25 = vpop.f32.mrf.mxu1 }
 0x5cf   :  { %v2593_v37 = vpop.f32.mrf.mxu1 }
 0x5d1   :  { %v2596_v46 = vpop.f32.mrf.mxu1 }
 0x5d3   :  { %v2598_v63 = vpop.f32.mrf.mxu1 }
 0x5d5   :  { %v2599_v40 = vpop.f32.mrf.mxu1 }
 0x5d6   :  { %v3948_v51 = vpop.f32.mrf.mxu0 }
 0x5d7   :  { %v2601_v4 = vpop.f32.mrf.mxu1  ;;  %v2774_v43 = vadd.f32 %v3948_v51, %v2548_v7 }
 0x5d8   :  { %v2765_v8 = vpop.f32.mrf.mxu0 }
 0x5d9   :  { %v4976_v12 = vpop.f32.mrf.mxu1  ;;  %v2766_v13 = vadd.f32 %v2765_v8, %v2540_v28 }
 0x5da   :  { %v3949_v61 = vpop.f32.mrf.mxu0 }
 0x5db   :  { %v2606_v62 = vpop.f32.mrf.mxu1  ;;  %v2777_v3 = vadd.f32 %v3949_v61, %v2551_v49 }
 0x5dc   :  { %v2768_v2 = vpop.f32.mrf.mxu0 }
 0x5dd   :  { %v2769_v15 = vadd.f32 %v2768_v2, %v2543_v1  ;;  %v4978_v17 = vpop.f32.mrf.mxu1  ;;  %v2957_v19 = vpack.c.bf16 %v2777_v3, %v2774_v43 }
 0x5de   :  { %v3952_v47 = vpop.f32.mrf.mxu0 }
 0x5df   :  { %v2956_v34 = vpack.c.bf16 %v2769_v15, %v2766_v13  ;;  %v2609_v36 = vpop.f32.mrf.mxu1  ;;  %v2790_v24 = vadd.f32 %v3952_v47, %v2564_v54 }
 0x5e0   :  { %v2781_v16 = vpop.f32.mrf.mxu0 }
 0x5e1   :  { %4010 = vmatprep.mubr.bf16.mxu0 %v2956_v34  ;;  %v2612_v18 = vpop.f32.mrf.mxu1  ;;  %v2782_v56 = vadd.f32 %v2781_v16, %v2556_v21 }
 0x5e2   :  { %4011 = vmatmul.mubr.bf16.vlgmr.msra.gmra.mxu0 %v2957_v19  ;;  %v3953_v22 = vpop.f32.mrf.mxu0 }
 0x5e3   :  { %v2614_v38 = vpop.f32.mrf.mxu1  ;;  %v2793_v32 = vadd.f32 %v3953_v22, %v2567_v55 }
 0x5e4   :  { %v2784_v52 = vpop.f32.mrf.mxu0 }
 0x5e5   :  { %v2785_v20 = vadd.f32 %v2784_v52, %v2559_v53  ;;  %v2615_v23 = vpop.f32.mrf.mxu1  ;;  %v2959_v30 = vpack.c.bf16 %v2793_v32, %v2790_v24 }
 0x5e6   :  { %v3956_v41 = vpop.f32.mrf.mxu0 }
 0x5e7   :  { %v2958_v6 = vpack.c.bf16 %v2785_v20, %v2782_v56  ;;  %v2617_v33 = vpop.f32.mrf.mxu1  ;;  %v2806_v49 = vadd.f32 %v3956_v41, %v2580_v35 }
 0x5e8   :  { %v2797_v28 = vpop.f32.mrf.mxu0 }
 0x5e9   :  { %4014 = vmatprep.mubr.bf16.mxu0 %v2958_v6  ;;  %v2620_v39 = vpop.f32.mrf.mxu1  ;;  %v2798_v7 = vadd.f32 %v2797_v28, %v2572_v5 }
 0x5ea   :  { %4015 = vmatmul.mubr.bf16.gmra.mxu0 %v2959_v30  ;;  %v3957_v42 = vpop.f32.mrf.mxu0 }
 0x5eb   :  { %v2622_v50 = vpop.f32.mrf.mxu1  ;;  %v2809_v1 = vadd.f32 %v3957_v42, %v2583_v57 }
 0x5ec   :  { %v2800_v44 = vpop.f32.mrf.mxu0 }
 0x5ed   :  { %v2801_v10 = vadd.f32 %v2800_v44, %v2575_v29  ;;  %v2623_v14 = vpop.f32.mrf.mxu1  ;;  %v2961_v53 = vpack.c.bf16 %v2809_v1, %v2806_v49 }
 0x5ee   :  { %v3960_v11 = vpop.f32.mrf.mxu0 }
 0x5ef   :  { %v2960_v21 = vpack.c.bf16 %v2801_v10, %v2798_v7  ;;  %v2625_v48 = vpop.f32.mrf.mxu1  ;;  %v2822_v5 = vadd.f32 %v3960_v11, %v2596_v46 }
 0x5f0   :  { %v2813_v59 = vpop.f32.mrf.mxu0 }
 0x5f1   :  { %4018 = vmatprep.mubr.bf16.mxu0 %v2960_v21  ;;  %v2628_v54 = vpop.f32.mrf.mxu1  ;;  %v2814_v27 = vadd.f32 %v2813_v59, %v4974_v31 }
 0x5f2   :  { %4019 = vmatmul.mubr.bf16.gmra.mxu0 %v2961_v53  ;;  %v3961_v45 = vpop.f32.mrf.mxu0 }
 0x5f3   :  { %v2630_v55 = vpop.f32.mrf.mxu1  ;;  %v2825_v58 = vadd.f32 %v3961_v45, %v2599_v40 }
 0x5f4   :  { %v2816_v26 = vpop.f32.mrf.mxu0 }
 0x5f5   :  { %v2817_v9 = vadd.f32 %v2816_v26, %v2591_v25  ;;  %v2631_v57 = vpop.f32.mrf.mxu1  ;;  %v2963_v60 = vpack.c.bf16 %v2825_v58, %v2822_v5 }
 0x5f6   :  { %v3964_v29 = vpop.f32.mrf.mxu0 }
 0x5f7   :  { %v2962_v0 = vpack.c.bf16 %v2817_v9, %v2814_v27  ;;  %v2633_v35 = vpop.f32.mrf.mxu1  ;;  %v2838_v25 = vadd.f32 %v3964_v29, %v2612_v18 }
 0x5f8   :  { %v2829_v37 = vpop.f32.mrf.mxu0 }
 0x5f9   :  { %4022 = vmatprep.mubr.bf16.mxu0 %v2962_v0  ;;  %v2636_v63 = vpop.f32.mrf.mxu1  ;;  %v2830_v40 = vadd.f32 %v2829_v37, %v4976_v12 }
 0x5fa   :  { %4023 = vmatmul.mubr.bf16.gmra.mxu0 %v2963_v60  ;;  %v3965_v51 = vpop.f32.mrf.mxu0 }
 0x5fb   :  { %v2638_v4 = vpop.f32.mrf.mxu1  ;;  %v2841_v8 = vadd.f32 %v3965_v51, %v2615_v23 }
 0x5fc   :  { %v2832_v61 = vpop.f32.mrf.mxu0 }
 0x5fd   :  { %v2639_v62 = vpop.f32.mrf.mxu1  ;;  %v2833_v31 = vadd.f32 %v2832_v61, %v4978_v17  ;;  %v2965_v13 = vpack.c.bf16 %v2841_v8, %v2838_v25 }
 0x5fe   :  { %v3968_v3 = vpop.f32.mrf.mxu0 }
 0x5ff   :  { %v2641_v46 = vpop.f32.mrf.mxu1  ;;  %v2964_v2 = vpack.c.bf16 %v2833_v31, %v2830_v40  ;;  %v2854_v12 = vadd.f32 %v3968_v3, %v2628_v54 }
 0x600   :  { %v2845_v15 = vpop.f32.mrf.mxu0 }
 0x601   :  { %v2644_v43 = vpop.f32.mrf.mxu1  ;;  %4026 = vmatprep.mubr.bf16.mxu0 %v2964_v2  ;;  %v2846_v22 = vadd.f32 %v2845_v15, %v2620_v39 }
 0x602   :  { %4027 = vmatmul.mubr.bf16.gmra.mxu0 %v2965_v13  ;;  %v3969_v47 = vpop.f32.mrf.mxu0 }
 0x603   :  { %v2646_v34 = vpop.f32.mrf.mxu1  ;;  %v2857_v36 = vadd.f32 %v3969_v47, %v2631_v57 }
 0x604   :  { %v2848_v19 = vpop.f32.mrf.mxu0 }
 0x605   :  { %v2647_v16 = vpop.f32.mrf.mxu1  ;;  %v2849_v38 = vadd.f32 %v2848_v19, %v2623_v14  ;;  %v2967_v18 = vpack.c.bf16 %v2857_v36, %v2854_v12 }
 0x606   :  { %v3972_v32 = vpop.f32.mrf.mxu0 }
 0x607   :  { %v2649_v52 = vpop.f32.mrf.mxu1  ;;  %v2966_v17 = vpack.c.bf16 %v2849_v38, %v2846_v22  ;;  %v2870_v42 = vadd.f32 %v3972_v32, %v2644_v43 }
 0x608   :  { %v2861_v56 = vpop.f32.mrf.mxu0 }
 0x609   :  { %v2652_v20 = vpop.f32.mrf.mxu1  ;;  %4030 = vmatprep.mubr.bf16.mxu0 %v2966_v17  ;;  %v2862_v30 = vadd.f32 %v2861_v56, %v2636_v63 }
 0x60a   :  { %4031 = vmatmul.mubr.bf16.gmra.mxu0 %v2967_v18  ;;  %v3973_v23 = vpop.f32.mrf.mxu0 }
 0x60b   :  { %v2654_v24 = vpop.f32.mrf.mxu1  ;;  %v2873_v41 = vadd.f32 %v3973_v23, %v2647_v16 }
 0x60c   :  { %v2864_v6 = vpop.f32.mrf.mxu0 }
 0x60d   :  { %v2655_v33 = vpop.f32.mrf.mxu1  ;;  %v2865_v28 = vadd.f32 %v2864_v6, %v2639_v62  ;;  %v2969_v44 = vpack.c.bf16 %v2873_v41, %v2870_v42 }
 0x60e   :  { %v3976_v50 = vpop.f32.mrf.mxu0 }
 0x60f   :  { %v2657_v39 = vpop.f32.mrf.mxu1  ;;  %v2968_v1 = vpack.c.bf16 %v2865_v28, %v2862_v30 }
 0x610   :  { %v2877_v7 = vpop.f32.mrf.mxu0 }
 0x611   :  { %v2660_v10 = vpop.f32.mrf.mxu1  ;;  %4034 = vmatprep.mubr.bf16.mxu0 %v2968_v1  ;;  %v2878_v48 = vadd.f32 %v2877_v7, %v2652_v20 }
 0x612   :  { %4035 = vmatmul.mubr.bf16.gmra.mxu0 %v2969_v44  ;;  %v3977_v14 = vpop.f32.mrf.mxu0  ;;  %v2886_v59 = vadd.f32 %v3976_v50, %v2660_v10 }
 0x613   :  { %v2662_v49 = vpop.f32.mrf.mxu1 }
 0x614   :  { %v2880_v11 = vpop.f32.mrf.mxu0 }
 0x615   :  { %v2663_v21 = vpop.f32.mrf.mxu1  ;;  %v2881_v53 = vadd.f32 %v2880_v11, %v2655_v33 }
 0x616   :  { %v2889_v54 = vadd.f32 %v3977_v14, %v2663_v21  ;;  %v3980_v45 = vpop.f32.mrf.mxu0 }
 0x617   :  { %v2665_v55 = vpop.f32.mrf.mxu1  ;;  %v2970_v58 = vpack.c.bf16 %v2881_v53, %v2878_v48 }
 0x618   :  { %v2971_v26 = vpack.c.bf16 %v2889_v54, %v2886_v59  ;;  %v2893_v27 = vpop.f32.mrf.mxu0 }
 0x619   :  { %v2668_v9 = vpop.f32.mrf.mxu1  ;;  %4038 = vmatprep.mubr.bf16.mxu0 %v2970_v58 }
 0x61a   :  { %4039 = vmatmul.mubr.bf16.gmra.mxu0 %v2971_v26  ;;  %v3981_v57 = vpop.f32.mrf.mxu0  ;;  %v2894_v35 = vadd.f32 %v2893_v27, %v2668_v9 }
 0x61b   :  { %v2670_v5 = vpop.f32.mrf.mxu1 }
 0x61c   :  { %v2896_v29 = vpop.f32.mrf.mxu0 }
 0x61d   :  { %v2671_v0 = vpop.f32.mrf.mxu1 }
 0x61e   :  { %v2897_v60 = vadd.f32 %v2896_v29, %v2671_v0  ;;  %v3984_v63 = vpop.f32.mrf.mxu0 }
 0x61f   :  { %v2673_v37 = vpop.f32.mrf.mxu1 }
 0x620   :  { %v2972_v51 = vpack.c.bf16 %v2897_v60, %v2894_v35  ;;  %v2909_v61 = vpop.f32.mrf.mxu0  ;;  %v4986_v60 = vld [vmem:[%s5055_s7] ss:$0 sm:$0xff]  ;;  %s4534_s7 = smov [#allocation12]  }
 0x621   :  { %v2676_v4 = vpop.f32.mrf.mxu1  ;;  %s3341_s16 = sshll.u32 %s4534_s7, 4  ;;  %s3342_s16 = int_to_ptr.vmem [resolvable:$true] %s3341_s16 }
 0x622   :  { %4042 = vmatprep.mubr.bf16.mxu0 %v2972_v51  ;;  %v2902_v62 = vadd.f32 %v3980_v45, %v2676_v4  ;;  %v3985_v3 = vpop.f32.mrf.mxu0  ;;  %s4474_s17 = scalar_lea.vmem %s3342_s16, 6144  ;;  %p4479_p12 = scmp.lt.s32.totalorder %s3342_s16, %s3342_s16 }
 0x623   :  { %v2678_v8 = vpop.f32.mrf.mxu1  ;;  %p4475_p11 = scmp.ne.s32.totalorder %s3342_s16, %s4474_s17  ;;  %p4480_p13 = scmp.lt.s32.totalorder %s4474_s17, %s4474_s17 }
 0x624   :  { %v2912_v15 = vpop.f32.mrf.mxu0 }
 0x625   :  { %v2679_v40 = vpop.f32.mrf.mxu1  ;;  %p4481_p0 = por %p4480_p13, %p4479_p12 }
 0x626   :  { %v2905_v31 = vadd.f32 %v3981_v57, %v2679_v40 }
 0x627   :  { %v2681_v25 = vpop.f32.mrf.mxu1  ;;  %p4482_p1 = pnand %p4481_p0, %p4475_p11 }
 0x628   :  { %v2973_v46 = vpack.c.bf16 %v2905_v31, %v2902_v62 }
 0x629   :  { %v2684_v2 = vpop.f32.mrf.mxu1 }
 0x62a   :  { %4043 = vmatmul.mubr.bf16.gmra.mxu0 %v2973_v46  ;;  %v2910_v47 = vadd.f32 %v2909_v61, %v2684_v2 }
 0x62b   :  { %v2686_v13 = vpop.f32.mrf.mxu1 }
 0x62d   :  { %v2687_v43 = vpop.f32.mrf.mxu1 }
 0x62e   :  { %v2913_v34 = vadd.f32 %v2912_v15, %v2687_v43 }
 0x62f   :  { %v2689_v36 = vpop.f32.mrf.mxu1 }
 0x630   :  { %v2974_v19 = vpack.c.bf16 %v2913_v34, %v2910_v47 }
 0x631   :  { %v2692_v16 = vpop.f32.mrf.mxu1 }
 0x632   :  { %4046 = vmatprep.mubr.bf16.mxu0 %v2974_v19  ;;  %v2918_v12 = vadd.f32 %v3984_v63, %v2692_v16 }
 0x633   :  { %v2694_v22 = vpop.f32.mrf.mxu1 }
 0x635   :  { %v2695_v38 = vpop.f32.mrf.mxu1 }
 0x636   :  { %v2921_v32 = vadd.f32 %v3985_v3, %v2695_v38 }
 0x637   :  { %v2697_v52 = vpop.f32.mrf.mxu1 }
 0x638   :  { %v2975_v17 = vpack.c.bf16 %v2921_v32, %v2918_v12 }
 0x639   :  { %v2700_v18 = vpop.f32.mrf.mxu1 }
 0x63a   :  { %4047 = vmatmul.mubr.bf16.gmra.mxu0 %v2975_v17 }
 0x63b   :  { %v2702_v56 = vpop.f32.mrf.mxu1 }
 0x63d   :  { %v2703_v20 = vpop.f32.mrf.mxu1 }
 0x63f   :  { %v2705_v23 = vpop.f32.mrf.mxu1 }
 0x641   :  { %v2708_v24 = vpop.f32.mrf.mxu1 }
 0x643   :  { %v2710_v41 = vpop.f32.mrf.mxu1 }
 0x645   :  { %v2711_v6 = vpop.f32.mrf.mxu1 }
 0x647   :  { %v2713_v33 = vpop.f32.mrf.mxu1 }
 0x649   :  { %v2716_v30 = vpop.f32.mrf.mxu1 }
 0x64b   :  { %v2718_v28 = vpop.f32.mrf.mxu1 }
 0x64d   :  { %v2719_v42 = vpop.f32.mrf.mxu1 }
 0x64f   :  { %v2721_v50 = vpop.f32.mrf.mxu1 }
 0x651   :  { %v2724_v39 = vpop.f32.mrf.mxu1 }
 0x653   :  { %v2726_v1 = vpop.f32.mrf.mxu1 }
 0x655   :  { %v2727_v44 = vpop.f32.mrf.mxu1 }
 0x657   :  { %v2729_v7 = vpop.f32.mrf.mxu1 }
 0x659   :  { %v3988_v10 = vpop.f32.mrf.mxu1 }
 0x65a   :  { %v2934_v59 = vadd.f32 %v3988_v10, %v2708_v24 }
 0x65b   :  { %v2925_v14 = vpop.f32.mrf.mxu1 }
 0x65c   :  { %v2926_v48 = vadd.f32 %v2925_v14, %v2700_v18 }
 0x65d   :  { %v3989_v49 = vpop.f32.mrf.mxu1 }
 0x65e   :  { %v2937_v11 = vadd.f32 %v3989_v49, %v2711_v6 }
 0x65f   :  { %v2928_v21 = vpop.f32.mrf.mxu1 }
 0x660   :  { %v2929_v53 = vadd.f32 %v2928_v21, %v2703_v20  ;;  %v2977_v55 = vpack.c.bf16 %v2937_v11, %v2934_v59 }
 0x661   :  { %v3992_v54 = vpop.f32.mrf.mxu1 }
 0x662   :  { %v2976_v45 = vpack.c.bf16 %v2929_v53, %v2926_v48  ;;  %v2950_v29 = vadd.f32 %v3992_v54, %v2724_v39 }
 0x663   :  { %v2941_v58 = vpop.f32.mrf.mxu1 }
 0x664   :  { %4050 = vmatprep.mubr.bf16.mxu0 %v2976_v45  ;;  %v2942_v57 = vadd.f32 %v2941_v58, %v2716_v30 }
 0x665   :  { %4051 = vmatmul.mubr.bf16.gmra.mxu0 %v2977_v55  ;;  %v3993_v26 = vpop.f32.mrf.mxu1 }
 0x666   :  { %v2953_v27 = vadd.f32 %v3993_v26, %v2727_v44 }
 0x667   :  { %v2944_v9 = vpop.f32.mrf.mxu1 }
 0x668   :  { %v2945_v5 = vadd.f32 %v2944_v9, %v2719_v42  ;;  %v2979_v35 = vpack.c.bf16 %v2953_v27, %v2950_v29 }
 0x66a   :  { %v2978_v0 = vpack.c.bf16 %v2945_v5, %v2942_v57 }
 0x66c   :  { %4054 = vmatprep.mubr.bf16.mxu0 %v2978_v0 }
 0x66d   :  { %4055 = vmatmul.mubr.bf16.gmra.mxu0 %v2979_v35 }
 0x6a2   :  { %v4012_v37 = vpop.f32.mrf.mxu0 }
 0x6a3   :  { %v3094_v63 = vadd.f32 %v4012_v37, %v4986_v60 }
 0x6a4   :  { %v3085_v51 = vpop.f32.mrf.mxu0 }
 0x6a5   :  { %3278 = vst [vmem:[#allocation11 + $0x10] sm:$0xff] %v3094_v63  ;;  %v3086_v4 = vadd.f32 %v4986_v60, %v3085_v51 }
 0x6a6   :  { %v4013_v8 = vpop.f32.mrf.mxu0 }
 0x6a7   :  { %3276 = vst [vmem:[#allocation11] sm:$0xff] %v3086_v4  ;;  %v3097_v61 = vadd.f32 %v4013_v8, %v4986_v60 }
 0x6a8   :  { %v3088_v40 = vpop.f32.mrf.mxu0 }
 0x6a9   :  { %3279 = vst [vmem:[#allocation11 + $0x18] sm:$0xff] %v3097_v61  ;;  %v3089_v62 = vadd.f32 %v4986_v60, %v3088_v40 }
 0x6aa   :  { %v4016_v31 = vpop.f32.mrf.mxu0 }
 0x6ab   :  { %3277 = vst [vmem:[#allocation11 + $0x8] sm:$0xff] %v3089_v62  ;;  %v3110_v25 = vadd.f32 %v4016_v31, %v4986_v60 }
 0x6ac   :  { %v3101_v3 = vpop.f32.mrf.mxu0 }
 0x6ad   :  { %3282 = vst [vmem:[#allocation11 + $0x30] sm:$0xff] %v3110_v25  ;;  %v3102_v46 = vadd.f32 %v4986_v60, %v3101_v3 }
 0x6ae   :  { %v4017_v2 = vpop.f32.mrf.mxu0 }
 0x6af   :  { %3280 = vst [vmem:[#allocation11 + $0x20] sm:$0xff] %v3102_v46  ;;  %v3113_v13 = vadd.f32 %v4017_v2, %v4986_v60 }
 0x6b0   :  { %v3104_v15 = vpop.f32.mrf.mxu0 }
 0x6b1   :  { %3283 = vst [vmem:[#allocation11 + $0x38] sm:$0xff] %v3113_v13  ;;  %v3105_v43 = vadd.f32 %v4986_v60, %v3104_v15 }
 0x6b2   :  { %v4020_v47 = vpop.f32.mrf.mxu0 }
 0x6b3   :  { %3281 = vst [vmem:[#allocation11 + $0x28] sm:$0xff] %v3105_v43  ;;  %v3126_v34 = vadd.f32 %v4020_v47, %v4986_v60 }
 0x6b4   :  { %v3117_v36 = vpop.f32.mrf.mxu0 }
 0x6b5   :  { %3286 = vst [vmem:[#allocation11 + $0x50] sm:$0xff] %v3126_v34  ;;  %v3118_v19 = vadd.f32 %v4986_v60, %v3117_v36 }
 0x6b6   :  { %v4021_v16 = vpop.f32.mrf.mxu0 }
 0x6b7   :  { %3284 = vst [vmem:[#allocation11 + $0x40] sm:$0xff] %v3118_v19  ;;  %v3129_v22 = vadd.f32 %v4021_v16, %v4986_v60 }
 0x6b8   :  { %v3120_v38 = vpop.f32.mrf.mxu0 }
 0x6b9   :  { %4485 = shalt.err (!%p4482_p1)
}
 0x6ba   :  { %s4535_s18 = smov 128   ;;  %s4536_s19 = smov 8   ;;  %3287 = vst [vmem:[#allocation11 + $0x58] sm:$0xff] %v3129_v22  ;;  %v3121_v12 = vadd.f32 %v4986_v60, %v3120_v38  ;;  %v4024_v32 = vpop.f32.mrf.mxu0 }
 0x6bb   :  { %3347 = dma.vmem_to_hbm [thread:$0]  %s3342_s16, 6144, %s5057_s9, [#allocation13], %s4535_s18, %s4535_s18, %s4536_s19   ;;  %v3142_v52 = vadd.f32 %v4024_v32, %v4986_v60 }
 0x6bc   :  { %3285 = vst [vmem:[#allocation11 + $0x48] sm:$0xff] %v3121_v12  ;;  %v3133_v17 = vpop.f32.mrf.mxu0  ;;  %s4537_s9 = smov [#allocation11]  }
 0x6bd   :  { %3290 = vst [vmem:[#allocation11 + $0x70] sm:$0xff] %v3142_v52  ;;  %v3134_v18 = vadd.f32 %v4986_v60, %v3133_v17  ;;  %s3329_s22 = sshll.u32 %s4537_s9, 4  ;;  %s3330_s22 = int_to_ptr.vmem [resolvable:$true] %s3329_s22 }
 0x6be   :  { %v4025_v56 = vpop.f32.mrf.mxu0  ;;  %s4494_s1 = scalar_lea.vmem %s3330_s22, 6144  ;;  %p4499_p3 = scmp.lt.s32.totalorder %s3330_s22, %s3330_s22 }
 0x6bf   :  { %3288 = vst [vmem:[#allocation11 + $0x60] sm:$0xff] %v3134_v18  ;;  %v3145_v20 = vadd.f32 %v4025_v56, %v4986_v60  ;;  %p4495_p2 = scmp.ne.s32.totalorder %s3330_s22, %s4494_s1  ;;  %p4500_p4 = scmp.lt.s32.totalorder %s4494_s1, %s4494_s1 }
 0x6c0   :  { %v3136_v23 = vpop.f32.mrf.mxu0 }
 0x6c1   :  { %3291 = vst [vmem:[#allocation11 + $0x78] sm:$0xff] %v3145_v20  ;;  %v3137_v24 = vadd.f32 %v4986_v60, %v3136_v23  ;;  %p4501_p5 = por %p4500_p4, %p4499_p3 }
 0x6c2   :  { %v4028_v41 = vpop.f32.mrf.mxu0 }
 0x6c3   :  { %3289 = vst [vmem:[#allocation11 + $0x68] sm:$0xff] %v3137_v24  ;;  %v3158_v6 = vadd.f32 %v4028_v41, %v4986_v60  ;;  %p4502_p6 = pnand %p4501_p5, %p4495_p2 }
 0x6c4   :  { %v3149_v33 = vpop.f32.mrf.mxu0 }
 0x6c5   :  { %3294 = vst [vmem:[#allocation11 + $0x90] sm:$0xff] %v3158_v6  ;;  %v3150_v30 = vadd.f32 %v4986_v60, %v3149_v33 }
 0x6c6   :  { %v4029_v28 = vpop.f32.mrf.mxu0 }
 0x6c7   :  { %3292 = vst [vmem:[#allocation11 + $0x80] sm:$0xff] %v3150_v30  ;;  %v3161_v42 = vadd.f32 %v4029_v28, %v4986_v60 }
 0x6c8   :  { %v3152_v50 = vpop.f32.mrf.mxu0 }
 0x6c9   :  { %3295 = vst [vmem:[#allocation11 + $0x98] sm:$0xff] %v3161_v42  ;;  %v3153_v39 = vadd.f32 %v4986_v60, %v3152_v50 }
 0x6ca   :  { %v4032_v1 = vpop.f32.mrf.mxu0 }
 0x6cb   :  { %3293 = vst [vmem:[#allocation11 + $0x88] sm:$0xff] %v3153_v39  ;;  %v3174_v44 = vadd.f32 %v4032_v1, %v4986_v60 }
 0x6cc   :  { %v3165_v7 = vpop.f32.mrf.mxu0 }
 0x6cd   :  { %3298 = vst [vmem:[#allocation11 + $0xb0] sm:$0xff] %v3174_v44  ;;  %v3166_v10 = vadd.f32 %v4986_v60, %v3165_v7 }
 0x6ce   :  { %v4033_v14 = vpop.f32.mrf.mxu0 }
 0x6cf   :  { %3296 = vst [vmem:[#allocation11 + $0xa0] sm:$0xff] %v3166_v10  ;;  %v3177_v49 = vadd.f32 %v4033_v14, %v4986_v60 }
 0x6d0   :  { %v3168_v11 = vpop.f32.mrf.mxu0 }
 0x6d1   :  { %3299 = vst [vmem:[#allocation11 + $0xb8] sm:$0xff] %v3177_v49  ;;  %v3169_v21 = vadd.f32 %v4986_v60, %v3168_v11 }
 0x6d2   :  { %v4036_v48 = vpop.f32.mrf.mxu0 }
 0x6d3   :  { %3297 = vst [vmem:[#allocation11 + $0xa8] sm:$0xff] %v3169_v21  ;;  %v3190_v53 = vadd.f32 %v4036_v48, %v4986_v60 }
 0x6d4   :  { %v3181_v59 = vpop.f32.mrf.mxu0 }
 0x6d5   :  { %3302 = vst [vmem:[#allocation11 + $0xd0] sm:$0xff] %v3190_v53  ;;  %v3182_v54 = vadd.f32 %v4986_v60, %v3181_v59 }
 0x6d6   :  { %v4037_v45 = vpop.f32.mrf.mxu0 }
 0x6d7   :  { %3300 = vst [vmem:[#allocation11 + $0xc0] sm:$0xff] %v3182_v54  ;;  %v3193_v55 = vadd.f32 %v4037_v45, %v4986_v60 }
 0x6d8   :  { %v3184_v58 = vpop.f32.mrf.mxu0 }
 0x6d9   :  { %3303 = vst [vmem:[#allocation11 + $0xd8] sm:$0xff] %v3193_v55  ;;  %v3185_v26 = vadd.f32 %v4986_v60, %v3184_v58 }
 0x6da   :  { %v4040_v27 = vpop.f32.mrf.mxu0 }
 0x6db   :  { %3301 = vst [vmem:[#allocation11 + $0xc8] sm:$0xff] %v3185_v26  ;;  %v3206_v9 = vadd.f32 %v4040_v27, %v4986_v60 }
 0x6dc   :  { %v3197_v57 = vpop.f32.mrf.mxu0 }
 0x6dd   :  { %3306 = vst [vmem:[#allocation11 + $0xf0] sm:$0xff] %v3206_v9  ;;  %v3198_v5 = vadd.f32 %v4986_v60, %v3197_v57 }
 0x6de   :  { %v4041_v29 = vpop.f32.mrf.mxu0 }
 0x6df   :  { %3304 = vst [vmem:[#allocation11 + $0xe0] sm:$0xff] %v3198_v5  ;;  %v3209_v0 = vadd.f32 %v4041_v29, %v4986_v60 }
 0x6e0   :  { %v3200_v35 = vpop.f32.mrf.mxu0 }
 0x6e1   :  { %3307 = vst [vmem:[#allocation11 + $0xf8] sm:$0xff] %v3209_v0  ;;  %v3201_v37 = vadd.f32 %v4986_v60, %v3200_v35 }
 0x6e3   :  { %3305 = vst [vmem:[#allocation11 + $0xe8] sm:$0xff] %v3201_v37 }
 0x6ea   :  { %v4044_v63 = vpop.f32.mrf.mxu0 }
 0x6eb   :  { %v3222_v51 = vadd.f32 %v4044_v63, %v4986_v60 }
 0x6ec   :  { %v3213_v4 = vpop.f32.mrf.mxu0 }
 0x6ed   :  { %3310 = vst [vmem:[#allocation11 + $0x110] sm:$0xff] %v3222_v51  ;;  %v3214_v8 = vadd.f32 %v4986_v60, %v3213_v4 }
 0x6ee   :  { %v4045_v61 = vpop.f32.mrf.mxu0 }
 0x6ef   :  { %3308 = vst [vmem:[#allocation11 + $0x100] sm:$0xff] %v3214_v8  ;;  %v3225_v40 = vadd.f32 %v4045_v61, %v4986_v60 }
 0x6f0   :  { %v3216_v62 = vpop.f32.mrf.mxu0 }
 0x6f1   :  { %3311 = vst [vmem:[#allocation11 + $0x118] sm:$0xff] %v3225_v40  ;;  %v3217_v31 = vadd.f32 %v4986_v60, %v3216_v62 }
 0x6f3   :  { %3309 = vst [vmem:[#allocation11 + $0x108] sm:$0xff] %v3217_v31 }
 0x6fa   :  { %v4048_v25 = vpop.f32.mrf.mxu0 }
 0x6fb   :  { %v3238_v3 = vadd.f32 %v4048_v25, %v4986_v60 }
 0x6fc   :  { %v3229_v46 = vpop.f32.mrf.mxu0 }
 0x6fd   :  { %3314 = vst [vmem:[#allocation11 + $0x130] sm:$0xff] %v3238_v3  ;;  %v3230_v2 = vadd.f32 %v4986_v60, %v3229_v46 }
 0x6fe   :  { %v4049_v13 = vpop.f32.mrf.mxu0 }
 0x6ff   :  { %3312 = vst [vmem:[#allocation11 + $0x120] sm:$0xff] %v3230_v2  ;;  %v3241_v15 = vadd.f32 %v4049_v13, %v4986_v60 }
 0x700   :  { %v3232_v43 = vpop.f32.mrf.mxu0 }
 0x701   :  { %3315 = vst [vmem:[#allocation11 + $0x138] sm:$0xff] %v3241_v15  ;;  %v3233_v47 = vadd.f32 %v4986_v60, %v3232_v43 }
 0x703   :  { %3313 = vst [vmem:[#allocation11 + $0x128] sm:$0xff] %v3233_v47 }
 0x725   :  { %v4052_v34 = vpop.f32.mrf.mxu0 }
 0x726   :  { %v3254_v36 = vadd.f32 %v4052_v34, %v4986_v60 }
 0x727   :  { %v3245_v19 = vpop.f32.mrf.mxu0 }
 0x728   :  { %3318 = vst [vmem:[#allocation11 + $0x150] sm:$0xff] %v3254_v36  ;;  %v3246_v16 = vadd.f32 %v4986_v60, %v3245_v19 }
 0x729   :  { %v4053_v22 = vpop.f32.mrf.mxu0 }
 0x72a   :  { %3316 = vst [vmem:[#allocation11 + $0x140] sm:$0xff] %v3246_v16  ;;  %v3257_v38 = vadd.f32 %v4053_v22, %v4986_v60 }
 0x72b   :  { %v3248_v12 = vpop.f32.mrf.mxu0 }
 0x72c   :  { %3319 = vst [vmem:[#allocation11 + $0x158] sm:$0xff] %v3257_v38  ;;  %v3249_v32 = vadd.f32 %v4986_v60, %v3248_v12 }
 0x72d   :  { %v4056_v52 = vpop.f32.mrf.mxu0 }
 0x72e   :  { %3317 = vst [vmem:[#allocation11 + $0x148] sm:$0xff] %v3249_v32  ;;  %v3270_v17 = vadd.f32 %v4056_v52, %v4986_v60 }
 0x72f   :  { %v3261_v18 = vpop.f32.mrf.mxu0 }
 0x730   :  { %3322 = vst [vmem:[#allocation11 + $0x170] sm:$0xff] %v3270_v17  ;;  %v3262_v56 = vadd.f32 %v4986_v60, %v3261_v18 }
 0x731   :  { %v4057_v20 = vpop.f32.mrf.mxu0 }
 0x732   :  { %3320 = vst [vmem:[#allocation11 + $0x160] sm:$0xff] %v3262_v56  ;;  %v3273_v23 = vadd.f32 %v4057_v20, %v4986_v60 }
 0x733   :  { %v3264_v24 = vpop.f32.mrf.mxu0 }
 0x734   :  { %3323 = vst [vmem:[#allocation11 + $0x178] sm:$0xff] %v3273_v23  ;;  %v3265_v41 = vadd.f32 %v4986_v60, %v3264_v24 }
 0x736   :  { %3321 = vst [vmem:[#allocation11 + $0x168] sm:$0xff] %v3265_v41 }
 0x737   :  { %4505 = shalt.err (!%p4502_p6)
}
 0x738   :  { %3335 = dma.vmem_to_hbm [thread:$0]  %s3330_s22, 6144, %s5056_s8, [#allocation4], %s4535_s18, %s4535_s18, %s4536_s19  }
 0x739   :  { %4520 = dma.done.wait [#allocation4], 6144  }
 0x73a   :  { %4521 = vsyncadd [#allocation4], 4294961152 }
 0x73b   :  { %4522 = dma.done.wait [#allocation13], 6144  }
 0x73c   :  { %4523 = vsyncadd [#allocation13], 4294961152 }
 0x73d   :  { %3354 = vsyncpa [#allocation3], 1 }
 0x73e   :  { %3355 = vsyncpa [#allocation6], 1 }
 0x73f   :  { %3356 = vsyncpa [#allocation9], 1 }
 0x740   :  { %3357 = vsyncpa [#allocation4], 1 }
 0x741   :  { %3358 = vsyncpa [#allocation13], 1 }

</bundles_post_ra>
